<compile_context>
chip_gen: v5e
topology: v5e:2x2
jax: 0.10.0
libtpu: 0.0.40
codegen_flags: <defaults>
</compile_context>

<pallas_src>
import functools

import jax
import jax.numpy as jnp
from jax import lax
from jax.experimental import pallas as pl
from jax.experimental.pallas import tpu as pltpu


def _round_up(n, m):
    return ((n + m - 1) // m) * m


def _chip_vmem_bytes():
    try:
        info = pltpu.get_tpu_info()
        v = getattr(info, "vmem_capacity_bytes", None)
        if v:
            return int(v)
    except Exception:
        pass
    return 64 * 1024 * 1024  # conservative (v7x-sized) default


def _pick_row_tile(hw, cap=1024, min_steps=1):
    """Largest divisor of hw that is a multiple of 128 (else 32), <= cap and
    gives at least `min_steps` grid steps; falls back to the full extent."""
    for quantum in (128, 32):
        best = None
        t = quantum
        while t <= min(cap, hw):
            if hw % t == 0 and (hw // t) >= min_steps:
                best = t
            t += quantum
        if best is not None:
            return best
    if min_steps > 1:
        return _pick_row_tile(hw, cap=cap, min_steps=1)
    return hw


def _pick_tile_and_vmem(hw, cin, cout_pad, na, no, zdim, feat_bytes, batch):
    """Chip-aware row tile + scoped-VMEM limit with a rough budget check."""
    vmem_cap = _chip_vmem_bytes()
    if vmem_cap >= 100 * 1024 * 1024:      # v5e / v6e (128 MiB physical)
        cap, limit = 2048, 64 * 1024 * 1024
    else:                                  # v7x (64 MiB per TensorCore)
        cap, limit = 1024, 40 * 1024 * 1024
    min_steps = 2 if batch == 1 else 1     # keep both v7x TCs fed when B == 1
    while True:
        t = _pick_row_tile(hw, cap=cap, min_steps=min_steps)
        est = (2 * t * cin * 2                      # double-buffered bf16 x tile
               + 2 * cin * cout_pad * 2             # resident bf16 weight
               + 2 * cout_pad * 4                   # bias
               + 2 * t * na * no * feat_bytes       # feat out (double-buffered)
               + 2 * t * na * zdim * 4              # z out (double-buffered)
               + t * cout_pad * 4                   # f32 matmul intermediate
               + (2 << 20))                         # slack
        if est <= int(0.8 * limit) or cap <= 32:
            return t, limit
        cap //= 2


# ---------------------------------------------------------------------------
# Fused inference kernel:
#   y  = x_bf16 @ w'_bf16 + b'            (ImplicitA/M + conv bias pre-folded)
#   feat[b, a, hw, :no] = y[:, a*no_pad : a*no_pad+no]   (training-layout out)
#   z[b, a, hw, :]      = [xy, w, h, obj, cls] decode     (inference output)
# ---------------------------------------------------------------------------
def _ibin_fused_kernel(x_ref, w_ref, b_ref, feat_ref, z_ref, *,
                       na, no, no_pad, nc, bin_count, width, row_tile,
                       stride, anchors, reg_scale=2.0, bin_min=0.0, bin_max=4.0):
    L = bin_count + 1
    step = (bin_max - bin_min) / bin_count
    n_tail = nc + 1                                        # obj + classes

    x = x_ref[0]                                           # (T, Cin) bf16
    y = jnp.dot(x, w_ref[...], preferred_element_type=jnp.float32)
    y = y + b_ref[...]                                     # (T, na*no_pad) f32
    T = y.shape[0]

    # ---- grid coords derived in-kernel (no aux DMA / wrapper meshgrid) -----
    lin = lax.broadcasted_iota(jnp.int32, (T, 1), 0) + pl.program_id(1) * row_tile
    q = jnp.floor((lin.astype(jnp.float32) + 0.5) * (1.0 / width)).astype(jnp.int32)
    r = lin - q * width
    q = q + (r >= width).astype(jnp.int32) - (r < 0).astype(jnp.int32)  # exact
    r = lin - q * width
    gx = r.astype(jnp.float32)                             # (T, 1) column idx
    gy = q.astype(jnp.float32)                             # (T, 1) row idx

    # ---- per-anchor views: no_pad multiple of 128 -> lane-aligned, free ----
    ya = [y[:, a * no_pad:a * no_pad + no_pad] for a in range(na)]

    # training-layout feature map (raw logits), bf16 store halves HBM write
    for a in range(na):
        feat_ref[0, a, :, :] = ya[a][:, :no].astype(feat_ref.dtype)

    # ---- decode, batched across anchors along the sublane axis -------------
    xy_log = jnp.concatenate([v[:, 0:2] for v in ya], axis=0)            # (naT,2)
    tail_log = jnp.concatenate(
        [v[:, 2 + 2 * L:2 + 2 * L + n_tail] for v in ya], axis=0)        # (naT,nc+1)
    reg_log = jnp.concatenate([v[:, 2:3] for v in ya]
                              + [v[:, 2 + L:3 + L] for v in ya], axis=0)  # (2naT,1)
    bin_log = jnp.concatenate([v[:, 3:3 + bin_count] for v in ya]
                              + [v[:, 3 + L:3 + L + bin_count] for v in ya],
                              axis=0)                                     # (2naT,bc)

    s_xy = jax.nn.sigmoid(xy_log)
    s_tail = jax.nn.sigmoid(tail_log)
    s_reg = jax.nn.sigmoid(reg_log)

    # xy decode (grid tiled once over anchors along sublanes)
    gxy = jnp.concatenate([gx, gy], axis=1)                               # (T,2)
    gxy_all = jnp.concatenate([gxy] * na, axis=0)                         # (naT,2)
    pxy = (s_xy * 2.0 - 0.5 + gxy_all) * stride

    # SigmoidBin decode for w and h of every anchor in a single pass.  Argmax
    # runs on the pre-sigmoid logits (identical by monotonicity) so sigmoid is
    # only evaluated on the nc+5 columns that need it.
    pred_reg = (s_reg * reg_scale - reg_scale * 0.5) * step
    mx = jnp.max(bin_log, axis=-1, keepdims=True)
    lane = lax.broadcasted_iota(jnp.int32, bin_log.shape, 1)
    idx = jnp.min(jnp.where(bin_log == mx, lane, bin_count),
                  axis=-1, keepdims=True)                   # first argmax
    bin_bias = bin_min + (2.0 * idx.astype(jnp.float32) + 1.0) * (step * 0.5)
    wh = jnp.clip(pred_reg + bin_bias, bin_min, bin_max)                  # (2naT,1)

    # z assembled via static column stores (no narrow 5-way concatenate)
    for a in range(na):
        r0, r1 = a * T, (a + 1) * T
        z_ref[0, a, :, 0:2] = pxy[r0:r1]
        z_ref[0, a, :, 2:3] = wh[r0:r1] * anchors[a][0]
        z_ref[0, a, :, 3:4] = wh[na * T + r0:na * T + r1] * anchors[a][1]
        z_ref[0, a, :, 4:4 + n_tail] = s_tail[r0:r1]


# Training path: matmul + bias, written directly in (B, na, HW, no) layout.
def _conv_feat_kernel(x_ref, w_ref, b_ref, feat_ref, *, na, no, no_pad):
    x = x_ref[0]
    y = jnp.dot(x, w_ref[...], preferred_element_type=jnp.float32) + b_ref[...]
    for a in range(na):
        feat_ref[0, a, :, :] = y[:, a * no_pad:a * no_pad + no].astype(feat_ref.dtype)


def ibin_fused_level(x3, w_pad, b_pad, *, na, no, no_pad, nc, bin_count,
                     stride, anchors, width, feat_dtype):
    B, HW, Cin = x3.shape
    cout = w_pad.shape[1]
    zdim = nc + 5
    feat_bytes = jnp.dtype(feat_dtype).itemsize
    T, vmem_limit = _pick_tile_and_vmem(HW, Cin, cout, na, no, zdim, feat_bytes, B)
    kernel = functools.partial(
        _ibin_fused_kernel, na=na, no=no, no_pad=no_pad, nc=nc,
        bin_count=bin_count, width=int(width), row_tile=T,
        stride=float(stride), anchors=tuple(anchors))
    cost = pl.CostEstimate(
        flops=2 * B * HW * Cin * cout,
        transcendentals=B * HW * na * (nc + 5),
        bytes_accessed=(B * HW * Cin * 2 + Cin * cout * 2 + cout * 4
                        + B * na * HW * no * feat_bytes
                        + B * na * HW * zdim * 4))
    return pl.pallas_call(
        kernel,
        out_shape=(jax.ShapeDtypeStruct((B, na, HW, no), feat_dtype),
                   jax.ShapeDtypeStruct((B, na, HW, zdim), jnp.float32)),
        grid_spec=pltpu.PrefetchScalarGridSpec(
            num_scalar_prefetch=0,
            grid=(B, HW // T),
            in_specs=[
                pl.BlockSpec((1, T, Cin), lambda b, j: (b, j, 0)),
                pl.BlockSpec((Cin, cout), lambda b, j: (0, 0)),
                pl.BlockSpec((1, cout), lambda b, j: (0, 0)),
            ],
            out_specs=[
                pl.BlockSpec((1, na, T, no), lambda b, j: (b, 0, j, 0)),
                pl.BlockSpec((1, na, T, zdim), lambda b, j: (b, 0, j, 0)),
            ],
        ),
        compiler_params=pltpu.CompilerParams(
            dimension_semantics=("parallel", "parallel"),
            vmem_limit_bytes=vmem_limit),
        cost_estimate=cost,
    )(x3, w_pad, b_pad)


def conv_feat_level(x3, w_pad, b_pad, *, na, no, no_pad, feat_dtype):
    B, HW, Cin = x3.shape
    cout = w_pad.shape[1]
    feat_bytes = jnp.dtype(feat_dtype).itemsize
    T, vmem_limit = _pick_tile_and_vmem(HW, Cin, cout, na, no, 0, feat_bytes, B)
    kernel = functools.partial(_conv_feat_kernel, na=na, no=no, no_pad=no_pad)
    cost = pl.CostEstimate(
        flops=2 * B * HW * Cin * cout, transcendentals=0,
        bytes_accessed=(B * HW * Cin * 2 + Cin * cout * 2 + cout * 4
                        + B * na * HW * no * feat_bytes))
    return pl.pallas_call(
        kernel,
        out_shape=jax.ShapeDtypeStruct((B, na, HW, no), feat_dtype),
        grid_spec=pltpu.PrefetchScalarGridSpec(
            num_scalar_prefetch=0,
            grid=(B, HW // T),
            in_specs=[
                pl.BlockSpec((1, T, Cin), lambda b, j: (b, j, 0)),
                pl.BlockSpec((Cin, cout), lambda b, j: (0, 0)),
                pl.BlockSpec((1, cout), lambda b, j: (0, 0)),
            ],
            out_specs=pl.BlockSpec((1, na, T, no), lambda b, j: (b, 0, j, 0)),
        ),
        compiler_params=pltpu.CompilerParams(
            dimension_semantics=("parallel", "parallel"),
            vmem_limit_bytes=vmem_limit),
        cost_estimate=cost,
    )(x3, w_pad, b_pad)


# ---------------------------------------------------------------------------
# IBin module (JAX/Pallas version)
# ---------------------------------------------------------------------------
class IBinPallas:
    def __init__(self, nc=80, anchors=(), ch=(), bin_count=21, key=None,
                 feat_dtype=jnp.bfloat16):
        self.nc = nc
        self.bin_count = bin_count
        self.length = bin_count + 1                  # SigmoidBin.get_length()
        self.no = nc + 3 + 2 * self.length
        self.no_pad = _round_up(self.no, 128)        # 128-lane aligned anchors
        self.nl = len(anchors)
        self.na = len(anchors[0]) // 2
        self.feat_dtype = feat_dtype
        self.anchors = jnp.asarray(anchors, jnp.float32).reshape(self.nl, -1, 2)
        self.anchor_pairs = [
            tuple((float(anchors[l][2 * a]), float(anchors[l][2 * a + 1]))
                  for a in range(self.na))
            for l in range(self.nl)]
        self.stride = None
        self.training = False
        self.export = False

        # Deterministic synthetic parameters matching nn.Conv2d(x, no*na, 1),
        # ImplicitA(x), ImplicitM(no*na); folded once at init and scattered
        # into 128-lane-aligned per-anchor column blocks for the kernel.
        cout = self.no * self.na
        cout_pad = self.no_pad * self.na
        keys = jax.random.split(key, self.nl)
        self.params = []       # padded (kernel) weights
        self.ref_params = []   # unpadded (reference) weights
        for i, cin in enumerate(ch):
            kw, kb, ka, km = jax.random.split(keys[i], 4)
            w = jax.random.normal(kw, (cin, cout), jnp.float32) * 0.1
            b = jax.random.normal(kb, (1, cout), jnp.float32) * 0.1
            ia = jax.random.normal(ka, (1, cin), jnp.float32) * 0.02
            im = 1.0 + jax.random.normal(km, (1, cout), jnp.float32) * 0.02
            # ((x + ia) @ w + b) * im == x @ (w*im) + ((ia @ w + b) * im)
            w_fold = (w * im).astype(jnp.bfloat16)
            b_fold = ((ia @ w + b) * im).astype(jnp.float32)
            pad = self.no_pad - self.no
            w_pad = jnp.pad(w_fold.reshape(cin, self.na, self.no),
                            ((0, 0), (0, 0), (0, pad))).reshape(cin, cout_pad)
            b_pad = jnp.pad(b_fold.reshape(1, self.na, self.no),
                            ((0, 0), (0, 0), (0, pad))).reshape(1, cout_pad)
            self.params.append((w_pad, b_pad))
            self.ref_params.append((w_fold, b_fold))

    def __call__(self, xs):
        training = self.training or self.export
        if not training:
            assert self.stride is not None, "stride must be set for inference"
        outs, zs = [], []
        for i in range(self.nl):
            x = xs[i]                                # NCHW (B, Cin, H, W)
            B, Cin, H, W = x.shape
            HW = H * W
            w_pad, b_pad = self.params[i]
            # TODO(synk): feed NHWC from upstream to drop this transpose pass.
            x3 = jnp.transpose(x, (0, 2, 3, 1)).astype(jnp.bfloat16) \
                    .reshape(B, HW, Cin)

            if training:
                feat = conv_feat_level(x3, w_pad, b_pad, na=self.na, no=self.no,
                                       no_pad=self.no_pad,
                                       feat_dtype=self.feat_dtype)
                outs.append(feat.reshape(B, self.na, H, W, self.no))
            else:
                feat, z = ibin_fused_level(
                    x3, w_pad, b_pad, na=self.na, no=self.no,
                    no_pad=self.no_pad, nc=self.nc, bin_count=self.bin_count,
                    stride=self.stride[i], anchors=self.anchor_pairs[i],
                    width=W, feat_dtype=self.feat_dtype)
                outs.append(feat.reshape(B, self.na, H, W, self.no))
                zs.append(z.reshape(B, self.na * HW, self.nc + 5))

        if training:
            return outs
        return jnp.concatenate(zs, axis=1), outs


# ---------------------------------------------------------------------------
# Pure-JAX reference (mirrors the PyTorch decode math).  Uses the same folded
# bf16 weights (unpadded) so decode inputs are precision-matched.
# ---------------------------------------------------------------------------
def reference_forward(model, xs):
    bmin, bmax = 0.0, 4.0
    bc = model.bin_count
    step = (bmax - bmin) / bc
    bins = bmin + step / 2.0 + step * jnp.arange(bc, dtype=jnp.float32)
    reg_scale = 2.0
    L = bc + 1

    outs, zs = [], []
    for i in range(model.nl):
        x = xs[i]
        B, Cin, H, W = x.shape
        w_q, b_fold = model.ref_params[i]
        xm = jnp.transpose(x, (0, 2, 3, 1)).astype(jnp.bfloat16).reshape(-1, Cin)
        ym = jnp.dot(xm, w_q, preferred_element_type=jnp.float32) + b_fold
        feat = jnp.transpose(ym.reshape(B, H, W, model.na, model.no),
                             (0, 3, 1, 2, 4))        # (B, na, H, W, no)
        outs.append(feat)

        sig = jax.nn.sigmoid(feat)
        gy, gx = jnp.meshgrid(jnp.arange(H), jnp.arange(W), indexing='ij')
        grid = jnp.stack([gx, gy], -1).astype(jnp.float32)[None, None]
        xy = (sig[..., 0:2] * 2.0 - 0.5 + grid) * model.stride[i]

        def sbin(pred_sig, pred_logit):
            pred_reg = (pred_sig[..., 0] * reg_scale - reg_scale / 2.0) * step
            idx = jnp.argmax(pred_logit[..., 1:1 + bc], axis=-1)
            return jnp.clip(pred_reg + bins[idx], bmin, bmax)

        anc = model.anchors[i][None, :, None, None, :]
        pw = sbin(sig[..., 2:2 + L], feat[..., 2:2 + L]) * anc[..., 0]
        ph = sbin(sig[..., 2 + L:2 + 2 * L], feat[..., 2 + L:2 + 2 * L]) * anc[..., 1]
        y = jnp.concatenate([xy, pw[..., None], ph[..., None],
                             sig[..., 2 + 2 * L:]], axis=-1)
        zs.append(y.reshape(B, -1, model.nc + 5))
    return jnp.concatenate(zs, 1), outs


if __name__ == "__main__":
    nc = 2
    anchors = ((10, 13, 16, 30, 33, 23), (30, 61, 62, 45, 59, 119))
    ch = (8, 16)
    B = 2
    spatial = (8, 4)

    model = IBinPallas(nc=nc, anchors=anchors, ch=ch, bin_count=21,
                       key=jax.random.PRNGKey(1))
    model.stride = (8.0, 16.0)
    model.training = False            # exercise the fused inference path

    data_keys = jax.random.split(jax.random.PRNGKey(0), len(ch))
    xs = [jax.random.normal(data_keys[i], (B, ch[i], spatial[i], spatial[i]),
                            jnp.float32)
          for i in range(len(ch))]

    z, x_out = model(xs)
    jax.block_until_ready(z)
    for t in x_out:
        jax.block_until_ready(t)

    z_ref, x_ref_out = reference_forward(model, xs)
    assert jnp.allclose(z, z_ref, atol=3e-3, rtol=3e-3)
    # feat is emitted in bf16 (HBM-write optimization) -> looser tolerance
    for a, r in zip(x_out, x_ref_out):
        assert jnp.allclose(a.astype(jnp.float32), r, atol=1e-2, rtol=1e-2)

    # training path (conv-only kernel) returns raw permuted feature maps
    model.training = True
    outs_train = model(xs)
    for t in outs_train:
        jax.block_until_ready(t)
    for a, r in zip(outs_train, x_ref_out):
        assert jnp.allclose(a.astype(jnp.float32), r, atol=1e-2, rtol=1e-2)
    model.training = False

    print("KERNEL_OK")
</pallas_src>

<mosaic_0001>
module attributes {stable_mosaic.version = 11 : i64} {
  func.func @_ibin_fused_kernel(%arg0: i32, %arg1: i32, %arg2: memref<1x64x8xbf16, #tpu.memory_space<vmem>>, %arg3: memref<8x384xbf16, #tpu.memory_space<vmem>>, %arg4: memref<1x384xf32, #tpu.memory_space<vmem>>, %arg5: memref<1x3x64x49xbf16, #tpu.memory_space<vmem>>, %arg6: memref<1x3x64x7xf32, #tpu.memory_space<vmem>>) attributes {dimension_semantics = [#tpu.dimension_semantics<parallel>, #tpu.dimension_semantics<parallel>], iteration_bounds = array<i64: 2, 1>, scalar_prefetch = 0 : i64, scratch_operands = 0 : i64, tpu.core_type = #tpu.core_type<tc>, window_params = [{transform_indices = @transform_0, window_bounds = array<i64: 1, 64, 8>}, {pipeline_mode = #tpu.pipeline_mode<synchronous>, transform_indices = @transform_1, window_bounds = array<i64: 8, 384>}, {pipeline_mode = #tpu.pipeline_mode<synchronous>, transform_indices = @transform_2, window_bounds = array<i64: 1, 384>}, {transform_indices = @transform_3, window_bounds = array<i64: 1, 3, 64, 49>}, {transform_indices = @transform_4, window_bounds = array<i64: 1, 3, 64, 7>}]} {
    %c0 = arith.constant 0 : index
    %c0_0 = arith.constant 0 : index
    %c0_1 = arith.constant 0 : index
    %0 = vector.load %arg2[%c0, %c0_0, %c0_1] : memref<1x64x8xbf16, #tpu.memory_space<vmem>>, vector<1x64x8xbf16>
    %1 = vector.shape_cast %0 : vector<1x64x8xbf16> to vector<64x8xbf16>
    %c0_2 = arith.constant 0 : index
    %c0_3 = arith.constant 0 : index
    %2 = vector.load %arg3[%c0_2, %c0_3] : memref<8x384xbf16, #tpu.memory_space<vmem>>, vector<8x384xbf16>
    %cst = arith.constant dense<0.000000e+00> : vector<64x384xf32>
    %3 = tpu.matmul %1, %2, %cst {dimension_numbers = #tpu.dot_dimension_numbers<[1], [0], [0], [1], [0, 0, 1, 1], [], []>} : vector<64x8xbf16>, vector<8x384xbf16>, vector<64x384xf32> -> vector<64x384xf32>
    %c0_4 = arith.constant 0 : index
    %c0_5 = arith.constant 0 : index
    %4 = vector.load %arg4[%c0_4, %c0_5] : memref<1x384xf32, #tpu.memory_space<vmem>>, vector<1x384xf32>
    %5 = vector.broadcast %4 : vector<1x384xf32> to vector<64x384xf32>
    %6 = arith.addf %3, %5 : vector<64x384xf32>
    %7 = tpu.iota {dimensions = array<i32: 0>} : vector<64x1xi32>
    %c64_i32 = arith.constant 64 : i32
    %8 = arith.muli %arg1, %c64_i32 : i32
    %9 = vector.broadcast %8 : i32 to vector<64x1xi32>
    %10 = arith.addi %7, %9 : vector<64x1xi32>
    %11 = arith.sitofp %10 : vector<64x1xi32> to vector<64x1xf32>
    %cst_6 = arith.constant 5.000000e-01 : f32
    %12 = vector.broadcast %cst_6 : f32 to vector<64x1xf32>
    %13 = arith.addf %11, %12 : vector<64x1xf32>
    %cst_7 = arith.constant 1.250000e-01 : f32
    %14 = vector.broadcast %cst_7 : f32 to vector<64x1xf32>
    %15 = arith.mulf %13, %14 : vector<64x1xf32>
    %16 = math.floor %15 : vector<64x1xf32>
    %17 = arith.fptosi %16 : vector<64x1xf32> to vector<64x1xi32>
    %c8_i32 = arith.constant 8 : i32
    %18 = vector.broadcast %c8_i32 : i32 to vector<64x1xi32>
    %19 = arith.muli %17, %18 : vector<64x1xi32>
    %20 = arith.subi %10, %19 : vector<64x1xi32>
    %c8_i32_8 = arith.constant 8 : i32
    %21 = vector.broadcast %c8_i32_8 : i32 to vector<64x1xi32>
    %22 = arith.cmpi sge, %20, %21 : vector<64x1xi32>
    %23 = arith.extui %22 : vector<64x1xi1> to vector<64x1xi32>
    %24 = arith.addi %17, %23 : vector<64x1xi32>
    %c0_i32 = arith.constant 0 : i32
    %25 = vector.broadcast %c0_i32 : i32 to vector<64x1xi32>
    %26 = arith.cmpi slt, %20, %25 : vector<64x1xi32>
    %27 = arith.extui %26 : vector<64x1xi1> to vector<64x1xi32>
    %28 = arith.subi %24, %27 : vector<64x1xi32>
    %c8_i32_9 = arith.constant 8 : i32
    %29 = vector.broadcast %c8_i32_9 : i32 to vector<64x1xi32>
    %30 = arith.muli %28, %29 : vector<64x1xi32>
    %31 = arith.subi %10, %30 : vector<64x1xi32>
    %32 = arith.sitofp %31 : vector<64x1xi32> to vector<64x1xf32>
    %33 = arith.sitofp %28 : vector<64x1xi32> to vector<64x1xf32>
    %34 = vector.extract_strided_slice %6 {offsets = [0, 0], sizes = [64, 128], strides = [1, 1]} : vector<64x384xf32> to vector<64x128xf32>
    %35 = vector.extract_strided_slice %6 {offsets = [0, 128], sizes = [64, 128], strides = [1, 1]} : vector<64x384xf32> to vector<64x128xf32>
    %36 = vector.extract_strided_slice %6 {offsets = [0, 256], sizes = [64, 128], strides = [1, 1]} : vector<64x384xf32> to vector<64x128xf32>
    %37 = vector.extract_strided_slice %34 {offsets = [0, 0], sizes = [64, 49], strides = [1, 1]} : vector<64x128xf32> to vector<64x49xf32>
    %38 = arith.truncf %37 : vector<64x49xf32> to vector<64x49xbf16>
    %c0_10 = arith.constant 0 : index
    %c0_11 = arith.constant 0 : index
    %c0_12 = arith.constant 0 : index
    %c0_13 = arith.constant 0 : index
    %39 = vector.load %arg5[%c0_10, %c0_11, %c0_12, %c0_13] : memref<1x3x64x49xbf16, #tpu.memory_space<vmem>>, vector<1x1x64x49xbf16>
    %40 = vector.shape_cast %39 : vector<1x1x64x49xbf16> to vector<64x49xbf16>
    %41 = vector.shape_cast %38 : vector<64x49xbf16> to vector<1x1x64x49xbf16>
    tpu.vector_store %arg5[%c0_10, %c0_11, %c0_12, %c0_13], %41 {strides = array<i32>} : memref<1x3x64x49xbf16, #tpu.memory_space<vmem>>, vector<1x1x64x49xbf16>,
    %42 = vector.extract_strided_slice %35 {offsets = [0, 0], sizes = [64, 49], strides = [1, 1]} : vector<64x128xf32> to vector<64x49xf32>
    %43 = arith.truncf %42 : vector<64x49xf32> to vector<64x49xbf16>
    %c0_14 = arith.constant 0 : index
    %c1 = arith.constant 1 : index
    %c0_15 = arith.constant 0 : index
    %c0_16 = arith.constant 0 : index
    %44 = vector.load %arg5[%c0_14, %c1, %c0_15, %c0_16] : memref<1x3x64x49xbf16, #tpu.memory_space<vmem>>, vector<1x1x64x49xbf16>
    %45 = vector.shape_cast %44 : vector<1x1x64x49xbf16> to vector<64x49xbf16>
    %46 = vector.shape_cast %43 : vector<64x49xbf16> to vector<1x1x64x49xbf16>
    tpu.vector_store %arg5[%c0_14, %c1, %c0_15, %c0_16], %46 {strides = array<i32>} : memref<1x3x64x49xbf16, #tpu.memory_space<vmem>>, vector<1x1x64x49xbf16>,
    %47 = vector.extract_strided_slice %36 {offsets = [0, 0], sizes = [64, 49], strides = [1, 1]} : vector<64x128xf32> to vector<64x49xf32>
    %48 = arith.truncf %47 : vector<64x49xf32> to vector<64x49xbf16>
    %c0_17 = arith.constant 0 : index
    %c2 = arith.constant 2 : index
    %c0_18 = arith.constant 0 : index
    %c0_19 = arith.constant 0 : index
    %49 = vector.load %arg5[%c0_17, %c2, %c0_18, %c0_19] : memref<1x3x64x49xbf16, #tpu.memory_space<vmem>>, vector<1x1x64x49xbf16>
    %50 = vector.shape_cast %49 : vector<1x1x64x49xbf16> to vector<64x49xbf16>
    %51 = vector.shape_cast %48 : vector<64x49xbf16> to vector<1x1x64x49xbf16>
    tpu.vector_store %arg5[%c0_17, %c2, %c0_18, %c0_19], %51 {strides = array<i32>} : memref<1x3x64x49xbf16, #tpu.memory_space<vmem>>, vector<1x1x64x49xbf16>,
    %52 = vector.extract_strided_slice %34 {offsets = [0, 0], sizes = [64, 2], strides = [1, 1]} : vector<64x128xf32> to vector<64x2xf32>
    %53 = vector.extract_strided_slice %35 {offsets = [0, 0], sizes = [64, 2], strides = [1, 1]} : vector<64x128xf32> to vector<64x2xf32>
    %54 = vector.extract_strided_slice %36 {offsets = [0, 0], sizes = [64, 2], strides = [1, 1]} : vector<64x128xf32> to vector<64x2xf32>
    %55 = tpu.concatenate %52, %53, %54 in 0 : vector<64x2xf32>, vector<64x2xf32>, vector<64x2xf32> -> vector<192x2xf32>
    %56 = vector.extract_strided_slice %34 {offsets = [0, 46], sizes = [64, 3], strides = [1, 1]} : vector<64x128xf32> to vector<64x3xf32>
    %57 = vector.extract_strided_slice %35 {offsets = [0, 46], sizes = [64, 3], strides = [1, 1]} : vector<64x128xf32> to vector<64x3xf32>
    %58 = vector.extract_strided_slice %36 {offsets = [0, 46], sizes = [64, 3], strides = [1, 1]} : vector<64x128xf32> to vector<64x3xf32>
    %59 = tpu.concatenate %56, %57, %58 in 0 : vector<64x3xf32>, vector<64x3xf32>, vector<64x3xf32> -> vector<192x3xf32>
    %60 = vector.extract_strided_slice %34 {offsets = [0, 2], sizes = [64, 1], strides = [1, 1]} : vector<64x128xf32> to vector<64x1xf32>
    %61 = vector.extract_strided_slice %35 {offsets = [0, 2], sizes = [64, 1], strides = [1, 1]} : vector<64x128xf32> to vector<64x1xf32>
    %62 = vector.extract_strided_slice %36 {offsets = [0, 2], sizes = [64, 1], strides = [1, 1]} : vector<64x128xf32> to vector<64x1xf32>
    %63 = vector.extract_strided_slice %34 {offsets = [0, 24], sizes = [64, 1], strides = [1, 1]} : vector<64x128xf32> to vector<64x1xf32>
    %64 = vector.extract_strided_slice %35 {offsets = [0, 24], sizes = [64, 1], strides = [1, 1]} : vector<64x128xf32> to vector<64x1xf32>
    %65 = vector.extract_strided_slice %36 {offsets = [0, 24], sizes = [64, 1], strides = [1, 1]} : vector<64x128xf32> to vector<64x1xf32>
    %66 = tpu.concatenate %60, %61, %62, %63, %64, %65 in 0 : vector<64x1xf32>, vector<64x1xf32>, vector<64x1xf32>, vector<64x1xf32>, vector<64x1xf32>, vector<64x1xf32> -> vector<384x1xf32>
    %67 = vector.extract_strided_slice %34 {offsets = [0, 3], sizes = [64, 21], strides = [1, 1]} : vector<64x128xf32> to vector<64x21xf32>
    %68 = vector.extract_strided_slice %35 {offsets = [0, 3], sizes = [64, 21], strides = [1, 1]} : vector<64x128xf32> to vector<64x21xf32>
    %69 = vector.extract_strided_slice %36 {offsets = [0, 3], sizes = [64, 21], strides = [1, 1]} : vector<64x128xf32> to vector<64x21xf32>
    %70 = vector.extract_strided_slice %34 {offsets = [0, 25], sizes = [64, 21], strides = [1, 1]} : vector<64x128xf32> to vector<64x21xf32>
    %71 = vector.extract_strided_slice %35 {offsets = [0, 25], sizes = [64, 21], strides = [1, 1]} : vector<64x128xf32> to vector<64x21xf32>
    %72 = vector.extract_strided_slice %36 {offsets = [0, 25], sizes = [64, 21], strides = [1, 1]} : vector<64x128xf32> to vector<64x21xf32>
    %73 = tpu.concatenate %67, %68, %69, %70, %71, %72 in 0 : vector<64x21xf32>, vector<64x21xf32>, vector<64x21xf32>, vector<64x21xf32>, vector<64x21xf32>, vector<64x21xf32> -> vector<384x21xf32>
    %74 = arith.negf %55 : vector<192x2xf32>
    %75 = math.exp %74 : vector<192x2xf32>
    %cst_20 = arith.constant 1.000000e+00 : f32
    %76 = vector.broadcast %cst_20 : f32 to vector<192x2xf32>
    %77 = arith.addf %76, %75 : vector<192x2xf32>
    %78 = arith.divf %76, %77 : vector<192x2xf32>
    %79 = arith.negf %59 : vector<192x3xf32>
    %80 = math.exp %79 : vector<192x3xf32>
    %cst_21 = arith.constant 1.000000e+00 : f32
    %81 = vector.broadcast %cst_21 : f32 to vector<192x3xf32>
    %82 = arith.addf %81, %80 : vector<192x3xf32>
    %83 = arith.divf %81, %82 : vector<192x3xf32>
    %84 = arith.negf %66 : vector<384x1xf32>
    %85 = math.exp %84 : vector<384x1xf32>
    %cst_22 = arith.constant 1.000000e+00 : f32
    %86 = vector.broadcast %cst_22 : f32 to vector<384x1xf32>
    %87 = arith.addf %86, %85 : vector<384x1xf32>
    %88 = arith.divf %86, %87 : vector<384x1xf32>
    %89 = tpu.concatenate %32, %33 in 1 : vector<64x1xf32>, vector<64x1xf32> -> vector<64x2xf32>
    %90 = tpu.concatenate %89, %89, %89 in 0 : vector<64x2xf32>, vector<64x2xf32>, vector<64x2xf32> -> vector<192x2xf32>
    %cst_23 = arith.constant 2.000000e+00 : f32
    %91 = vector.broadcast %cst_23 : f32 to vector<192x2xf32>
    %92 = arith.mulf %78, %91 : vector<192x2xf32>
    %cst_24 = arith.constant 5.000000e-01 : f32
    %93 = vector.broadcast %cst_24 : f32 to vector<192x2xf32>
    %94 = arith.subf %92, %93 : vector<192x2xf32>
    %95 = arith.addf %94, %90 : vector<192x2xf32>
    %cst_25 = arith.constant 8.000000e+00 : f32
    %96 = vector.broadcast %cst_25 : f32 to vector<192x2xf32>
    %97 = arith.mulf %95, %96 : vector<192x2xf32>
    %cst_26 = arith.constant 2.000000e+00 : f32
    %98 = vector.broadcast %cst_26 : f32 to vector<384x1xf32>
    %99 = arith.mulf %88, %98 : vector<384x1xf32>
    %cst_27 = arith.constant 1.000000e+00 : f32
    %100 = vector.broadcast %cst_27 : f32 to vector<384x1xf32>
    %101 = arith.subf %99, %100 : vector<384x1xf32>
    %cst_28 = arith.constant 0.190476194 : f32
    %102 = vector.broadcast %cst_28 : f32 to vector<384x1xf32>
    %103 = arith.mulf %101, %102 : vector<384x1xf32>
    %cst_29 = arith.constant dense<0xFF800000> : vector<384xf32>
    %104 = vector.multi_reduction <maximumf>, %73, %cst_29 [1] : vector<384x21xf32> to vector<384xf32>
    %105 = vector.shape_cast %104 : vector<384xf32> to vector<384x1xf32>
    %106 = tpu.iota {dimensions = array<i32: 1>} : vector<384x21xi32>
    %107 = vector.broadcast %105 : vector<384x1xf32> to vector<384x21xf32>
    %108 = arith.cmpf oeq, %73, %107 : vector<384x21xf32>
    %c21_i32 = arith.constant 21 : i32
    %109 = vector.broadcast %c21_i32 : i32 to vector<384x21xi32>
    %110 = arith.select %108, %106, %109 : vector<384x21xi1>, vector<384x21xi32>
    %cst_30 = arith.constant dense<2147483647> : vector<384xi32>
    %111 = vector.multi_reduction <minsi>, %110, %cst_30 [1] : vector<384x21xi32> to vector<384xi32>
    %112 = vector.shape_cast %111 : vector<384xi32> to vector<384x1xi32>
    %113 = arith.sitofp %112 : vector<384x1xi32> to vector<384x1xf32>
    %cst_31 = arith.constant 2.000000e+00 : f32
    %114 = vector.broadcast %cst_31 : f32 to vector<384x1xf32>
    %115 = arith.mulf %114, %113 : vector<384x1xf32>
    %cst_32 = arith.constant 1.000000e+00 : f32
    %116 = vector.broadcast %cst_32 : f32 to vector<384x1xf32>
    %117 = arith.addf %115, %116 : vector<384x1xf32>
    %cst_33 = arith.constant 0.095238097 : f32
    %118 = vector.broadcast %cst_33 : f32 to vector<384x1xf32>
    %119 = arith.mulf %117, %118 : vector<384x1xf32>
    %cst_34 = arith.constant 0.000000e+00 : f32
    %120 = vector.broadcast %cst_34 : f32 to vector<384x1xf32>
    %121 = arith.addf %120, %119 : vector<384x1xf32>
    %122 = arith.addf %103, %121 : vector<384x1xf32>
    %cst_35 = arith.constant 0.000000e+00 : f32
    %cst_36 = arith.constant 4.000000e+00 : f32
    %123 = vector.broadcast %cst_35 : f32 to vector<384x1xf32>
    %124 = arith.maximumf %123, %122 : vector<384x1xf32>
    %125 = vector.broadcast %cst_36 : f32 to vector<384x1xf32>
    %126 = arith.minimumf %125, %124 : vector<384x1xf32>
    %127 = vector.extract_strided_slice %97 {offsets = [0, 0], sizes = [64, 2], strides = [1, 1]} : vector<192x2xf32> to vector<64x2xf32>
    %c0_37 = arith.constant 0 : index
    %c0_38 = arith.constant 0 : index
    %c0_39 = arith.constant 0 : index
    %c0_40 = arith.constant 0 : index
    %128 = vector.load %arg6[%c0_37, %c0_38, %c0_39, %c0_40] : memref<1x3x64x7xf32, #tpu.memory_space<vmem>>, vector<1x1x64x2xf32>
    %129 = vector.shape_cast %128 : vector<1x1x64x2xf32> to vector<64x2xf32>
    %130 = vector.shape_cast %127 : vector<64x2xf32> to vector<1x1x64x2xf32>
    tpu.vector_store %arg6[%c0_37, %c0_38, %c0_39, %c0_40], %130 {strides = array<i32>} : memref<1x3x64x7xf32, #tpu.memory_space<vmem>>, vector<1x1x64x2xf32>,
    %131 = vector.extract_strided_slice %126 {offsets = [0, 0], sizes = [64, 1], strides = [1, 1]} : vector<384x1xf32> to vector<64x1xf32>
    %cst_41 = arith.constant 1.000000e+01 : f32
    %132 = vector.broadcast %cst_41 : f32 to vector<64x1xf32>
    %133 = arith.mulf %131, %132 : vector<64x1xf32>
    %c0_42 = arith.constant 0 : index
    %c0_43 = arith.constant 0 : index
    %c0_44 = arith.constant 0 : index
    %c2_45 = arith.constant 2 : index
    %134 = vector.load %arg6[%c0_42, %c0_43, %c0_44, %c2_45] : memref<1x3x64x7xf32, #tpu.memory_space<vmem>>, vector<1x1x64x1xf32>
    %135 = vector.shape_cast %134 : vector<1x1x64x1xf32> to vector<64x1xf32>
    %136 = vector.shape_cast %133 : vector<64x1xf32> to vector<1x1x64x1xf32>
    tpu.vector_store %arg6[%c0_42, %c0_43, %c0_44, %c2_45], %136 {strides = array<i32>} : memref<1x3x64x7xf32, #tpu.memory_space<vmem>>, vector<1x1x64x1xf32>,
    %137 = vector.extract_strided_slice %126 {offsets = [192, 0], sizes = [64, 1], strides = [1, 1]} : vector<384x1xf32> to vector<64x1xf32>
    %cst_46 = arith.constant 1.300000e+01 : f32
    %138 = vector.broadcast %cst_46 : f32 to vector<64x1xf32>
    %139 = arith.mulf %137, %138 : vector<64x1xf32>
    %c0_47 = arith.constant 0 : index
    %c0_48 = arith.constant 0 : index
    %c0_49 = arith.constant 0 : index
    %c3 = arith.constant 3 : index
    %140 = vector.load %arg6[%c0_47, %c0_48, %c0_49, %c3] : memref<1x3x64x7xf32, #tpu.memory_space<vmem>>, vector<1x1x64x1xf32>
    %141 = vector.shape_cast %140 : vector<1x1x64x1xf32> to vector<64x1xf32>
    %142 = vector.shape_cast %139 : vector<64x1xf32> to vector<1x1x64x1xf32>
    tpu.vector_store %arg6[%c0_47, %c0_48, %c0_49, %c3], %142 {strides = array<i32>} : memref<1x3x64x7xf32, #tpu.memory_space<vmem>>, vector<1x1x64x1xf32>,
    %143 = vector.extract_strided_slice %83 {offsets = [0, 0], sizes = [64, 3], strides = [1, 1]} : vector<192x3xf32> to vector<64x3xf32>
    %c0_50 = arith.constant 0 : index
    %c0_51 = arith.constant 0 : index
    %c0_52 = arith.constant 0 : index
    %c4 = arith.constant 4 : index
    %144 = vector.load %arg6[%c0_50, %c0_51, %c0_52, %c4] : memref<1x3x64x7xf32, #tpu.memory_space<vmem>>, vector<1x1x64x3xf32>
    %145 = vector.shape_cast %144 : vector<1x1x64x3xf32> to vector<64x3xf32>
    %146 = vector.shape_cast %143 : vector<64x3xf32> to vector<1x1x64x3xf32>
    tpu.vector_store %arg6[%c0_50, %c0_51, %c0_52, %c4], %146 {strides = array<i32>} : memref<1x3x64x7xf32, #tpu.memory_space<vmem>>, vector<1x1x64x3xf32>,
    %147 = vector.extract_strided_slice %97 {offsets = [64, 0], sizes = [64, 2], strides = [1, 1]} : vector<192x2xf32> to vector<64x2xf32>
    %c0_53 = arith.constant 0 : index
    %c1_54 = arith.constant 1 : index
    %c0_55 = arith.constant 0 : index
    %c0_56 = arith.constant 0 : index
    %148 = vector.load %arg6[%c0_53, %c1_54, %c0_55, %c0_56] : memref<1x3x64x7xf32, #tpu.memory_space<vmem>>, vector<1x1x64x2xf32>
    %149 = vector.shape_cast %148 : vector<1x1x64x2xf32> to vector<64x2xf32>
    %150 = vector.shape_cast %147 : vector<64x2xf32> to vector<1x1x64x2xf32>
    tpu.vector_store %arg6[%c0_53, %c1_54, %c0_55, %c0_56], %150 {strides = array<i32>} : memref<1x3x64x7xf32, #tpu.memory_space<vmem>>, vector<1x1x64x2xf32>,
    %151 = vector.extract_strided_slice %126 {offsets = [64, 0], sizes = [64, 1], strides = [1, 1]} : vector<384x1xf32> to vector<64x1xf32>
    %cst_57 = arith.constant 1.600000e+01 : f32
    %152 = vector.broadcast %cst_57 : f32 to vector<64x1xf32>
    %153 = arith.mulf %151, %152 : vector<64x1xf32>
    %c0_58 = arith.constant 0 : index
    %c1_59 = arith.constant 1 : index
    %c0_60 = arith.constant 0 : index
    %c2_61 = arith.constant 2 : index
    %154 = vector.load %arg6[%c0_58, %c1_59, %c0_60, %c2_61] : memref<1x3x64x7xf32, #tpu.memory_space<vmem>>, vector<1x1x64x1xf32>
    %155 = vector.shape_cast %154 : vector<1x1x64x1xf32> to vector<64x1xf32>
    %156 = vector.shape_cast %153 : vector<64x1xf32> to vector<1x1x64x1xf32>
    tpu.vector_store %arg6[%c0_58, %c1_59, %c0_60, %c2_61], %156 {strides = array<i32>} : memref<1x3x64x7xf32, #tpu.memory_space<vmem>>, vector<1x1x64x1xf32>,
    %157 = vector.extract_strided_slice %126 {offsets = [256, 0], sizes = [64, 1], strides = [1, 1]} : vector<384x1xf32> to vector<64x1xf32>
    %cst_62 = arith.constant 3.000000e+01 : f32
    %158 = vector.broadcast %cst_62 : f32 to vector<64x1xf32>
    %159 = arith.mulf %157, %158 : vector<64x1xf32>
    %c0_63 = arith.constant 0 : index
    %c1_64 = arith.constant 1 : index
    %c0_65 = arith.constant 0 : index
    %c3_66 = arith.constant 3 : index
    %160 = vector.load %arg6[%c0_63, %c1_64, %c0_65, %c3_66] : memref<1x3x64x7xf32, #tpu.memory_space<vmem>>, vector<1x1x64x1xf32>
    %161 = vector.shape_cast %160 : vector<1x1x64x1xf32> to vector<64x1xf32>
    %162 = vector.shape_cast %159 : vector<64x1xf32> to vector<1x1x64x1xf32>
    tpu.vector_store %arg6[%c0_63, %c1_64, %c0_65, %c3_66], %162 {strides = array<i32>} : memref<1x3x64x7xf32, #tpu.memory_space<vmem>>, vector<1x1x64x1xf32>,
    %163 = vector.extract_strided_slice %83 {offsets = [64, 0], sizes = [64, 3], strides = [1, 1]} : vector<192x3xf32> to vector<64x3xf32>
    %c0_67 = arith.constant 0 : index
    %c1_68 = arith.constant 1 : index
    %c0_69 = arith.constant 0 : index
    %c4_70 = arith.constant 4 : index
    %164 = vector.load %arg6[%c0_67, %c1_68, %c0_69, %c4_70] : memref<1x3x64x7xf32, #tpu.memory_space<vmem>>, vector<1x1x64x3xf32>
    %165 = vector.shape_cast %164 : vector<1x1x64x3xf32> to vector<64x3xf32>
    %166 = vector.shape_cast %163 : vector<64x3xf32> to vector<1x1x64x3xf32>
    tpu.vector_store %arg6[%c0_67, %c1_68, %c0_69, %c4_70], %166 {strides = array<i32>} : memref<1x3x64x7xf32, #tpu.memory_space<vmem>>, vector<1x1x64x3xf32>,
    %167 = vector.extract_strided_slice %97 {offsets = [128, 0], sizes = [64, 2], strides = [1, 1]} : vector<192x2xf32> to vector<64x2xf32>
    %c0_71 = arith.constant 0 : index
    %c2_72 = arith.constant 2 : index
    %c0_73 = arith.constant 0 : index
    %c0_74 = arith.constant 0 : index
    %168 = vector.load %arg6[%c0_71, %c2_72, %c0_73, %c0_74] : memref<1x3x64x7xf32, #tpu.memory_space<vmem>>, vector<1x1x64x2xf32>
    %169 = vector.shape_cast %168 : vector<1x1x64x2xf32> to vector<64x2xf32>
    %170 = vector.shape_cast %167 : vector<64x2xf32> to vector<1x1x64x2xf32>
    tpu.vector_store %arg6[%c0_71, %c2_72, %c0_73, %c0_74], %170 {strides = array<i32>} : memref<1x3x64x7xf32, #tpu.memory_space<vmem>>, vector<1x1x64x2xf32>,
    %171 = vector.extract_strided_slice %126 {offsets = [128, 0], sizes = [64, 1], strides = [1, 1]} : vector<384x1xf32> to vector<64x1xf32>
    %cst_75 = arith.constant 3.300000e+01 : f32
    %172 = vector.broadcast %cst_75 : f32 to vector<64x1xf32>
    %173 = arith.mulf %171, %172 : vector<64x1xf32>
    %c0_76 = arith.constant 0 : index
    %c2_77 = arith.constant 2 : index
    %c0_78 = arith.constant 0 : index
    %c2_79 = arith.constant 2 : index
    %174 = vector.load %arg6[%c0_76, %c2_77, %c0_78, %c2_79] : memref<1x3x64x7xf32, #tpu.memory_space<vmem>>, vector<1x1x64x1xf32>
    %175 = vector.shape_cast %174 : vector<1x1x64x1xf32> to vector<64x1xf32>
    %176 = vector.shape_cast %173 : vector<64x1xf32> to vector<1x1x64x1xf32>
    tpu.vector_store %arg6[%c0_76, %c2_77, %c0_78, %c2_79], %176 {strides = array<i32>} : memref<1x3x64x7xf32, #tpu.memory_space<vmem>>, vector<1x1x64x1xf32>,
    %177 = vector.extract_strided_slice %126 {offsets = [320, 0], sizes = [64, 1], strides = [1, 1]} : vector<384x1xf32> to vector<64x1xf32>
    %cst_80 = arith.constant 2.300000e+01 : f32
    %178 = vector.broadcast %cst_80 : f32 to vector<64x1xf32>
    %179 = arith.mulf %177, %178 : vector<64x1xf32>
    %c0_81 = arith.constant 0 : index
    %c2_82 = arith.constant 2 : index
    %c0_83 = arith.constant 0 : index
    %c3_84 = arith.constant 3 : index
    %180 = vector.load %arg6[%c0_81, %c2_82, %c0_83, %c3_84] : memref<1x3x64x7xf32, #tpu.memory_space<vmem>>, vector<1x1x64x1xf32>
    %181 = vector.shape_cast %180 : vector<1x1x64x1xf32> to vector<64x1xf32>
    %182 = vector.shape_cast %179 : vector<64x1xf32> to vector<1x1x64x1xf32>
    tpu.vector_store %arg6[%c0_81, %c2_82, %c0_83, %c3_84], %182 {strides = array<i32>} : memref<1x3x64x7xf32, #tpu.memory_space<vmem>>, vector<1x1x64x1xf32>,
    %183 = vector.extract_strided_slice %83 {offsets = [128, 0], sizes = [64, 3], strides = [1, 1]} : vector<192x3xf32> to vector<64x3xf32>
    %c0_85 = arith.constant 0 : index
    %c2_86 = arith.constant 2 : index
    %c0_87 = arith.constant 0 : index
    %c4_88 = arith.constant 4 : index
    %184 = vector.load %arg6[%c0_85, %c2_86, %c0_87, %c4_88] : memref<1x3x64x7xf32, #tpu.memory_space<vmem>>, vector<1x1x64x3xf32>
    %185 = vector.shape_cast %184 : vector<1x1x64x3xf32> to vector<64x3xf32>
    %186 = vector.shape_cast %183 : vector<64x3xf32> to vector<1x1x64x3xf32>
    tpu.vector_store %arg6[%c0_85, %c2_86, %c0_87, %c4_88], %186 {strides = array<i32>} : memref<1x3x64x7xf32, #tpu.memory_space<vmem>>, vector<1x1x64x3xf32>,
    return
  }
  func.func @transform_0(%arg0: i32, %arg1: i32) -> (i32, i32, i32) {
    %c0_i32 = arith.constant 0 : i32
    %c0_i32_0 = arith.constant 0 : i32
    return %arg0, %arg1, %c0_i32 : i32, i32, i32
  }
  func.func @transform_1(%arg0: i32, %arg1: i32) -> (i32, i32) {
    %c0_i32 = arith.constant 0 : i32
    %c0_i32_0 = arith.constant 0 : i32
    %c0_i32_1 = arith.constant 0 : i32
    return %c0_i32, %c0_i32_0 : i32, i32
  }
  func.func @transform_2(%arg0: i32, %arg1: i32) -> (i32, i32) {
    %c0_i32 = arith.constant 0 : i32
    %c0_i32_0 = arith.constant 0 : i32
    %c0_i32_1 = arith.constant 0 : i32
    return %c0_i32, %c0_i32_0 : i32, i32
  }
  func.func @transform_3(%arg0: i32, %arg1: i32) -> (i32, i32, i32, i32) {
    %c0_i32 = arith.constant 0 : i32
    %c0_i32_0 = arith.constant 0 : i32
    %c0_i32_1 = arith.constant 0 : i32
    return %arg0, %c0_i32, %arg1, %c0_i32_0 : i32, i32, i32, i32
  }
  func.func @transform_4(%arg0: i32, %arg1: i32) -> (i32, i32, i32, i32) {
    %c0_i32 = arith.constant 0 : i32
    %c0_i32_0 = arith.constant 0 : i32
    %c0_i32_1 = arith.constant 0 : i32
    return %arg0, %c0_i32, %arg1, %c0_i32_0 : i32, i32, i32, i32
  }
}

</mosaic_0001>

<bundles_post_ra>
// kernel: tpu_custom_call.1
= control target key start
LH: loop header
LB: loop body
LE: loop exit
PB: predicated region body
PF: predicated region fallthrough
CT: control target
= control target key end

     0   :  { %s4225_s15 = smov 0   ;;  %s4227_s16 = smov 0   ;;  %s7232_s0 = inlined_call_operand.vmem [shape: bf16[2,64,8], index: 0, kind: input, shape index: {}]   ;;  %s7233_s1 = inlined_call_operand.vmem [shape: bf16[8,384], index: 1, kind: input, shape index: {}]   ;;  %s7234_s2 = inlined_call_operand.vmem [shape: f32[1,384], index: 2, kind: input, shape index: {}]   ;;  %s7235_s3 = inlined_call_operand.vmem [shape: bf16[2,3,64,49], index: 3, kind: output, shape index: {0}]   ;;  %s7236_s4 = inlined_call_operand.vmem [shape: f32[2,3,64,7], index: 4, kind: output, shape index: {1}]  }
   0x1   :  { %s4229_s17 = smov 0  }
   0x2 LB: > { %s27_s18 = sadd.s32 1, %s4189_s16  ;;  %p3689_p0 = scmp.ge.s32.totalorder %s4193_s17, 1  ;;  %s4193_s17 = sphi %s4229_s17, %s15_s17   ;;  %s4189_s16 = sphi %s4227_s16, %s7778_s16   ;;  %s4185_s15 = sphi %s4225_s15, %s7777_s15  }
   0x3   : > { %p29_p1 = scmp.ge.s32.totalorder %s27_s18, 2  ;;  %p188_p2 = scmp.lt.s32.totalorder %s4193_s17, 3 }
   0x5   : > { %s7780_s18 = smov (%p29_p1, %s27_s18), 0  ;;  %p189_p3 = pnand %p3689_p0, %p188_p2 }
   0x7   : > { %192 = sbr.rel (%p189_p3) target bundleno = 1398 (0x576), region = 32 }
   0xc   : > { %v270_v0 = vld [vmem:[%s7233_s1] sm:$0xff]  ;;  %v271_v1 = vld [vmem:[%s7233_s1 + $0x8] sm:$0xf]  ;;  %p232_p4 = scmp.lt.s32.totalorder %s4185_s15, 1  ;;  %v418_v2 = vlaneseq  ;;  %vm321_vm0 = vcmask 1043456   ;;  %s4195_s24 = smov 3  }
   0xd   : > { %v302_v3 = vunpack.c.l.b16 %v270_v0  ;;  %v303_v4 = vunpack.c.h.b16 %v270_v0  ;;  %v304_v5 = vunpack.c.l.b16 %v271_v1  ;;  %vm308_vm1 = vcmask 64512   ;;  %v272_v25 = vld [vmem:[%s7234_s2] sm:$0x7]  ;;  %s4196_s5 = smov 106   ;;  %s4198_s13 = smov 86  }
   0xe   : > { %s7782_s15 = smov (!%p232_p4, %s4185_s15), 1  ;;  %v2003_v6 = vand.u32 127, %v418_v2  ;;  %v4269_v16 = vshrl.u32 %v418_v2, 7  ;;  %v4282_v28 = vperm.slane %v272_v25, 0  ;;  %v4284_v29 = vperm.slane %v272_v25, 1  ;;  %s4199_s14 = smov 1  }
   0xf   : > { %v305_v7 = vpack.c.b16 %v302_v3, %v302_v3  ;;  %v306_v8 = vpack.c.b16 %v303_v4, %v303_v4  ;;  %v307_v9 = vpack.c.b16 %v304_v5, %v304_v5  ;;  %s3924_s23 = sshll.u32 %s7782_s15, 5  ;;  %s3932_s30 = smul.u32 96, %s7782_s15  ;;  %vm581_vm3 = vcmask 396288  }
  0x10   : > { %2052 = vrot.lane.b32.xlu2 %v2003_v6, %s4195_s24  ;;  %s4255_s27 = scalar_lea.vmem %s7232_s0, %s3924_s23  ;;  %v4272_v17 = vadd.s32 16, %v4269_v16  ;;  %v4276_v22 = vadd.s32 24, %v4269_v16  ;;  %v4308_v39 = vperm.slane %v272_v25, 2  ;;  %v7237_v41 = vmov 0   ;;  %s3933_s9 = smul.u32 192, %s7782_s15 }
  0x11   : > { %v323_v10 = vsel %vm321_vm0, %v305_v7, 0  ;;  %v326_v11 = vsel %vm321_vm0, %v306_v8, 0  ;;  %v329_v12 = vsel %vm321_vm0, %v307_v9, 0  ;;  %v3925_v13 = vld [vmem:[%s4255_s27] sm:$0xff]  ;;  %v3926_v14 = vld [vmem:[%s4255_s27 + $0x8] sm:$0xff]  ;;  %v3927_v15 = vld [vmem:[%s4255_s27 + $0x10] sm:$0xff]  ;;  %s4302_s8 = scalar_lea.vmem %s7235_s3, %s3932_s30  ;;  %v437_v9 = vcvt.s32.f32 %v4269_v16 }
  0x12   : > { %338 = vmatpush.bf16.msra.mxu0 %v323_v10  ;;  %3929 = vmatpush.bf16.msra.mxu3 %v323_v10  ;;  %v439_v18 = vcvt.s32.f32 %v4272_v17  ;;  %v440_v24 = vcvt.s32.f32 %v4276_v22  ;;  %vm1857_vm4 = vcmask 195608   ;;  %v4344_v62 = vadd.s32 8, %v4269_v16  ;;  %s4665_s12 = scalar_lea.vmem %s7236_s4, %s3933_s9 }
  0x13   : > { %3930 = vmatpush.bf16.msra.mxu1 %v326_v11  ;;  %3931 = vmatpush.bf16.msra.mxu2 %v329_v12  ;;  %v445_v25 = vadd.f32 0.5, %v437_v9 }
  0x14   : > { %v447_v19 = vadd.f32 0.5, %v439_v18  ;;  %v448_v27 = vadd.f32 0.5, %v440_v24  ;;  %v438_v8 = vcvt.s32.f32 %v4344_v62 }
  0x15   : > { %3710 = vmatmul.msk.bf16.vlgmr.msra.gmra.mxu0 %vm308_vm1, %v3925_v13  ;;  %3711 = vmatmul.msk.bf16.vlgmr.msra.gmra.mxu3 %vm308_vm1, %v3926_v14 }
  0x16   : > { %367 = vmatpush.bf16.msrb.mxu0 %v326_v11  ;;  %3715 = vmatmul.msk.bf16.vlgmr.msra.gmra.mxu1 %vm308_vm1, %v3926_v14  ;;  %v455_v20 = vmul.f32 0.125, %v447_v19  ;;  %v456_v32 = vmul.f32 0.125, %v448_v27  ;;  %v446_v18 = vadd.f32 0.5, %v438_v8 }
  0x17   : > { %3719 = vmatmul.msk.bf16.vlgmr.msra.gmra.mxu2 %vm308_vm1, %v3926_v14 }
  0x18   : > { %v463_v21 = vfloor.f32 %v455_v20  ;;  %v464_v40 = vfloor.f32 %v456_v32  ;;  %v454_v24 = vmul.f32 0.125, %v446_v18 }
  0x1a   : > { %396 = vmatpush.bf16.msra.mxu0 %v329_v12  ;;  %v3939_v23 = vcvt.f32.s32 %v463_v21  ;;  %v4322_v50 = vcvt.f32.s32 %v464_v40  ;;  %v462_v32 = vfloor.f32 %v454_v24 }
  0x1c   : > { %v479_v26 = vmul.u32 8, %v3939_v23  ;;  %v480_v1 = vmul.u32 8, %v4322_v50 }
  0x1e   : > { %v487_v30 = vsub.s32 %v4272_v17, %v479_v26  ;;  %v4374_v11 = vsub.s32 %v4276_v22, %v480_v1 }
  0x20   : > { %vm495_vm2 = vcmp.ge.s32.totalorder %v487_v30, 8  ;;  %vm519_vm5 = vcmp.lt.s32.totalorder %v487_v30, 0  ;;  %vm496_vm6 = vcmp.ge.s32.totalorder %v4374_v11, 8  ;;  %vm520_vm7 = vcmp.lt.s32.totalorder %v4374_v11, 0 }
  0x21   : > { %v503_v42 = vsel %vm495_vm2, 1, %v7237_v41  ;;  %v527_v58 = vsel %vm519_vm5, 1, %v7237_v41  ;;  %v504_v40 = vsel %vm496_vm6, 1, %v7237_v41  ;;  %v528_v11 = vsel %vm520_vm7, 1, %v7237_v41 }
  0x22   : > { %v511_v49 = vadd.s32 %v3939_v23, %v503_v42 }
  0x24   : > { %v4357_v2 = vsub.s32 %v511_v49, %v527_v58  ;;  %v512_v58 = vadd.s32 %v4322_v50, %v504_v40 }
  0x25   : > { %3714 = vmatmul.msk.bf16.vlgmr.msrb.gmra.mxu0 %vm308_vm1, %v3925_v13  ;;  %3712 = vmatmul.msk.bf16.gmra.mxu3 %vm308_vm1, %v3927_v15 }
  0x26   : > { %3716 = vmatmul.msk.bf16.gmra.mxu1 %vm308_vm1, %v3927_v15 }
  0x27   : > { %3720 = vmatmul.msk.bf16.gmra.mxu2 %vm308_vm1, %v3927_v15  ;;  %v543_v15 = vmul.u32 8, %v4357_v2 }
  0x35   : > { %3718 = vmatmul.msk.bf16.vlgmr.msra.gmra.mxu0 %vm308_vm1, %v3925_v13 }
  0x92   : > { %v340_v31 = vpop.f32.mrf.mxu0 }
  0x93   : > { %v4289_v33 = vadd.f32 %v340_v31, %v4282_v28  ;;  %v374_v34 = vpop.f32.mrf.mxu1  ;;  %v4396_v31 = vsub.s32 %v4272_v17, %v543_v15 }
  0x94   : > { %v4292_v35 = vadd.f32 %v374_v34, %v4284_v29  ;;  %v453_v34 = vmul.f32 0.125, %v445_v25 }
  0x95   : > { %v573_v36 = vpack.c.bf16 %v4289_v33, %v4289_v33  ;;  %v3738_v37 = vmul.f32 -1.442695, %v4289_v33  ;;  %632 = vrot.lane.b32.xlu0 %v4289_v33, %s4196_s5  ;;  %v559_v49 = vcvt.s32.f32 %v4396_v31 }
  0x96   : > { %v592_v38 = vpack.c.bf16 %v4292_v35, %v4292_v35  ;;  %668 = vrot.lane.b32.xlu1 %v4292_v35, %s4196_s5  ;;  %v3748_v46 = vmul.f32 -1.442695, %v4292_v35  ;;  %v4411_v17 = vsel %vm1857_vm4, %v4292_v35, -inf }
  0x97   : > { %582 = vst.msk [vmem:[%s4302_s8] sm:$0xf] %vm581_vm3, %v573_v36  ;;  %3979 = vpow2.f32 %v3738_v37  ;;  %v3937_v37 = vcvt.f32.s32 %v462_v32 }
  0x98   : > { %3724 = vst.msk [vmem:[%s4302_s8 + $0x28] sm:$0xf] %vm581_vm3, %v592_v38  ;;  %v345_v43 = vpop.f32.mrf.mxu3 }
  0x99   : > { %v4316_v44 = vadd.f32 %v345_v43, %v4282_v28 }
  0x9a   : > { %v403_v45 = vpop.f32.mrf.mxu2  ;;  %v342_v48 = vpop.f32.mrf.mxu0 }
  0x9b   : > { %v4320_v47 = vadd.f32 %v403_v45, %v4308_v39  ;;  %v575_v51 = vpack.c.bf16 %v4316_v44, %v4316_v44  ;;  %v3740_v52 = vmul.f32 -1.442695, %v4316_v44  ;;  %v1864_v53 = vsel %vm1857_vm4, %v4316_v44, -inf  ;;  %v376_v54 = vpop.f32.mrf.mxu1 }
  0x9c   : > { %v4330_v55 = vadd.f32 %v342_v48, %v4282_v28  ;;  %1865 = vmax.xlane.f32.xlu2 %v1864_v53  ;;  %v4335_v57 = vadd.f32 %v376_v54, %v4284_v29  ;;  %v4407_v45 = vsel %vm1857_vm4, %v4289_v33, -inf }
  0x9d   : > { %v609_v56 = vpack.c.bf16 %v4320_v47, %v4320_v47  ;;  %v3980_v59 = vpop.eup %3979  ;;  %584 = vst.msk [vmem:[%s4302_s8 + $0x8] sm:$0xf] %vm581_vm3, %v575_v51  ;;  %3981 = vpow2.f32 %v3740_v52  ;;  %v1912_v7 = vsel %vm1857_vm4, %v4320_v47, -inf  ;;  %v3756_v30 = vmul.f32 -1.442695, %v4320_v47 }
  0x9e   : > { %v574_v60 = vpack.c.bf16 %v4330_v55, %v4330_v55  ;;  %v3739_v61 = vmul.f32 -1.442695, %v4330_v55  ;;  %v4346_v63 = vadd.f32 1.0, %v3980_v59  ;;  %3983 = vpow2.f32 %v3748_v46  ;;  %636 = vrot.lane.b32.xlu1 %v4316_v44, %s4196_s5 }
  0x9f   : > { %3732 = vst.msk [vmem:[%s4302_s8 + $0x48] sm:$0xf] %vm581_vm3, %v609_v56  ;;  %v593_v0 = vpack.c.bf16 %v4335_v57, %v4335_v57  ;;  %v3749_v4 = vmul.f32 -1.442695, %v4335_v57  ;;  %v461_v46 = vfloor.f32 %v453_v34  ;;  %v567_v51 = vcvt.s32.f32 %v4357_v2 }
  0xa0   : > { %583 = vst.msk [vmem:[%s4302_s8 + $0x4] sm:$0xf] %vm581_vm3, %v574_v60  ;;  %3985 = vpow2.f32 %v3739_v61  ;;  %v347_v3 = vpop.f32.mrf.mxu3  ;;  %v478_v52 = vmul.u32 8, %v3937_v37  ;;  %vm821_vm2 = vweird.f32 %v4346_v63 }
  0xa1   : > { %3987 = vrcp.f32 %v4346_v63  ;;  %3725 = vst.msk [vmem:[%s4302_s8 + $0x2c] sm:$0xf] %vm581_vm3, %v593_v0  ;;  %v4364_v5 = vadd.f32 %v347_v3, %v4282_v28  ;;  %v3935_v56 = vcvt.f32.s32 %v461_v46 }
  0xa2   : > { %v405_v6 = vpop.f32.mrf.mxu2  ;;  %3989 = vpow2.f32 %v3749_v4  ;;  %v486_v60 = vsub.s32 %v4344_v62, %v478_v52 }
  0xa3   : > { %v4371_v10 = vadd.f32 %v405_v6, %v4308_v39  ;;  %v3982_v12 = vpop.eup %3981  ;;  %v576_v13 = vpack.c.bf16 %v4364_v5, %v4364_v5  ;;  %v3741_v14 = vmul.f32 -1.442695, %v4364_v5  ;;  %v477_v3 = vmul.u32 8, %v3935_v56 }
  0xa4   : > { %v3984_v19 = vpop.eup %3983  ;;  %v4380_v20 = vadd.f32 1.0, %v3982_v12  ;;  %1913 = vmax.xlane.f32.xlu2 %v1912_v7  ;;  %vm494_vm9 = vcmp.ge.s32.totalorder %v486_v60, 8  ;;  %vm518_vm10 = vcmp.lt.s32.totalorder %v486_v60, 0  ;;  %v4463_v60 = vsub.s32 %v512_v58, %v528_v11 }
  0xa5   : > { %v610_v21 = vpack.c.bf16 %v4371_v10, %v4371_v10  ;;  %585 = vst.msk [vmem:[%s4302_s8 + $0xc] sm:$0xf] %vm581_vm3, %v576_v13  ;;  %3991 = vpow2.f32 %v3741_v14  ;;  %v4398_v36 = vadd.f32 1.0, %v3984_v19  ;;  %v3757_v43 = vmul.f32 -1.442695, %v4371_v10 }
  0xa6   : > { %v3986_v23 = vpop.eup %3985  ;;  %3993 = vrcp.f32 %v4380_v20  ;;  %v855_v54 = vand.u32 2147483647, %v4380_v20  ;;  %vm851_vm8 = vweird.f32 %v4380_v20  ;;  %v857_v1 = vand.u32 2147483648, %v4380_v20 }
  0xa7   : > { %v4386_v26 = vpop.eup %3987  ;;  %3733 = vst.msk [vmem:[%s4302_s8 + $0x4c] sm:$0xf] %vm581_vm3, %v610_v21  ;;  %v4391_v27 = vadd.f32 1.0, %v3986_v23  ;;  %v502_v7 = vsel %vm494_vm9, 1, %v7237_v41  ;;  %v526_v8 = vsel %vm518_vm10, 1, %v7237_v41  ;;  %v485_v23 = vsub.s32 %v4269_v16, %v477_v3 }
  0xa8   : > { %v817_v38 = vmul.f32 %v4386_v26, %v4346_v63  ;;  %v3990_v42 = vpop.eup %3989  ;;  %v510_v14 = vadd.s32 %v3937_v37, %v502_v7  ;;  %vm822_vm5 = vweird.f32 %v4386_v26  ;;  %v827_v7 = vand.u32 2147483648, %v4346_v63 }
  0xa9   : > { %3995 = vrcp.f32 %v4391_v27  ;;  %v4424_v0 = vadd.f32 1.0, %v3990_v42  ;;  %v842_v15 = vand.u32 2147483648, %v4391_v27  ;;  %vm836_vm11 = vweird.f32 %v4391_v27  ;;  %vm4470_vm9 = vmor %vm821_vm2, %vm822_vm5 }
  0xaa   : > { %3997 = vpow2.f32 %v3756_v30  ;;  %v818_v61 = vsub.f32 1.0, %v817_v38  ;;  %v534_v24 = vsub.s32 %v510_v14, %v526_v8  ;;  %v840_v25 = vand.u32 2147483647, %v4391_v27 }
  0xab   : > { %v3992_v48 = vpop.eup %3991  ;;  %3999 = vrcp.f32 %v4398_v36  ;;  %vm493_vm14 = vcmp.ge.s32.totalorder %v485_v23, 8  ;;  %vm517_vm15 = vcmp.lt.s32.totalorder %v485_v23, 0  ;;  %v858_v58 = vor.u32 1.1754944e-38, %v857_v1 }
  0xac   : > { %v4415_v53 = vpop.eup %3993  ;;  %4001 = vpow2.f32 %v3757_v43  ;;  %v4428_v6 = vadd.f32 1.0, %v3992_v48  ;;  %v819_v18 = vmul.f32 %v4386_v26, %v818_v61  ;;  %v542_v37 = vmul.u32 8, %v534_v24 }
  0xad   : > { %v847_v59 = vmul.f32 %v4415_v53, %v4380_v20  ;;  %vm852_vm13 = vweird.f32 %v4415_v53  ;;  %v501_v40 = vsel %vm493_vm14, 1, %v7237_v41  ;;  %v843_v43 = vor.u32 1.1754944e-38, %v842_v15 }
  0xae   : > { %4003 = vrcp.f32 %v4428_v6  ;;  %v525_v46 = vsel %vm517_vm15, 1, %v7237_v41  ;;  %vm4457_vm6 = vmor %vm851_vm8, %vm852_vm13  ;;  %vm841_vm7 = vcmp.eq.f32.partialorder %v840_v25, 8.507059e+37  ;;  %v820_v52 = vadd.f32 %v4386_v26, %v819_v18 }
  0xaf   : > { %v3996_v4 = vpop.eup %3995  ;;  %v848_v50 = vsub.f32 1.0, %v847_v59  ;;  %v825_v59 = vand.u32 2147483647, %v4346_v63  ;;  %v550_v61 = vsub.s32 %v4344_v62, %v542_v37  ;;  %4005 = vrcp.f32 %v4424_v0 }
  0xb0   : > { %v832_v9 = vmul.f32 %v3996_v4, %v4391_v27  ;;  %v3998_v12 = vpop.eup %3997  ;;  %vm837_vm12 = vweird.f32 %v3996_v4  ;;  %v509_v27 = vadd.s32 %v3935_v56, %v501_v40  ;;  %vm1632_vm8 = vcmask 7168  }
  0xb1   : > { %v849_v13 = vmul.f32 %v4415_v53, %v848_v50  ;;  %v4437_v19 = vpop.eup %3999  ;;  %vm4445_vm0 = vmor %vm836_vm11, %vm837_vm12  ;;  %vm856_vm10 = vcmp.eq.f32.partialorder %v855_v54, 8.507059e+37  ;;  %v824_v63 = vsel %vm4470_vm9, %v4386_v26, %v820_v52  ;;  %vm826_vm11 = vcmp.eq.f32.partialorder %v825_v59, 8.507059e+37 }
  0xb2   : > { %v833_v21 = vsub.f32 1.0, %v832_v9  ;;  %v4002_v30 = vpop.eup %4001  ;;  %v4468_v3 = vsub.s32 %v509_v27, %v525_v46  ;;  %v4477_v9 = vadd.f32 1.0, %v3998_v12  ;;  %v558_v1 = vcvt.s32.f32 %v550_v61 }
  0xb3   : > { %v850_v32 = vadd.f32 %v4415_v53, %v849_v13  ;;  %v828_v13 = vor.u32 1.1754944e-38, %v827_v7  ;;  %v4486_v14 = vadd.f32 1.0, %v4002_v30  ;;  %v566_v12 = vcvt.s32.f32 %v534_v24 }
  0xb4   : > { %v834_v34 = vmul.f32 %v3996_v4, %v833_v21  ;;  %v4475_v8 = vpop.eup %4003  ;;  %v541_v11 = vmul.u32 8, %v4468_v3  ;;  %v544_v15 = vmul.u32 8, %v4463_v60  ;;  %v1861_v18 = vsel %vm1857_vm4, %v4330_v55, -inf }
  0xb5   : > { %v854_v62 = vsel %vm4457_vm6, %v4415_v53, %v850_v32  ;;  %v4502_v20 = vsel %vm1857_vm4, %v4335_v57, -inf  ;;  %4007 = vrcp.f32 %v4477_v9  ;;  %v4516_v21 = vsel %vm1632_vm8, %v559_v49, %v567_v51  ;;  %v4522_v25 = vpop.eup %4005 }
  0xb6   : > { %v835_v42 = vadd.f32 %v3996_v4, %v834_v34  ;;  %v4495_v53 = vsel %vm856_vm10, %v858_v58, %v854_v62  ;;  %v4508_v26 = vsub.s32 %v4269_v16, %v541_v11  ;;  %v4518_v23 = vsel %vm826_vm11, %v828_v13, %v824_v63 }
  0xb7   : > { %7388 = vst [vmem:[#allocation3_spill] sm:$0xff] %v4495_v53  ;;  %v862_v24 = vmul.f32 %v4475_v8, %v4428_v6  ;;  %4009 = vrcp.f32 %v4486_v14  ;;  %v4527_v30 = vmul.f32 2.0, %v4495_v53  ;;  %v967_v2 = vmul.f32 %v4437_v19, %v4398_v36 }
  0xb8   : > { %v839_v56 = vsel %vm4445_vm0, %v3996_v4, %v835_v42  ;;  %7390 = vst [vmem:[#allocation5_spill] sm:$0xff] %v4518_v23  ;;  %v1095_v31 = vand.u32 2147483647, %v4477_v9  ;;  %v4533_v49 = vsel %vm1632_vm8, %v558_v1, %v566_v12  ;;  %v565_v51 = vcvt.s32.f32 %v4468_v3  ;;  %v369_v3 = vpop.f32.mrf.mxu0 }
  0xb9   : > { %v4483_v4 = vsel %vm841_vm7, %v843_v43, %v839_v56  ;;  %7391 = vst [vmem:[#allocation6_spill] sm:$0xff] %v4527_v30  ;;  %v4537_v32 = vsub.s32 %v4276_v22, %v544_v15  ;;  %v863_v34 = vsub.f32 1.0, %v862_v24  ;;  %v4542_v38 = vmul.f32 2.0, %v4518_v23 }
  0xba   : > { %7387 = vst [vmem:[#allocation2_spill] sm:$0xff] %v4483_v4  ;;  %v4505_v54 = vmul.f32 2.0, %v4483_v4  ;;  %v872_v40 = vand.u32 2147483648, %v4428_v6  ;;  %vm867_vm12 = vweird.f32 %v4475_v8  ;;  %v870_v43 = vand.u32 2147483647, %v4428_v6 }
  0xbb   : > { %7392 = vst [vmem:[#allocation7_spill] sm:$0xff] %v4542_v38  ;;  %v864_v42 = vmul.f32 %v4475_v8, %v863_v34  ;;  %v982_v22 = vmul.f32 %v4522_v25, %v4424_v0  ;;  %vm866_vm13 = vweird.f32 %v4428_v6  ;;  %vm986_vm14 = vweird.f32 %v4424_v0  ;;  %v4554_v46 = vpop.eup %4007 }
  0xbc   : > { %670 = vrot.lane.b32.xlu2 %v4335_v57, %s4196_s5  ;;  %7389 = vst [vmem:[#allocation4_spill] sm:$0xff] %v4505_v54  ;;  %v3787_v37 = vadd.f32 -0.5, %v4505_v54  ;;  %vm987_vm15 = vweird.f32 %v4522_v25  ;;  %v990_v27 = vand.u32 2147483647, %v4424_v0  ;;  %v992_v59 = vand.u32 2147483648, %v4424_v0  ;;  %vm868_vm0 = vmor %vm866_vm13, %vm867_vm12 }
  0xbd   : > { %v865_v48 = vadd.f32 %v4475_v8, %v864_v42  ;;  %v983_v52 = vsub.f32 1.0, %v982_v22  ;;  %v968_v61 = vsub.f32 1.0, %v967_v2  ;;  %v4558_v56 = vpop.eup %4009  ;;  %v873_v50 = vor.u32 1.1754944e-38, %v872_v40  ;;  %vm4576_vm9 = vmor %vm986_vm14, %vm987_vm15 }
  0xbe   : > { %vm971_vm2 = vweird.f32 %v4398_v36  ;;  %vm972_vm5 = vweird.f32 %v4437_v19  ;;  %v975_v6 = vand.u32 2147483647, %v4398_v36  ;;  %vm1091_vm6 = vweird.f32 %v4477_v9 }
  0xbf   : > { %1859 = vmax.xlane.f32.xlu0 %v4407_v45  ;;  %v557_v45 = vcvt.s32.f32 %v4508_v26  ;;  %v4565_v7 = vadd.f32 %v369_v3, %v4284_v29  ;;  %v869_v62 = vsel %vm868_vm0, %v4475_v8, %v865_v48  ;;  %vm871_vm7 = vcmp.eq.f32.partialorder %v870_v43, 8.507059e+37  ;;  %vm4590_vm11 = vmor %vm971_vm2, %vm972_vm5 }
  0xc0   : > { %v984_v58 = vmul.f32 %v4522_v25, %v983_v52  ;;  %v4570_v11 = vsel %vm871_vm7, %v873_v50, %v869_v62  ;;  %v993_v63 = vor.u32 1.1754944e-38, %v992_v59  ;;  %v969_v1 = vmul.f32 %v4437_v19, %v968_v61 }
  0xc1   : > { %7393 = vst [vmem:[#allocation8_spill] sm:$0xff] %v4570_v11  ;;  %v977_v8 = vand.u32 2147483648, %v4398_v36  ;;  %v560_v12 = vcvt.s32.f32 %v4537_v32  ;;  %vm991_vm10 = vcmp.eq.f32.partialorder %v990_v27, 8.507059e+37  ;;  %vm976_vm12 = vcmp.eq.f32.partialorder %v975_v6, 8.507059e+37 }
  0xc2   : > { %v985_v15 = vadd.f32 %v4522_v25, %v984_v58  ;;  %v970_v26 = vadd.f32 %v4437_v19, %v969_v1  ;;  %v1087_v24 = vmul.f32 %v4554_v46, %v4477_v9  ;;  %v3786_v2 = vadd.f32 -0.5, %v4542_v38 }
  0xc3   : > { %v568_v32 = vcvt.s32.f32 %v4463_v60  ;;  %v4602_v34 = vmul.f32 2.0, %v4570_v11  ;;  %v4608_v40 = vsel %vm1632_vm8, %v557_v45, %v565_v51  ;;  %v3788_v27 = vadd.f32 -0.5, %v4527_v30 }
  0xc4   : > { %v989_v36 = vsel %vm4576_vm9, %v4522_v25, %v985_v15  ;;  %v974_v43 = vsel %vm4590_vm11, %v4437_v19, %v970_v26  ;;  %v1088_v22 = vsub.f32 1.0, %v1087_v24  ;;  %v1690_v60 = vadd.f32 %v3787_v37, %v4533_v49  ;;  %v371_v25 = vpop.f32.mrf.mxu0 }
  0xc5   : > { %7398 = vst [vmem:[#allocation9_spill] sm:$0xff] %v4602_v34  ;;  %v4610_v42 = vsel %vm991_vm10, %v993_v63, %v989_v36  ;;  %vm1092_vm13 = vweird.f32 %v4554_v46  ;;  %v1097_v19 = vand.u32 2147483648, %v4477_v9  ;;  %v4629_v59 = vadd.f32 %v371_v25, %v4284_v29 }
  0xc6   : > { %7399 = vst [vmem:[#allocation10_spill] sm:$0xff] %v4610_v42  ;;  %v4618_v48 = vmul.f32 2.0, %v4610_v42  ;;  %v1089_v45 = vmul.f32 %v4554_v46, %v1088_v22  ;;  %v1689_v37 = vadd.f32 %v3786_v2, %v4608_v40  ;;  %v3789_v61 = vadd.f32 -0.5, %v4602_v34  ;;  %vm1093_vm14 = vmor %vm1091_vm6, %vm1092_vm13 }
  0xc7   : > { %1889 = vmax.xlane.f32.xlu0 %v4411_v17  ;;  %v590_v17 = vpack.c.bf16 %v4565_v7, %v4565_v7  ;;  %v1102_v3 = vmul.f32 %v4558_v56, %v4486_v14  ;;  %v1636_v50 = vsel %vm1632_vm8, %v560_v12, %v568_v32  ;;  %v591_v13 = vpack.c.bf16 %v4629_v59, %v4629_v59 }
  0xc8   : > { %1862 = vmax.xlane.f32.xlu1 %v1861_v18  ;;  %v978_v18 = vor.u32 1.1754944e-38, %v977_v8  ;;  %7400 = vst [vmem:[#allocation11_spill] sm:$0xff] %v4618_v48  ;;  %v3797_v6 = vadd.f32 -0.5, %v4618_v48  ;;  %v1090_v58 = vadd.f32 %v4554_v46, %v1089_v45  ;;  %v3747_v63 = vmul.f32 -1.442695, %v4629_v59 }
  0xc9   : > { %3722 = vst.msk [vmem:[%s4302_s8 + $0x20] sm:$0xf] %vm581_vm3, %v590_v17  ;;  %v1691_v1 = vadd.f32 %v3788_v27, %v4516_v21  ;;  %v1098_v8 = vor.u32 1.1754944e-38, %v1097_v19  ;;  %v1714_v17 = vmul.f32 8.0, %v1690_v60  ;;  %vm1096_vm15 = vcmp.eq.f32.partialorder %v1095_v31, 8.507059e+37 }
  0xca   : > { %v4620_v52 = vsel %vm976_vm12, %v978_v18, %v974_v43  ;;  %v1094_v15 = vsel %vm1093_vm14, %v4554_v46, %v1090_v58  ;;  %3723 = vst.msk [vmem:[%s4302_s8 + $0x24] sm:$0xf] %vm581_vm3, %v591_v13  ;;  %4011 = vpow2.f32 %v3747_v63  ;;  %v1103_v26 = vsub.f32 1.0, %v1102_v3 }
  0xcb   : > { %7401 = vst [vmem:[#allocation12_spill] sm:$0xff] %v4620_v52  ;;  %v4623_v51 = vmul.f32 2.0, %v4620_v52  ;;  %v4653_v0 = vsel %vm1096_vm15, %v1098_v8, %v1094_v15  ;;  %v1713_v18 = vmul.f32 8.0, %v1689_v37  ;;  %v1700_v24 = vadd.f32 %v3797_v6, %v1636_v50 }
  0xcc   : > { %7403 = vst [vmem:[#allocation14_spill] sm:$0xff] %v4653_v0  ;;  %v4656_v32 = vmul.f32 2.0, %v4653_v0  ;;  %v1104_v36 = vmul.f32 %v4558_v56, %v1103_v26  ;;  %vm1107_vm0 = vweird.f32 %v4558_v56  ;;  %v1110_v9 = vand.u32 2147483647, %v4486_v14 }
  0xcd   : > { %7402 = vst [vmem:[#allocation13_spill] sm:$0xff] %v4623_v51  ;;  %v3796_v62 = vadd.f32 -0.5, %v4623_v51  ;;  %v1112_v31 = vand.u32 2147483648, %v4486_v14  ;;  %v1715_v46 = vmul.f32 8.0, %v1691_v1  ;;  %vm3206_vm2 = vcmask 15360  }
  0xce   : > { %7404 = vst [vmem:[#allocation15_spill] sm:$0xff] %v4656_v32  ;;  %v3804_v43 = vadd.f32 -0.5, %v4656_v32  ;;  %v1105_v27 = vadd.f32 %v4558_v56, %v1104_v36  ;;  %vm1106_vm5 = vweird.f32 %v4486_v14  ;;  %v1724_v60 = vmul.f32 8.0, %v1700_v24 }
  0xcf   : > { %v1699_v12 = vadd.f32 %v3796_v62, %v4516_v21  ;;  %vm1108_vm6 = vmor %vm1106_vm5, %vm1107_vm0  ;;  %v1113_v45 = vor.u32 1.1754944e-38, %v1112_v31  ;;  %3207 = vst.msk [vmem:[%s4665_s12] sm:$0xff] %vm3206_vm2, %v1713_v18  ;;  %vm1111_vm7 = vcmp.eq.f32.partialorder %v1110_v9, 8.507059e+37  ;;  %v1867_v63 = vsel %vm1857_vm4, %v4364_v5, -inf }
  0xd0   : > { %1892 = vmax.xlane.f32.xlu1 %v4502_v20  ;;  %v1692_v20 = vadd.f32 %v3789_v61, %v1636_v50  ;;  %v1707_v25 = vadd.f32 %v3804_v43, %v4516_v21  ;;  %v4012_v19 = vpop.eup %4011  ;;  %v1109_v37 = vsel %vm1108_vm6, %v4558_v56, %v1105_v27  ;;  %3208 = vst.msk [vmem:[%s4665_s12 + $0x8] sm:$0xff] %vm3206_vm2, %v1714_v17  ;;  %v3746_v56 = vmul.f32 -1.442695, %v4565_v7  ;;  %v379_v43 = vpop.f32.mrf.mxu1 }
  0xd1   : > { %v1723_v2 = vmul.f32 8.0, %v1699_v12  ;;  %v801_v61 = vadd.f32 1.0, %v4012_v19  ;;  %v4678_v3 = vsel %vm1111_vm7, %v1113_v45, %v1109_v37  ;;  %3209 = vst.msk [vmem:[%s4665_s12 + $0x10] sm:$0xff] %vm3206_vm2, %v1715_v46 }
  0xd2   : > { %v1716_v22 = vmul.f32 8.0, %v1692_v20  ;;  %v1731_v14 = vmul.f32 8.0, %v1707_v25  ;;  %7405 = vst [vmem:[#allocation16_spill] sm:$0xff] %v4678_v3  ;;  %v4683_v21 = vmul.f32 2.0, %v4678_v3  ;;  %v4715_v25 = vadd.f32 %v379_v43, %v4284_v29 }
  0xd3   : > { %3860 = vst.msk [vmem:[%s4665_s12 + $0x50] sm:$0xff] %vm3206_vm2, %v1723_v2  ;;  %4013 = vrcp.f32 %v801_v61  ;;  %v962_v15 = vand.u32 2147483648, %v801_v61  ;;  %vm956_vm9 = vweird.f32 %v801_v61  ;;  %v960_v26 = vand.u32 2147483647, %v801_v61 }
  0xd4   : > { %7406 = vst [vmem:[#allocation17_spill] sm:$0xff] %v4683_v21  ;;  %v3805_v6 = vadd.f32 -0.5, %v4683_v21  ;;  %4015 = vpow2.f32 %v3746_v56  ;;  %v594_v37 = vpack.c.bf16 %v4715_v25, %v4715_v25 }
  0xd5   : > { %3210 = vst.msk [vmem:[%s4665_s12 + $0x18] sm:$0xff] %vm3206_vm2, %v1716_v22  ;;  %v963_v18 = vor.u32 1.1754944e-38, %v962_v15  ;;  %vm961_vm12 = vcmp.eq.f32.partialorder %v960_v26, 8.507059e+37 }
  0xd6   : > { %3861 = vst.msk [vmem:[%s4665_s12 + $0x58] sm:$0xff] %vm3206_vm2, %v1724_v60  ;;  %v1708_v62 = vadd.f32 %v3805_v6, %v1636_v50 }
  0xd7   : > { %3892 = vst.msk [vmem:[%s4665_s12 + $0x90] sm:$0xff] %vm3206_vm2, %v1731_v14 }
  0xd8   : > { %v1732_v58 = vmul.f32 8.0, %v1708_v62  ;;  %3726 = vst.msk [vmem:[%s4302_s8 + $0x30] sm:$0xf] %vm581_vm3, %v594_v37  ;;  %v381_v62 = vpop.f32.mrf.mxu1  ;;  %v3928_v37 = vld [vmem:[%s4255_s27 + $0x18] sm:$0xff] }
  0xd9   : > { %v4014_v13 = vpop.eup %4013  ;;  %3717 = vmatmul.msk.bf16.gmra.mxu1 %vm308_vm1, %v3928_v37  ;;  %3721 = vmatmul.msk.bf16.gmra.mxu2 %vm308_vm1, %v3928_v37 }
  0xda   : > { %3893 = vst.msk [vmem:[%s4665_s12 + $0x98] sm:$0xff] %vm3206_vm2, %v1732_v58  ;;  %v4016_v1 = vpop.eup %4015  ;;  %v952_v8 = vmul.f32 %v4014_v13, %v801_v61  ;;  %vm957_vm10 = vweird.f32 %v4014_v13  ;;  %v3750_v61 = vmul.f32 -1.442695, %v4715_v25  ;;  %v4725_v58 = vadd.s32 40, %v4269_v16  ;;  %3713 = vmatmul.msk.bf16.gmra.mxu3 %vm308_vm1, %v3928_v37 }
  0xdb   : > { %700 = vrot.lane.b32.xlu0 %v4320_v47, %s4196_s5  ;;  %v800_v12 = vadd.f32 1.0, %v4016_v1  ;;  %vm958_vm11 = vmor %vm956_vm9, %vm957_vm10 }
  0xdc   : > { %v953_v17 = vsub.f32 1.0, %v952_v8  ;;  %v442_v1 = vcvt.s32.f32 %v4725_v58 }
  0xdd   : > { %4017 = vrcp.f32 %v800_v12  ;;  %v947_v19 = vand.u32 2147483648, %v800_v12  ;;  %vm941_vm13 = vweird.f32 %v800_v12  ;;  %v945_v56 = vand.u32 2147483647, %v800_v12 }
  0xde   : > { %v954_v50 = vmul.f32 %v4014_v13, %v953_v17  ;;  %4019 = vpow2.f32 %v3750_v61  ;;  %v450_v26 = vadd.f32 0.5, %v442_v1 }
  0xdf   : > { %v948_v6 = vor.u32 1.1754944e-38, %v947_v19  ;;  %vm946_vm0 = vcmp.eq.f32.partialorder %v945_v56, 8.507059e+37  ;;  %v350_v56 = vpop.f32.mrf.mxu3 }
  0xe0   : > { %v955_v20 = vadd.f32 %v4014_v13, %v954_v50  ;;  %v408_v50 = vpop.f32.mrf.mxu2  ;;  %v458_v43 = vmul.f32 0.125, %v450_v26 }
  0xe2   : > { %v959_v24 = vsel %vm958_vm11, %v4014_v13, %v955_v20  ;;  %v4728_v13 = vadd.s32 32, %v4269_v16  ;;  %v4741_v20 = vadd.f32 %v408_v50, %v4308_v39  ;;  %v466_v61 = vfloor.f32 %v458_v43 }
  0xe3   : > { %634 = vrot.lane.b32.xlu0 %v4330_v55, %s4196_s5  ;;  %v4703_v2 = vsel %vm961_vm12, %v963_v18, %v959_v24  ;;  %v4018_v31 = vpop.eup %4017 }
  0xe4   : > { %7407 = vst [vmem:[#allocation18_spill] sm:$0xff] %v4703_v2  ;;  %v4706_v36 = vmul.f32 2.0, %v4703_v2  ;;  %v937_v27 = vmul.f32 %v4018_v31, %v800_v12  ;;  %vm942_vm14 = vweird.f32 %v4018_v31  ;;  %v441_v8 = vcvt.s32.f32 %v4728_v13  ;;  %v4020_v24 = vpop.eup %4019 }
  0xe5   : > { %1868 = vmax.xlane.f32.xlu2 %v1867_v63  ;;  %vm943_vm15 = vmor %vm941_vm13, %vm942_vm14  ;;  %v4735_v12 = vadd.f32 %v381_v62, %v4284_v29  ;;  %v3945_v1 = vcvt.f32.s32 %v466_v61 }
  0xe6   : > { %7408 = vst [vmem:[#allocation19_spill] sm:$0xff] %v4706_v36  ;;  %v3795_v9 = vadd.f32 -0.5, %v4706_v36  ;;  %v938_v60 = vsub.f32 1.0, %v937_v27  ;;  %v449_v18 = vadd.f32 0.5, %v441_v8 }
  0xe7   : > { %v482_v26 = vmul.u32 8, %v3945_v1 }
  0xe8   : > { %v1698_v46 = vadd.f32 %v3795_v9, %v4533_v49  ;;  %v939_v45 = vmul.f32 %v4018_v31, %v938_v60  ;;  %v595_v9 = vpack.c.bf16 %v4735_v12, %v4735_v12  ;;  %v4751_v60 = vadd.f32 1.0, %v4020_v24 }
  0xe9   : > { %638 = vrot.lane.b32.xlu1 %v4364_v5, %s4196_s5  ;;  %v4769_v24 = vadd.f32 %v350_v56, %v4282_v28 }
  0xea   : > { %v1722_v22 = vmul.f32 8.0, %v1698_v46  ;;  %v940_v14 = vadd.f32 %v4018_v31, %v939_v45  ;;  %v611_v46 = vpack.c.bf16 %v4741_v20, %v4741_v20  ;;  %3727 = vst.msk [vmem:[%s4302_s8 + $0x34] sm:$0xf] %vm581_vm3, %v595_v9  ;;  %4021 = vrcp.f32 %v4751_v60 }
  0xeb   : > { %v577_v43 = vpack.c.bf16 %v4769_v24, %v4769_v24  ;;  %vm1001_vm9 = vweird.f32 %v4751_v60 }
  0xec   : > { %3859 = vst.msk [vmem:[%s4665_s12 + $0x48] sm:$0xff] %vm3206_vm2, %v1722_v22  ;;  %v944_v63 = vsel %vm943_vm15, %v4018_v31, %v940_v14  ;;  %v457_v22 = vmul.f32 0.125, %v449_v18  ;;  %v3751_v14 = vmul.f32 -1.442695, %v4735_v12  ;;  %v352_v18 = vpop.f32.mrf.mxu3 }
  0xed   : > { %v4732_v17 = vsel %vm946_vm0, %v948_v6, %v944_v63  ;;  %3734 = vst.msk [vmem:[%s4302_s8 + $0x50] sm:$0xf] %vm581_vm3, %v611_v46  ;;  %v1915_v63 = vsel %vm1857_vm4, %v4371_v10, -inf  ;;  %v4772_v9 = vadd.f32 %v352_v18, %v4282_v28 }
  0xee   : > { %7409 = vst [vmem:[#allocation20_spill] sm:$0xff] %v4732_v17  ;;  %v4738_v15 = vmul.f32 2.0, %v4732_v17  ;;  %v465_v45 = vfloor.f32 %v457_v22  ;;  %4023 = vpow2.f32 %v3751_v14  ;;  %v3742_v22 = vmul.f32 -1.442695, %v4769_v24 }
  0xef   : > { %v3743_v37 = vmul.f32 -1.442695, %v4772_v9  ;;  %586 = vst.msk [vmem:[%s4302_s8 + $0x10] sm:$0xf] %vm581_vm3, %v577_v43 }
  0xf0   : > { %7410 = vst [vmem:[#allocation21_spill] sm:$0xff] %v4738_v15  ;;  %v3794_v31 = vadd.f32 -0.5, %v4738_v15  ;;  %v3943_v6 = vcvt.f32.s32 %v465_v45  ;;  %v4766_v50 = vpop.eup %4021  ;;  %v410_v45 = vpop.f32.mrf.mxu2  ;;  %4025 = vpow2.f32 %v3742_v22 }
  0xf1   : > { %702 = vrot.lane.b32.xlu1 %v4371_v10, %s4196_s5  ;;  %v997_v46 = vmul.f32 %v4766_v50, %v4751_v60  ;;  %v4784_v61 = vadd.f32 %v410_v45, %v4308_v39  ;;  %4027 = vpow2.f32 %v3743_v37  ;;  %vm1002_vm10 = vweird.f32 %v4766_v50 }
  0xf2   : > { %v1697_v27 = vadd.f32 %v3794_v31, %v4608_v40  ;;  %v481_v62 = vmul.u32 8, %v3943_v6  ;;  %vm4816_vm11 = vmor %vm1001_vm9, %vm1002_vm10 }
  0xf4   : > { %v1721_v19 = vmul.f32 8.0, %v1697_v27  ;;  %v489_v8 = vsub.s32 %v4728_v13, %v481_v62  ;;  %v4024_v31 = vpop.eup %4023  ;;  %v578_v27 = vpack.c.bf16 %v4772_v9, %v4772_v9  ;;  %v612_v62 = vpack.c.bf16 %v4784_v61, %v4784_v61 }
  0xf5   : > { %v4787_v56 = vadd.f32 1.0, %v4024_v31  ;;  %v1882_v31 = vsel %vm1857_vm4, %v4565_v7, -inf }
  0xf6   : > { %3858 = vst.msk [vmem:[%s4665_s12 + $0x40] sm:$0xff] %vm3206_vm2, %v1721_v19  ;;  %vm497_vm1 = vcmp.ge.s32.totalorder %v489_v8, 8  ;;  %v490_v19 = vsub.s32 %v4725_v58, %v482_v26  ;;  %vm521_vm6 = vcmp.lt.s32.totalorder %v489_v8, 0 }
  0xf7   : > { %v505_v14 = vsel %vm497_vm1, 1, %v7237_v41  ;;  %587 = vst.msk [vmem:[%s4302_s8 + $0x14] sm:$0xf] %vm581_vm3, %v578_v27  ;;  %v529_v18 = vsel %vm521_vm6, 1, %v7237_v41  ;;  %4029 = vrcp.f32 %v4787_v56  ;;  %vm1016_vm13 = vweird.f32 %v4787_v56 }
  0xf8   : > { %vm498_vm5 = vcmp.ge.s32.totalorder %v490_v19, 8  ;;  %v513_v26 = vadd.s32 %v3943_v6, %v505_v14  ;;  %3735 = vst.msk [vmem:[%s4302_s8 + $0x54] sm:$0xf] %vm581_vm3, %v612_v62  ;;  %vm522_vm7 = vcmp.lt.s32.totalorder %v490_v19, 0  ;;  %v1005_v19 = vand.u32 2147483647, %v4751_v60 }
  0xf9   : > { %v506_v43 = vsel %vm498_vm5, 1, %v7237_v41  ;;  %v530_v62 = vsel %vm522_vm7, 1, %v7237_v41 }
  0xfa   : > { %v537_v22 = vsub.s32 %v513_v26, %v529_v18  ;;  %v514_v14 = vadd.s32 %v3945_v1, %v506_v43  ;;  %v1918_v26 = vsel %vm1857_vm4, %v4741_v20, -inf  ;;  %vm1006_vm12 = vcmp.eq.f32.partialorder %v1005_v19, 8.507059e+37 }
  0xfb   : > { %v1020_v18 = vand.u32 2147483647, %v4787_v56 }
  0xfc   : > { %v545_v8 = vmul.u32 8, %v537_v22  ;;  %v4822_v43 = vsub.s32 %v514_v14, %v530_v62  ;;  %v569_v41 = vcvt.s32.f32 %v537_v22  ;;  %v3758_v22 = vmul.f32 -1.442695, %v4741_v20 }
  0xfd   : > { %664 = vrot.lane.b32.xlu2 %v4565_v7, %s4196_s5  ;;  %vm4851_vm15 = vcmp.eq.f32.partialorder %v1020_v18, 8.507059e+37 }
  0xfe   : > { %v553_v1 = vsub.s32 %v4728_v13, %v545_v8  ;;  %v570_v52 = vcvt.s32.f32 %v4822_v43 }
 0x100   : > { %v561_v8 = vcvt.s32.f32 %v553_v1 }
 0x102   : > { %v4843_v1 = vsel %vm1632_vm8, %v561_v8, %v569_v41 }
 0x10d   : > { %1916 = vmax.xlane.f32.xlu0 %v1915_v63  ;;  %v998_v63 = vsub.f32 1.0, %v997_v46  ;;  %v4026_v46 = vpop.eup %4025 }
 0x10e   : > { %v4028_v45 = vpop.eup %4027  ;;  %v4803_v6 = vadd.f32 1.0, %v4026_v46  ;;  %v1894_v46 = vsel %vm1857_vm4, %v4715_v25, -inf }
 0x10f   : > { %v999_v27 = vmul.f32 %v4766_v50, %v998_v63  ;;  %v797_v37 = vadd.f32 1.0, %v4028_v45  ;;  %v4811_v63 = vpop.eup %4029 }
 0x110   : > { %4031 = vrcp.f32 %v4803_v6  ;;  %v1012_v13 = vmul.f32 %v4811_v63, %v4787_v56  ;;  %vm1017_vm14 = vweird.f32 %v4811_v63  ;;  %vm881_vm9 = vweird.f32 %v4803_v6 }
 0x111   : > { %4033 = vrcp.f32 %v797_v37  ;;  %vm896_vm0 = vweird.f32 %v797_v37  ;;  %vm4857_vm5 = vmor %vm1016_vm13, %vm1017_vm14 }
 0x112   : > { %v1013_v14 = vsub.f32 1.0, %v1012_v13  ;;  %4035 = vpow2.f32 %v3758_v22 }
 0x114   : > { %v1014_v19 = vmul.f32 %v4811_v63, %v1013_v14 }
 0x116   : > { %v4032_v0 = vpop.eup %4031 }
 0x117   : > { %v4034_v62 = vpop.eup %4033  ;;  %v877_v36 = vmul.f32 %v4032_v0, %v4803_v6  ;;  %vm882_vm10 = vweird.f32 %v4032_v0 }
 0x118   : > { %vm897_vm1 = vweird.f32 %v4034_v62  ;;  %v4036_v22 = vpop.eup %4035 }
 0x119   : > { %vm898_vm6 = vmor %vm896_vm0, %vm897_vm1 }
 0x11b   : > { %1883 = vmax.xlane.f32.xlu1 %v1882_v31  ;;  %v1000_v31 = vadd.f32 %v4766_v50, %v999_v27  ;;  %v1007_v27 = vand.u32 2147483648, %v4751_v60  ;;  %v546_v60 = vmul.u32 8, %v4822_v43 }
 0x11d   : > { %v1004_v45 = vsel %vm4816_vm11, %v4766_v50, %v1000_v31  ;;  %v1008_v3 = vor.u32 1.1754944e-38, %v1007_v27  ;;  %v892_v50 = vmul.f32 %v4034_v62, %v797_v37  ;;  %v878_v27 = vsub.f32 1.0, %v877_v36  ;;  %vm883_vm11 = vmor %vm881_vm9, %vm882_vm10 }
 0x11e   : > { %v554_v13 = vsub.s32 %v4725_v58, %v546_v60  ;;  %v902_v36 = vand.u32 2147483648, %v797_v37 }
 0x11f   : > { %v879_v14 = vmul.f32 %v4032_v0, %v878_v27 }
 0x120   : > { %v903_v60 = vor.u32 1.1754944e-38, %v902_v36 }
 0x121   : > { %672 = vrot.lane.b32.xlu0 %v4715_v25, %s4196_s5  ;;  %v880_v27 = vadd.f32 %v4032_v0, %v879_v14 }
 0x123   : > { %1919 = vmax.xlane.f32.xlu1 %v1918_v26  ;;  %v4833_v26 = vsel %vm1006_vm12, %v1008_v3, %v1004_v45  ;;  %v893_v3 = vsub.f32 1.0, %v892_v50  ;;  %v1015_v50 = vadd.f32 %v4811_v63, %v1014_v19  ;;  %v885_v19 = vand.u32 2147483647, %v4803_v6 }
 0x124   : > { %7413 = vst [vmem:[#allocation22_spill] sm:$0xff] %v4833_v26  ;;  %v4838_v31 = vmul.f32 2.0, %v4833_v26  ;;  %v884_v14 = vsel %vm883_vm11, %v4032_v0, %v880_v27  ;;  %v812_v27 = vadd.f32 1.0, %v4036_v22  ;;  %v398_v22 = vpop.f32.mrf.mxu0 }
 0x125   : > { %v894_v41 = vmul.f32 %v4034_v62, %v893_v3  ;;  %v562_v3 = vcvt.s32.f32 %v554_v13  ;;  %vm886_vm12 = vcmp.eq.f32.partialorder %v885_v19, 8.507059e+37  ;;  %v3759_v19 = vmul.f32 -1.442695, %v4784_v61 }
 0x126   : > { %1895 = vmax.xlane.f32.xlu2 %v1894_v46  ;;  %7414 = vst [vmem:[#allocation23_spill] sm:$0xff] %v4838_v31  ;;  %v1022_v46 = vand.u32 2147483648, %v4787_v56  ;;  %v3798_v45 = vadd.f32 -0.5, %v4838_v31  ;;  %v900_v56 = vand.u32 2147483647, %v797_v37  ;;  %v887_v37 = vand.u32 2147483648, %v4803_v6 }
 0x127   : > { %v895_v43 = vadd.f32 %v4034_v62, %v894_v41  ;;  %v4885_v0 = vsel %vm1632_vm8, %v562_v3, %v570_v52  ;;  %4037 = vrcp.f32 %v812_v27  ;;  %vm1121_vm13 = vweird.f32 %v812_v27 }
 0x128   : > { %v1701_v8 = vadd.f32 %v3798_v45, %v4843_v1  ;;  %v1023_v58 = vor.u32 1.1754944e-38, %v1022_v46  ;;  %vm901_vm7 = vcmp.eq.f32.partialorder %v900_v56, 8.507059e+37  ;;  %v1019_v46 = vsel %vm4857_vm5, %v4811_v63, %v1015_v50 }
 0x129   : > { %v899_v45 = vsel %vm898_vm6, %v4034_v62, %v895_v43  ;;  %v888_v13 = vor.u32 1.1754944e-38, %v887_v37  ;;  %4039 = vpow2.f32 %v3759_v19 }
 0x12a   : > { %v1725_v18 = vmul.f32 8.0, %v1701_v8  ;;  %v4869_v41 = vsel %vm901_vm7, %v903_v60, %v899_v45  ;;  %v4873_v36 = vsel %vm4851_vm15, %v1023_v58, %v1019_v46  ;;  %v1870_v45 = vsel %vm1857_vm4, %v4769_v24, -inf }
 0x12b   : > { %7419 = vst [vmem:[#allocation24_spill] sm:$0xff] %v4869_v41  ;;  %v4876_v62 = vmul.f32 2.0, %v4869_v41  ;;  %v4879_v6 = vmul.f32 2.0, %v4873_v36  ;;  %v4882_v31 = vsel %vm886_vm12, %v888_v13, %v884_v14 }
 0x12c   : > { %3862 = vst.msk [vmem:[%s4665_s12 + $0x60] sm:$0xff] %vm3206_vm2, %v1725_v18  ;;  %v4888_v42 = vmul.f32 2.0, %v4882_v31 }
 0x12d   : > { %7420 = vst [vmem:[#allocation25_spill] sm:$0xff] %v4873_v36  ;;  %v3791_v63 = vadd.f32 -0.5, %v4876_v62  ;;  %v3799_v8 = vadd.f32 -0.5, %v4879_v6  ;;  %v4038_v3 = vpop.eup %4037 }
 0x12e   : > { %7421 = vst [vmem:[#allocation26_spill] sm:$0xff] %v4876_v62  ;;  %v3790_v56 = vadd.f32 -0.5, %v4888_v42  ;;  %v1117_v37 = vmul.f32 %v4038_v3, %v812_v27  ;;  %vm1122_vm14 = vweird.f32 %v4038_v3 }
 0x12f   : > { %7422 = vst [vmem:[#allocation27_spill] sm:$0xff] %v4879_v6  ;;  %v1694_v50 = vadd.f32 %v3791_v63, %v4885_v0  ;;  %v1702_v43 = vadd.f32 %v3799_v8, %v4885_v0  ;;  %v4040_v13 = vpop.eup %4039  ;;  %v1127_v63 = vand.u32 2147483648, %v812_v27  ;;  %vm1123_vm15 = vmor %vm1121_vm13, %vm1122_vm14 }
 0x130   : > { %7423 = vst [vmem:[#allocation28_spill] sm:$0xff] %v4882_v31  ;;  %v1693_v60 = vadd.f32 %v3790_v56, %v4843_v1  ;;  %v1118_v46 = vsub.f32 1.0, %v1117_v37 }
 0x131   : > { %7424 = vst [vmem:[#allocation29_spill] sm:$0xff] %v4888_v42  ;;  %v1718_v58 = vmul.f32 8.0, %v1694_v50  ;;  %v1726_v18 = vmul.f32 8.0, %v1702_v43  ;;  %v1125_v50 = vand.u32 2147483647, %v812_v27  ;;  %v1128_v56 = vor.u32 1.1754944e-38, %v1127_v63 }
 0x132   : > { %v1717_v52 = vmul.f32 8.0, %v1693_v60  ;;  %v1119_v14 = vmul.f32 %v4038_v3, %v1118_v46 }
 0x133   : > { %3212 = vst.msk [vmem:[%s4665_s12 + $0x28] sm:$0xff] %vm3206_vm2, %v1718_v58  ;;  %v813_v58 = vadd.f32 1.0, %v4040_v13  ;;  %vm1126_vm0 = vcmp.eq.f32.partialorder %v1125_v50, 8.507059e+37  ;;  %v1873_v13 = vsel %vm1857_vm4, %v4772_v9, -inf }
 0x134   : > { %3863 = vst.msk [vmem:[%s4665_s12 + $0x68] sm:$0xff] %vm3206_vm2, %v1726_v18  ;;  %v1120_v8 = vadd.f32 %v4038_v3, %v1119_v14 }
 0x135   : > { %3211 = vst.msk [vmem:[%s4665_s12 + $0x20] sm:$0xff] %vm3206_vm2, %v1717_v52  ;;  %4041 = vrcp.f32 %v813_v58  ;;  %v4916_v52 = vadd.f32 %v398_v22, %v4308_v39  ;;  %vm1136_vm1 = vweird.f32 %v813_v58  ;;  %v1142_v50 = vand.u32 2147483648, %v813_v58 }
 0x136   : > { %v1124_v43 = vsel %vm1123_vm15, %v4038_v3, %v1120_v8 }
 0x137   : > { %v4910_v60 = vsel %vm1126_vm0, %v1128_v56, %v1124_v43  ;;  %v607_v27 = vpack.c.bf16 %v4916_v52, %v4916_v52  ;;  %v1143_v43 = vor.u32 1.1754944e-38, %v1142_v50  ;;  %v3754_v62 = vmul.f32 -1.442695, %v4916_v52 }
 0x138   : > { %7425 = vst [vmem:[#allocation30_spill] sm:$0xff] %v4910_v60  ;;  %v4913_v18 = vmul.f32 2.0, %v4910_v60 }
 0x139   : > { %3730 = vst.msk [vmem:[%s4302_s8 + $0x40] sm:$0xf] %vm581_vm3, %v607_v27  ;;  %v1885_v27 = vsel %vm1857_vm4, %v4629_v59, -inf }
 0x13a   : > { %7426 = vst [vmem:[#allocation31_spill] sm:$0xff] %v4913_v18  ;;  %v3806_v19 = vadd.f32 -0.5, %v4913_v18 }
 0x13b   : > { %v4042_v3 = vpop.eup %4041 }
 0x13c   : > { %674 = vrot.lane.b32.xlu1 %v4735_v12, %s4196_s5  ;;  %v1132_v46 = vmul.f32 %v4042_v3, %v813_v58  ;;  %vm1137_vm5 = vweird.f32 %v4042_v3 }
 0x13d   : > { %vm1138_vm6 = vmor %vm1136_vm1, %vm1137_vm5 }
 0x13e   : > { %640 = vrot.lane.b32.xlu2 %v4769_v24, %s4196_s5  ;;  %v1133_v14 = vsub.f32 1.0, %v1132_v46 }
 0x140   : > { %v1134_v63 = vmul.f32 %v4042_v3, %v1133_v14 }
 0x142   : > { %v1135_v8 = vadd.f32 %v4042_v3, %v1134_v63  ;;  %v400_v63 = vpop.f32.mrf.mxu0 }
 0x144   : > { %v1139_v56 = vsel %vm1138_vm6, %v4042_v3, %v1135_v8  ;;  %v4960_v8 = vadd.f32 %v400_v63, %v4308_v39 }
 0x146   : > { %704 = vrot.lane.b32.xlu2 %v4741_v20, %s4196_s5 }
 0x14b   : > { %1871 = vmax.xlane.f32.xlu0 %v1870_v45  ;;  %v1709_v45 = vadd.f32 %v3806_v19, %v4843_v1  ;;  %v1140_v1 = vand.u32 2147483647, %v813_v58  ;;  %v1897_v58 = vsel %vm1857_vm4, %v4735_v12, -inf }
 0x14d   : > { %v1733_v37 = vmul.f32 8.0, %v1709_v45  ;;  %vm1141_vm7 = vcmp.eq.f32.partialorder %v1140_v1, 8.507059e+37 }
 0x14e   : > { %v4930_v22 = vsel %vm1141_vm7, %v1143_v43, %v1139_v56  ;;  %v608_v56 = vpack.c.bf16 %v4960_v8, %v4960_v8 }
 0x14f   : > { %3894 = vst.msk [vmem:[%s4665_s12 + $0xa0] sm:$0xff] %vm3206_vm2, %v1733_v37  ;;  %v4933_v19 = vmul.f32 2.0, %v4930_v22 }
 0x150   : > { %7427 = vst [vmem:[#allocation32_spill] sm:$0xff] %v4930_v22  ;;  %v1921_v22 = vsel %vm1857_vm4, %v4784_v61, -inf }
 0x151   : > { %7428 = vst [vmem:[#allocation33_spill] sm:$0xff] %v4933_v19  ;;  %v3807_v45 = vadd.f32 -0.5, %v4933_v19 }
 0x152   : > { %3731 = vst.msk [vmem:[%s4302_s8 + $0x44] sm:$0xf] %vm581_vm3, %v608_v56 }
 0x153   : > { %v1710_v37 = vadd.f32 %v3807_v45, %v4885_v0  ;;  %v4972_v45 = vadd.s32 56, %v4269_v16 }
 0x155   : > { %v1734_v46 = vmul.f32 8.0, %v1710_v37 }
 0x156   : > { %v384_v3 = vpop.f32.mrf.mxu1 }
 0x157   : > { %3895 = vst.msk [vmem:[%s4665_s12 + $0xa8] sm:$0xff] %vm3206_vm2, %v1734_v46  ;;  %v4948_v14 = vadd.f32 %v384_v3, %v4284_v29  ;;  %v444_v46 = vcvt.s32.f32 %v4972_v45 }
 0x159   : > { %v596_v0 = vpack.c.bf16 %v4948_v14, %v4948_v14  ;;  %v3752_v37 = vmul.f32 -1.442695, %v4948_v14 }
 0x15b   : > { %3728 = vst.msk [vmem:[%s4302_s8 + $0x38] sm:$0xf] %vm581_vm3, %v596_v0  ;;  %v452_v0 = vadd.f32 0.5, %v444_v46  ;;  %4043 = vpow2.f32 %v3752_v37  ;;  %v4991_v37 = vadd.s32 48, %v4269_v16 }
 0x15c   : > { %v413_v43 = vpop.f32.mrf.mxu2 }
 0x15d   : > { %v355_v18 = vpop.f32.mrf.mxu3 }
 0x15f   : > { %666 = vrot.lane.b32.xlu0 %v4629_v59, %s4196_s5 }
 0x166   : > { %1874 = vmax.xlane.f32.xlu1 %v1873_v13  ;;  %v386_v13 = vpop.f32.mrf.mxu1 }
 0x167   : > { %v4957_v1 = vadd.f32 %v386_v13, %v4284_v29  ;;  %v460_v13 = vmul.f32 0.125, %v452_v0  ;;  %v7429_v0 = vmov 0  }
 0x169   : > { %v597_v50 = vpack.c.bf16 %v4957_v1, %v4957_v1  ;;  %v3753_v3 = vmul.f32 -1.442695, %v4957_v1  ;;  %v468_v63 = vfloor.f32 %v460_v13 }
 0x16b   : > { %3729 = vst.msk [vmem:[%s4302_s8 + $0x3c] sm:$0xf] %vm581_vm3, %v597_v50  ;;  %4045 = vpow2.f32 %v3753_v3  ;;  %v3755_v50 = vmul.f32 -1.442695, %v4960_v8  ;;  %v3949_v56 = vcvt.f32.s32 %v468_v63  ;;  %v443_v3 = vcvt.s32.f32 %v4991_v37 }
 0x16d   : > { %v484_v60 = vmul.u32 8, %v3949_v56  ;;  %4047 = vpow2.f32 %v3755_v50  ;;  %v451_v63 = vadd.f32 0.5, %v443_v3 }
 0x16e   : > { %4049 = vpow2.f32 %v3754_v62 }
 0x16f   : > { %1886 = vmax.xlane.f32.xlu2 %v1885_v27  ;;  %v4967_v27 = vadd.f32 %v413_v43, %v4308_v39  ;;  %v4044_v43 = vpop.eup %4043 }
 0x170   : > { %v4993_v46 = vadd.f32 1.0, %v4044_v43 }
 0x171   : > { %v613_v29 = vpack.c.bf16 %v4967_v27, %v4967_v27  ;;  %v4046_v19 = vpop.eup %4045 }
 0x172   : > { %4051 = vrcp.f32 %v4993_v46  ;;  %v1037_v26 = vand.u32 2147483648, %v4993_v46  ;;  %vm1031_vm13 = vweird.f32 %v4993_v46 }
 0x173   : > { %3736 = vst.msk [vmem:[%s4302_s8 + $0x58] sm:$0xf] %vm581_vm3, %v613_v29  ;;  %v492_v29 = vsub.s32 %v4972_v45, %v484_v60  ;;  %v459_v60 = vmul.f32 0.125, %v451_v63 }
 0x175   : > { %vm500_vm9 = vcmp.ge.s32.totalorder %v492_v29, 8  ;;  %vm524_vm10 = vcmp.lt.s32.totalorder %v492_v29, 0  ;;  %v467_v43 = vfloor.f32 %v459_v60  ;;  %v5019_v60 = vadd.f32 %v355_v18, %v4282_v28 }
 0x176   : > { %v508_v13 = vsel %vm500_vm9, 1, %v7429_v0 }
 0x177   : > { %v516_v16 = vadd.s32 %v3949_v56, %v508_v13  ;;  %v3947_v17 = vcvt.f32.s32 %v467_v43  ;;  %v1906_v43 = vsel %vm1857_vm4, %v4916_v52, -inf  ;;  %v579_v32 = vpack.c.bf16 %v5019_v60, %v5019_v60 }
 0x179   : > { %v483_v29 = vmul.u32 8, %v3947_v17  ;;  %588 = vst.msk [vmem:[%s4302_s8 + $0x18] sm:$0xf] %vm581_vm3, %v579_v32 }
 0x17b   : > { %v491_v56 = vsub.s32 %v4991_v37, %v483_v29  ;;  %v357_v29 = vpop.f32.mrf.mxu3 }
 0x17c   : > { %v5030_v18 = vadd.f32 %v357_v29, %v4282_v28 }
 0x17d   : > { %vm499_vm11 = vcmp.ge.s32.totalorder %v491_v56, 8  ;;  %vm523_vm12 = vcmp.lt.s32.totalorder %v491_v56, 0 }
 0x17e   : > { %v531_v42 = vsel %vm523_vm12, 1, %v7429_v0  ;;  %v3745_v28 = vmul.f32 -1.442695, %v5030_v18 }
 0x17f   : > { %696 = vrot.lane.b32.xlu1 %v4916_v52, %s4196_s5 }
 0x187   : > { %642 = vrot.lane.b32.xlu2 %v4772_v9, %s4196_s5 }
 0x189   : > { %1898 = vmax.xlane.f32.xlu0 %v1897_v58  ;;  %v1900_v58 = vsel %vm1857_vm4, %v4948_v14, -inf }
 0x19d   : > { %706 = vrot.lane.b32.xlu0 %v4784_v61, %s4196_s5 }
 0x1a9   : > { %1901 = vmax.xlane.f32.xlu1 %v1900_v58  ;;  %v4995_v58 = vadd.f32 1.0, %v4046_v19  ;;  %v532_v19 = vsel %vm524_vm10, 1, %v7429_v0 }
 0x1aa   : > { %v5004_v6 = vsub.s32 %v516_v16, %v532_v19  ;;  %v507_v16 = vsel %vm499_vm11, 1, %v7429_v0  ;;  %v1038_v0 = vor.u32 1.1754944e-38, %v1037_v26 }
 0x1ab   : > { %4053 = vrcp.f32 %v4995_v58  ;;  %v515_v11 = vadd.s32 %v3947_v17, %v507_v16  ;;  %v580_v17 = vpack.c.bf16 %v5030_v18, %v5030_v18  ;;  %vm1046_vm1 = vweird.f32 %v4995_v58 }
 0x1ac   : > { %v548_v13 = vmul.u32 8, %v5004_v6  ;;  %v572_v31 = vcvt.s32.f32 %v5004_v6  ;;  %v1035_v6 = vand.u32 2147483647, %v4993_v46  ;;  %v1050_v26 = vand.u32 2147483647, %v4995_v58 }
 0x1ad   : > { %v539_v56 = vsub.s32 %v515_v11, %v531_v42  ;;  %589 = vst.msk [vmem:[%s4302_s8 + $0x1c] sm:$0xf] %vm581_vm3, %v580_v17  ;;  %v1052_v29 = vand.u32 2147483648, %v4995_v58  ;;  %v3744_v17 = vmul.f32 -1.442695, %v5019_v60 }
 0x1ae   : > { %v5033_v23 = vsub.s32 %v4972_v45, %v548_v13  ;;  %vm1036_vm0 = vcmp.eq.f32.partialorder %v1035_v6, 8.507059e+37  ;;  %vm1051_vm9 = vcmp.eq.f32.partialorder %v1050_v26, 8.507059e+37 }
 0x1af   : > { %v547_v32 = vmul.u32 8, %v539_v56 }
 0x1b0   : > { %1922 = vmax.xlane.f32.xlu2 %v1921_v22  ;;  %v4048_v22 = vpop.eup %4047 }
 0x1b1   : > { %v5001_v50 = vadd.f32 1.0, %v4048_v22  ;;  %v4050_v36 = vpop.eup %4049 }
 0x1b2   : > { %v4052_v62 = vpop.eup %4051  ;;  %v5009_v21 = vadd.f32 1.0, %v4050_v36 }
 0x1b3   : > { %v5006_v3 = vpop.eup %4053  ;;  %4055 = vrcp.f32 %v5001_v50  ;;  %v1027_v63 = vmul.f32 %v4052_v62, %v4993_v46  ;;  %vm1032_vm14 = vweird.f32 %v4052_v62  ;;  %vm1076_vm7 = vweird.f32 %v5001_v50 }
 0x1b4   : > { %v1042_v22 = vmul.f32 %v5006_v3, %v4995_v58  ;;  %4057 = vrcp.f32 %v5009_v21  ;;  %vm1033_vm15 = vmor %vm1031_vm13, %vm1032_vm14  ;;  %vm1047_vm5 = vweird.f32 %v5006_v3 }
 0x1b5   : > { %v1028_v36 = vsub.f32 1.0, %v1027_v63  ;;  %4059 = vpow2.f32 %v3745_v28  ;;  %vm5060_vm6 = vmor %vm1046_vm1, %vm1047_vm5 }
 0x1b6   : > { %v1043_v63 = vsub.f32 1.0, %v1042_v22 }
 0x1b7   : > { %v1029_v4 = vmul.f32 %v4052_v62, %v1028_v36 }
 0x1b8   : > { %v1044_v11 = vmul.f32 %v5006_v3, %v1043_v63 }
 0x1b9   : > { %v5022_v19 = vpop.eup %4055  ;;  %v1030_v13 = vadd.f32 %v4052_v62, %v1029_v4  ;;  %v555_v4 = vsub.s32 %v4991_v37, %v547_v32  ;;  %v564_v37 = vcvt.s32.f32 %v5033_v23  ;;  %v1080_v23 = vand.u32 2147483647, %v5001_v50 }
 0x1ba   : > { %v1072_v45 = vmul.f32 %v5022_v19, %v5001_v50  ;;  %v5052_v42 = vpop.eup %4057  ;;  %v1045_v16 = vadd.f32 %v5006_v3, %v1044_v11  ;;  %vm1077_vm10 = vweird.f32 %v5022_v19 }
 0x1bb   : > { %v1034_v22 = vsel %vm1033_vm15, %v4052_v62, %v1030_v13  ;;  %v563_v28 = vcvt.s32.f32 %v555_v4  ;;  %v4060_v32 = vpop.eup %4059  ;;  %vm5083_vm11 = vmor %vm1076_vm7, %vm1077_vm10  ;;  %vm1081_vm12 = vcmp.eq.f32.partialorder %v1080_v23, 8.507059e+37  ;;  %vm1062_vm13 = vweird.f32 %v5052_v42 }
 0x1bc   : > { %v5057_v46 = vsel %vm1036_vm0, %v1038_v0, %v1034_v22  ;;  %v1073_v63 = vsub.f32 1.0, %v1072_v45  ;;  %v1049_v6 = vsel %vm5060_vm6, %v5006_v3, %v1045_v16  ;;  %v799_v45 = vadd.f32 1.0, %v4060_v32 }
 0x1bd   : > { %7430 = vst [vmem:[#allocation34_spill] sm:$0xff] %v5057_v46  ;;  %v5066_v62 = vmul.f32 2.0, %v5057_v46  ;;  %v1082_v16 = vand.u32 2147483648, %v5001_v50 }
 0x1be   : > { %v1074_v58 = vmul.f32 %v5022_v19, %v1073_v63  ;;  %4061 = vrcp.f32 %v799_v45  ;;  %vm926_vm0 = vweird.f32 %v799_v45 }
 0x1bf   : > { %7433 = vst [vmem:[#allocation35_spill] sm:$0xff] %v5066_v62  ;;  %v3800_v13 = vadd.f32 -0.5, %v5066_v62  ;;  %4063 = vpow2.f32 %v3744_v17  ;;  %v1065_v17 = vand.u32 2147483647, %v5009_v21 }
 0x1c0   : > { %v1075_v4 = vadd.f32 %v5022_v19, %v1074_v58 }
 0x1c1   : > { %vm1066_vm15 = vcmp.eq.f32.partialorder %v1065_v17, 8.507059e+37 }
 0x1c2   : > { %708 = vrot.lane.b32.xlu1 %v4967_v27, %s4196_s5  ;;  %v1079_v63 = vsel %vm5083_vm11, %v5022_v19, %v1075_v4 }
 0x1c7   : > { %1907 = vmax.xlane.f32.xlu0 %v1906_v43  ;;  %v571_v43 = vcvt.s32.f32 %v539_v56  ;;  %v1053_v56 = vor.u32 1.1754944e-38, %v1052_v29  ;;  %v5097_v29 = vsel %vm1632_vm8, %v564_v37, %v572_v31  ;;  %v4062_v37 = vpop.eup %4061 }
 0x1c8   : > { %676 = vrot.lane.b32.xlu2 %v4948_v14, %s4196_s5  ;;  %v4064_v22 = vpop.eup %4063  ;;  %v922_v4 = vmul.f32 %v4062_v37, %v799_v45  ;;  %vm927_vm1 = vweird.f32 %v4062_v37 }
 0x1c9   : > { %v5077_v0 = vsel %vm1632_vm8, %v563_v28, %v571_v43  ;;  %v5087_v3 = vsel %vm1051_vm9, %v1053_v56, %v1049_v6  ;;  %v1057_v43 = vmul.f32 %v5052_v42, %v5009_v21  ;;  %v1083_v28 = vor.u32 1.1754944e-38, %v1082_v16  ;;  %vm928_vm5 = vmor %vm926_vm0, %vm927_vm1 }
 0x1ca   : > { %v1703_v11 = vadd.f32 %v3800_v13, %v5077_v0  ;;  %7436 = vst [vmem:[#allocation36_spill] sm:$0xff] %v5087_v3  ;;  %v5092_v26 = vmul.f32 2.0, %v5087_v3  ;;  %v1067_v56 = vand.u32 2147483648, %v5009_v21  ;;  %vm1061_vm8 = vweird.f32 %v5009_v21 }
 0x1cb   : > { %v5105_v50 = vsel %vm1081_vm12, %v1083_v28, %v1079_v63  ;;  %v1058_v6 = vsub.f32 1.0, %v1057_v43  ;;  %vm1063_vm14 = vmor %vm1061_vm8, %vm1062_vm13  ;;  %v923_v43 = vsub.f32 1.0, %v922_v4  ;;  %v798_v21 = vadd.f32 1.0, %v4064_v22 }
 0x1cc   : > { %v1727_v36 = vmul.f32 8.0, %v1703_v11  ;;  %7437 = vst [vmem:[#allocation37_spill] sm:$0xff] %v5092_v26  ;;  %v3801_v13 = vadd.f32 -0.5, %v5092_v26  ;;  %v5110_v31 = vmul.f32 2.0, %v5105_v50  ;;  %v1068_v11 = vor.u32 1.1754944e-38, %v1067_v56 }
 0x1cd   : > { %7438 = vst [vmem:[#allocation38_spill] sm:$0xff] %v5105_v50  ;;  %v1059_v19 = vmul.f32 %v5052_v42, %v1058_v6  ;;  %v924_v6 = vmul.f32 %v4062_v37, %v923_v43  ;;  %4065 = vrcp.f32 %v798_v21 }
 0x1ce   : > { %3864 = vst.msk [vmem:[%s4665_s12 + $0x70] sm:$0xff] %vm3206_vm2, %v1727_v36  ;;  %v1704_v32 = vadd.f32 %v3801_v13, %v5097_v29  ;;  %v3803_v23 = vadd.f32 -0.5, %v5110_v31 }
 0x1cf   : > { %7439 = vst [vmem:[#allocation39_spill] sm:$0xff] %v5110_v31  ;;  %v1060_v16 = vadd.f32 %v5052_v42, %v1059_v19  ;;  %v925_v19 = vadd.f32 %v4062_v37, %v924_v6 }
 0x1d0   : > { %v1728_v58 = vmul.f32 8.0, %v1704_v32  ;;  %v1706_v36 = vadd.f32 %v3803_v23, %v4533_v49  ;;  %v932_v32 = vand.u32 2147483648, %v799_v45  ;;  %v415_v49 = vpop.f32.mrf.mxu2 }
 0x1d1   : > { %v1064_v63 = vsel %vm1063_vm14, %v5052_v42, %v1060_v16  ;;  %v930_v42 = vand.u32 2147483647, %v799_v45  ;;  %v5132_v17 = vadd.f32 %v415_v49, %v4308_v39  ;;  %v929_v23 = vsel %vm928_vm5, %v4062_v37, %v925_v19 }
 0x1d2   : > { %3865 = vst.msk [vmem:[%s4665_s12 + $0x78] sm:$0xff] %vm3206_vm2, %v1728_v58  ;;  %v1730_v28 = vmul.f32 8.0, %v1706_v36  ;;  %v5124_v13 = vsel %vm1066_vm15, %v1068_v11, %v1064_v63  ;;  %v933_v58 = vor.u32 1.1754944e-38, %v932_v32  ;;  %v1909_v32 = vsel %vm1857_vm4, %v4960_v8, -inf }
 0x1d3   : > { %7440 = vst [vmem:[#allocation40_spill] sm:$0xff] %v5124_v13  ;;  %v5127_v56 = vmul.f32 2.0, %v5124_v13  ;;  %vm931_vm6 = vcmp.eq.f32.partialorder %v930_v42, 8.507059e+37  ;;  %v614_v22 = vpack.c.bf16 %v5132_v17, %v5132_v17  ;;  %v4066_v36 = vpop.eup %4065  ;;  %v1876_v49 = vsel %vm1857_vm4, %v5019_v60, -inf }
 0x1d4   : > { %3891 = vst.msk [vmem:[%s4665_s12 + $0x88] sm:$0xff] %vm3206_vm2, %v1730_v28  ;;  %v5137_v4 = vsel %vm931_vm6, %v933_v58, %v929_v23  ;;  %v907_v28 = vmul.f32 %v4066_v36, %v798_v21  ;;  %v917_v19 = vand.u32 2147483648, %v798_v21  ;;  %vm912_vm7 = vweird.f32 %v4066_v36 }
 0x1d5   : > { %7441 = vst [vmem:[#allocation41_spill] sm:$0xff] %v5127_v56  ;;  %v3802_v11 = vadd.f32 -0.5, %v5127_v56  ;;  %v5140_v16 = vmul.f32 2.0, %v5137_v4  ;;  %v915_v58 = vand.u32 2147483647, %v798_v21 }
 0x1d6   : > { %7442 = vst [vmem:[#allocation42_spill] sm:$0xff] %v5137_v4  ;;  %v908_v6 = vsub.f32 1.0, %v907_v28  ;;  %v918_v23 = vor.u32 1.1754944e-38, %v917_v19  ;;  %v3761_v28 = vmul.f32 -1.442695, %v5132_v17 }
 0x1d7   : > { %7443 = vst [vmem:[#allocation43_spill] sm:$0xff] %v5140_v16  ;;  %v1705_v45 = vadd.f32 %v3802_v11, %v4608_v40  ;;  %v3793_v39 = vadd.f32 -0.5, %v5140_v16  ;;  %vm916_vm10 = vcmp.eq.f32.partialorder %v915_v58, 8.507059e+37 }
 0x1d8   : > { %3737 = vst.msk [vmem:[%s4302_s8 + $0x5c] sm:$0xf] %vm581_vm3, %v614_v22  ;;  %v909_v40 = vmul.f32 %v4066_v36, %v908_v6  ;;  %vm911_vm3 = vweird.f32 %v798_v21  ;;  %v1924_v21 = vsel %vm1857_vm4, %v4967_v27, -inf  ;;  %v3760_v6 = vmul.f32 -1.442695, %v4967_v27 }
 0x1d9   : > { %v1729_v37 = vmul.f32 8.0, %v1705_v45  ;;  %v1696_v43 = vadd.f32 %v3793_v39, %v5097_v29  ;;  %vm913_vm9 = vmor %vm911_vm3, %vm912_vm7  ;;  %4067 = vpow2.f32 %v3761_v28 }
 0x1da   : > { %v910_v42 = vadd.f32 %v4066_v36, %v909_v40  ;;  %4069 = vpow2.f32 %v3760_v6 }
 0x1db   : > { %644 = vrot.lane.b32.xlu0 %v5019_v60, %s4196_s5  ;;  %3890 = vst.msk [vmem:[%s4665_s12 + $0x80] sm:$0xff] %vm3206_vm2, %v1729_v37  ;;  %v1720_v63 = vmul.f32 8.0, %v1696_v43 }
 0x1dc   : > { %v914_v11 = vsel %vm913_vm9, %v4066_v36, %v910_v42 }
 0x1dd   : > { %3214 = vst.msk [vmem:[%s4665_s12 + $0x38] sm:$0xff] %vm3206_vm2, %v1720_v63  ;;  %v5155_v22 = vsel %vm916_vm10, %v918_v23, %v914_v11  ;;  %v5164_v63 = vpop.permute.xlu2 %2052 }
 0x1de   : > { %7444 = vst [vmem:[#allocation44_spill] sm:$0xff] %v5155_v22  ;;  %v5158_v45 = vmul.f32 2.0, %v5155_v22 }
 0x1e0   : > { %7445 = vst [vmem:[#allocation45_spill] sm:$0xff] %v5158_v45  ;;  %v3792_v39 = vadd.f32 -0.5, %v5158_v45  ;;  %v1927_v45 = vsel %vm1857_vm4, %v5132_v17, -inf }
 0x1e2   : > { %v1695_v37 = vadd.f32 %v3792_v39, %v5077_v0  ;;  %v5186_v39 = vpop.permute.xlu0 %632 }
 0x1e3   : > { %7449 = vst [vmem:[#allocation49_spill] sm:$0xff] %v5186_v39 }
 0x1e4   : > { %v1719_v43 = vmul.f32 8.0, %v1695_v37 }
 0x1e5   : > { %v5170_v36 = vpop.xlane.xlu2 %1865 }
 0x1e6   : > { %3213 = vst.msk [vmem:[%s4665_s12 + $0x30] sm:$0xff] %vm3206_vm2, %v1719_v43  ;;  %vm2006_vm9 = vcmp.eq.f32.partialorder %v4316_v44, %v5170_v36 }
 0x1ea   : > { %v5192_v50 = vpop.xlane.xlu0 %1859 }
 0x1ec   : > { %1910 = vmax.xlane.f32.xlu1 %v1909_v32  ;;  %v5176_v32 = vpop.permute.xlu1 %668 }
 0x1ed   : > { %7446 = vst [vmem:[#allocation46_spill] sm:$0xff] %v5176_v32  ;;  %v5178_v40 = vpop.xlane.xlu2 %1913 }
 0x1f1   : > { %1877 = vmax.xlane.f32.xlu2 %v1876_v49  ;;  %v4068_v49 = vpop.eup %4067 }
 0x1f2   : > { %v4070_v19 = vpop.eup %4069  ;;  %v815_v58 = vadd.f32 1.0, %v4068_v49 }
 0x1f3   : > { %v814_v23 = vadd.f32 1.0, %v4070_v19 }
 0x1f4   : > { %v5180_v42 = vpop.permute.xlu1 %636  ;;  %4071 = vrcp.f32 %v815_v58  ;;  %v1172_v16 = vand.u32 2147483648, %v815_v58  ;;  %vm1166_vm11 = vweird.f32 %v815_v58  ;;  %v1170_v62 = vand.u32 2147483647, %v815_v58 }
 0x1f5   : > { %7447 = vst [vmem:[#allocation47_spill] sm:$0xff] %v5180_v42  ;;  %v5184_v11 = vpop.permute.xlu2 %670  ;;  %4073 = vrcp.f32 %v814_v23  ;;  %vm1151_vm13 = vweird.f32 %v814_v23 }
 0x1f6   : > { %7448 = vst [vmem:[#allocation48_spill] sm:$0xff] %v5184_v11  ;;  %v1173_v56 = vor.u32 1.1754944e-38, %v1172_v16  ;;  %vm1171_vm15 = vcmp.eq.f32.partialorder %v1170_v62, 8.507059e+37 }
 0x1fa   : > { %v4072_v43 = vpop.eup %4071 }
 0x1fb   : > { %v1162_v6 = vmul.f32 %v4072_v43, %v815_v58  ;;  %vm1167_vm12 = vweird.f32 %v4072_v43 }
 0x1fc   : > { %v5188_v37 = vpop.xlane.xlu1 %1862  ;;  %vm1168_vm8 = vmor %vm1166_vm11, %vm1167_vm12 }
 0x1fd   : > { %v5190_v28 = vpop.xlane.xlu2 %1868  ;;  %v1163_v3 = vsub.f32 1.0, %v1162_v6  ;;  %vm2005_vm10 = vcmp.eq.f32.partialorder %v4330_v55, %v5188_v37 }
 0x1ff   : > { %v1164_v19 = vmul.f32 %v4072_v43, %v1163_v3  ;;  %v1155_v3 = vand.u32 2147483647, %v814_v23 }
 0x201   : > { %v1165_v31 = vadd.f32 %v4072_v43, %v1164_v19  ;;  %vm1156_vm1 = vcmp.eq.f32.partialorder %v1155_v3, 8.507059e+37 }
 0x203   : > { %v1169_v6 = vsel %vm1168_vm8, %v4072_v43, %v1165_v31  ;;  %v1890_v31 = vpop.xlane.xlu0 %1889 }
 0x204   : > { %v5194_v49 = vpop.xlane.xlu1 %1892  ;;  %v5202_v19 = vsel %vm1171_vm15, %v1173_v56, %v1169_v6  ;;  %v1936_v56 = vsel %vm1857_vm4, %v5180_v42, -inf  ;;  %vm2014_vm3 = vcmp.eq.f32.partialorder %v4292_v35, %v1890_v31 }
 0x205   : > { %646 = vrot.lane.b32.xlu1 %v5030_v18, %s4196_s5  ;;  %1925 = vmax.xlane.f32.xlu0 %v1924_v21  ;;  %v4074_v21 = vpop.eup %4073  ;;  %v5198_v4 = vpop.permute.xlu2 %664  ;;  %7451 = vst [vmem:[#allocation51_spill] sm:$0xff] %v5202_v19  ;;  %vm2015_vm8 = vcmp.eq.f32.partialorder %v4335_v57, %v5194_v49 }
 0x206   : > { %v1147_v13 = vmul.f32 %v4074_v21, %v814_v23  ;;  %7450 = vst [vmem:[#allocation50_spill] sm:$0xff] %v5198_v4  ;;  %vm1152_vm14 = vweird.f32 %v4074_v21 }
 0x207   : > { %vm1153_vm0 = vmor %vm1151_vm13, %vm1152_vm14  ;;  %vm2007_vm13 = vcmp.eq.f32.partialorder %v4364_v5, %v5190_v28 }
 0x208   : > { %v1148_v46 = vsub.f32 1.0, %v1147_v13  ;;  %v1903_v13 = vsel %vm1857_vm4, %v4957_v1, -inf }
 0x209   : > { %698 = vrot.lane.b32.xlu2 %v4960_v8, %s4196_s5 }
 0x20a   : > { %v1149_v26 = vmul.f32 %v4074_v21, %v1148_v46  ;;  %v1157_v46 = vand.u32 2147483648, %v814_v23 }
 0x20c   : > { %v1150_v22 = vadd.f32 %v4074_v21, %v1149_v26  ;;  %v5205_v26 = vmul.f32 2.0, %v5202_v19  ;;  %v1158_v16 = vor.u32 1.1754944e-38, %v1157_v46  ;;  %v5222_v46 = vpop.permute.xlu0 %700 }
 0x20d   : > { %v1896_v43 = vpop.xlane.xlu2 %1895  ;;  %7456 = vst [vmem:[#allocation56_spill] sm:$0xff] %v5222_v46 }
 0x20e   : > { %v1154_v2 = vsel %vm1153_vm0, %v4074_v21, %v1150_v22  ;;  %7452 = vst [vmem:[#allocation52_spill] sm:$0xff] %v5205_v26  ;;  %v3809_v62 = vadd.f32 -0.5, %v5205_v26  ;;  %vm2016_vm6 = vcmp.eq.f32.partialorder %v4715_v25, %v1896_v43  ;;  %v2064_v43 = vsel %vm2014_vm3, %v5164_v63, 21 }
 0x20f   : > { %v5210_v58 = vsel %vm1156_vm1, %v1158_v16, %v1154_v2  ;;  %v1963_v16 = vsel %vm1857_vm4, %v5184_v11, -inf  ;;  %v5279_v35 = vsel %vm1857_vm4, %v2064_v43, 2147483647  ;;  %vm2022_vm3 = vcmp.eq.f32.partialorder %v4320_v47, %v5178_v40 }
 0x210   : > { %7454 = vst [vmem:[#allocation54_spill] sm:$0xff] %v5210_v58  ;;  %v5213_v23 = vmul.f32 2.0, %v5210_v58  ;;  %v1712_v22 = vadd.f32 %v3809_v62, %v5097_v29  ;;  %v1879_v62 = vsel %vm1857_vm4, %v5030_v18, -inf }
 0x212   : > { %7455 = vst [vmem:[#allocation55_spill] sm:$0xff] %v5213_v23  ;;  %v3808_v21 = vadd.f32 -0.5, %v5213_v23  ;;  %v1736_v6 = vmul.f32 8.0, %v1712_v22  ;;  %v1954_v22 = vsel %vm1857_vm4, %v5198_v4, -inf }
 0x214   : > { %v1711_v3 = vadd.f32 %v3808_v21, %v5077_v0  ;;  %3897 = vst.msk [vmem:[%s4665_s12 + $0xb8] sm:$0xff] %vm3206_vm2, %v1736_v6  ;;  %v5234_v0 = vpop.permute.xlu0 %634  ;;  %v1960_v21 = vsel %vm1857_vm4, %v5176_v32, -inf }
 0x215   : > { %v5230_v29 = vpop.permute.xlu2 %640  ;;  %7459 = vst [vmem:[#allocation59_spill] sm:$0xff] %v5234_v0 }
 0x216   : > { %v1735_v2 = vmul.f32 8.0, %v1711_v3  ;;  %7458 = vst [vmem:[#allocation58_spill] sm:$0xff] %v5230_v29 }
 0x218   : > { %3896 = vst.msk [vmem:[%s4665_s12 + $0xb0] sm:$0xff] %vm3206_vm2, %v1735_v2  ;;  %vm2004_vm2 = vcmp.eq.f32.partialorder %v4289_v33, %v5192_v50  ;;  %v2066_v50 = vsel %vm2016_vm6, %v5164_v63, 21 }
 0x219   : > { %678 = vrot.lane.b32.xlu0 %v4957_v1, %s4196_s5  ;;  %v5271_v25 = vsel %vm1857_vm4, %v2066_v50, 2147483647  ;;  %v2254_v50 = vshra.s32 %v5279_v35, 16 }
 0x21a   : > { %7462 = vst [vmem:[#allocation62_spill] sm:$0xff] %v5271_v25 }
 0x21b   : > { %v5291_v26 = vcvt.s32.f32 %v2254_v50 }
 0x21c   : > { %v5248_v2 = vpop.xlane.xlu0 %1916 }
 0x21d   : > { %v5244_v3 = vpop.permute.xlu2 %704  ;;  %vm2023_vm1 = vcmp.eq.f32.partialorder %v4371_v10, %v5248_v2 }
 0x21e   : > { %7460 = vst [vmem:[#allocation60_spill] sm:$0xff] %v5244_v3 }
 0x225   : > { %v1887_v58 = vpop.xlane.xlu2 %1886 }
 0x226   : > { %vm2013_vm11 = vcmp.eq.f32.partialorder %v4629_v59, %v1887_v58 }
 0x227   : > { %v2063_v55 = vsel %vm2013_vm11, %v5164_v63, 21 }
 0x228   : > { %v5338_v58 = vsel %vm1857_vm4, %v2063_v55, 2147483647 }
 0x22f   : > { %1928 = vmax.xlane.f32.xlu1 %v1927_v45  ;;  %v5207_v45 = vpop.permute.xlu1 %638 }
 0x230   : > { %7453 = vst [vmem:[#allocation53_spill] sm:$0xff] %v5207_v45 }
 0x232   : > { %1904 = vmax.xlane.f32.xlu2 %v1903_v13 }
 0x237   : > { %1937 = vmax.xlane.f32.xlu1 %v1936_v56  ;;  %v5224_v13 = vpop.permute.xlu1 %702 }
 0x238   : > { %7457 = vst [vmem:[#allocation57_spill] sm:$0xff] %v5224_v13  ;;  %v1987_v41 = vsel %vm1857_vm4, %v5224_v13, -inf }
 0x23f   : > { %1964 = vmax.xlane.f32.xlu1 %v1963_v16  ;;  %v1884_v56 = vpop.xlane.xlu1 %1883  ;;  %v1990_v16 = vsel %vm1857_vm4, %v5244_v3, -inf  ;;  %v2065_v3 = vsel %vm2015_vm8, %v5164_v63, 21 }
 0x240   : > { %vm2012_vm5 = vcmp.eq.f32.partialorder %v4565_v7, %v1884_v56 }
 0x241   : > { %v2062_v6 = vsel %vm2012_vm5, %v5164_v63, 21 }
 0x242   : > { %v5253_v7 = vsel %vm1857_vm4, %v2062_v6, 2147483647 }
 0x243   : > { %1880 = vmax.xlane.f32.xlu0 %v1879_v62  ;;  %v2054_v62 = vsel %vm2004_vm2, %v5164_v63, 21  ;;  %v2224_v56 = vshra.s32 %v5253_v7, 16 }
 0x244   : > { %v5261_v33 = vsel %vm1857_vm4, %v2054_v62, 2147483647 }
 0x245   : > { %v5267_v6 = vcvt.s32.f32 %v2224_v56 }
 0x247   : > { %1955 = vmax.xlane.f32.xlu1 %v1954_v22  ;;  %v1933_v22 = vsel %vm1857_vm4, %v5234_v0, -inf  ;;  %v5285_v19 = vpop.xlane.xlu1 %1919 }
 0x248   : > { %vm2024_vm11 = vcmp.eq.f32.partialorder %v4741_v20, %v5285_v19 }
 0x24a   : > { %710 = vrot.lane.b32.xlu2 %v5132_v17, %s4196_s5 }
 0x24b   : > { %1961 = vmax.xlane.f32.xlu0 %v1960_v21  ;;  %v5265_v21 = vpop.permute.xlu0 %672 }
 0x24c   : > { %7461 = vst [vmem:[#allocation61_spill] sm:$0xff] %v5265_v21 }
 0x24f   : > { %1991 = vmax.xlane.f32.xlu1 %v1990_v16  ;;  %v2104_v16 = vshra.s32 %v5261_v33, 16 }
 0x251   : > { %v5275_v62 = vcvt.s32.f32 %v2104_v16  ;;  %v5289_v16 = vpop.permute.xlu2 %642 }
 0x252   : > { %7464 = vst [vmem:[#allocation64_spill] sm:$0xff] %v5289_v16  ;;  %v1945_v23 = vsel %vm1857_vm4, %v5289_v16, -inf }
 0x253   : > { %1934 = vmax.xlane.f32.xlu0 %v1933_v22  ;;  %v2284_v22 = vshra.s32 %v5271_v25, 16  ;;  %v1872_v31 = vpop.xlane.xlu0 %1871 }
 0x254   : > { %vm2008_vm7 = vcmp.eq.f32.partialorder %v4769_v24, %v1872_v31  ;;  %v2056_v24 = vsel %vm2006_vm9, %v5164_v63, 21 }
 0x255   : > { %v5282_v56 = vcvt.s32.f32 %v2284_v22  ;;  %v2058_v43 = vsel %vm2008_vm7, %v5164_v63, 21  ;;  %v5297_v22 = vpop.permute.xlu1 %674  ;;  %v5311_v44 = vsel %vm1857_vm4, %v2056_v24, 2147483647  ;;  %v1930_v24 = vsel %vm1857_vm4, %v5186_v39, -inf }
 0x256   : > { %7465 = vst [vmem:[#allocation65_spill] sm:$0xff] %v5297_v22  ;;  %v5302_v15 = vsel %vm1857_vm4, %v2058_v43, 2147483647  ;;  %v2134_v43 = vshra.s32 %v5311_v44, 16  ;;  %v1969_v30 = vsel %vm1857_vm4, %v5297_v22, -inf }
 0x257   : > { %2227 = vmin.xlane.f32.xlu1 %v5267_v6  ;;  %7463 = vst [vmem:[#allocation63_spill] sm:$0xff] %v5282_v56  ;;  %v2164_v50 = vshra.s32 %v5302_v15, 16 }
 0x258   : > { %v5321_v51 = vcvt.s32.f32 %v2134_v43 }
 0x259   : > { %v5305_v31 = vpop.xlane.xlu2 %1922  ;;  %v5315_v36 = vcvt.s32.f32 %v2164_v50 }
 0x25b   : > { %2107 = vmin.xlane.f32.xlu0 %v5275_v62  ;;  %v5350_v38 = vpop.permute.xlu0 %666 }
 0x25c   : > { %7468 = vst [vmem:[#allocation68_spill] sm:$0xff] %v5350_v38 }
 0x25d   : > { %v1875_v53 = vpop.xlane.xlu1 %1874 }
 0x25e   : > { %vm2009_vm12 = vcmp.eq.f32.partialorder %v4772_v9, %v1875_v53 }
 0x25f   : > { %2287 = vmin.xlane.f32.xlu1 %v5282_v56  ;;  %v2059_v48 = vsel %vm2009_vm12, %v5164_v63, 21 }
 0x260   : > { %v5353_v55 = vsel %vm1857_vm4, %v2059_v48, 2147483647 }
 0x261   : > { %v5329_v37 = vpop.permute.xlu2 %676 }
 0x262   : > { %7466 = vst [vmem:[#allocation66_spill] sm:$0xff] %v5329_v37  ;;  %v1972_v59 = vsel %vm1857_vm4, %v5329_v37, -inf  ;;  %v2057_v37 = vsel %vm2007_vm13, %v5164_v63, 21 }
 0x263   : > { %2257 = vmin.xlane.f32.xlu0 %v5291_v26 }
 0x265   : > { %v5333_v13 = vpop.permute.xlu1 %696 }
 0x266   : > { %7467 = vst [vmem:[#allocation67_spill] sm:$0xff] %v5333_v13  ;;  %v1978_v5 = vsel %vm1857_vm4, %v5333_v13, -inf }
 0x267   : > { %1946 = vmax.xlane.f32.xlu1 %v1945_v23  ;;  %v2055_v23 = vsel %vm2005_vm10, %v5164_v63, 21  ;;  %vm2025_vm10 = vcmp.eq.f32.partialorder %v4784_v61, %v5305_v31 }
 0x269   : > { %v1878_v9 = vpop.xlane.xlu2 %1877 }
 0x26a   : > { %vm2010_vm0 = vcmp.eq.f32.partialorder %v5019_v60, %v1878_v9 }
 0x26b   : > { %1988 = vmax.xlane.f32.xlu0 %v1987_v41  ;;  %v5326_v41 = vsel %vm1857_vm4, %v2055_v23, 2147483647  ;;  %v2239_v23 = vshra.s32 %v5338_v58, 16 }
 0x26c   : > { %v2119_v50 = vshra.s32 %v5326_v41, 16 }
 0x26d   : > { %v5348_v34 = vcvt.s32.f32 %v2239_v23  ;;  %v5356_v53 = vpop.xlane.xlu1 %1901  ;;  %v1899_v23 = vpop.xlane.xlu0 %1898 }
 0x26e   : > { %v5341_v43 = vcvt.s32.f32 %v2119_v50  ;;  %v2179_v50 = vshra.s32 %v5353_v55, 16  ;;  %vm2017_vm14 = vcmp.eq.f32.partialorder %v4735_v12, %v1899_v23  ;;  %v5397_v12 = vsel %vm1857_vm4, %v2057_v37, 2147483647 }
 0x26f   : > { %2167 = vmin.xlane.f32.xlu1 %v5315_v36  ;;  %vm2018_vm2 = vcmp.eq.f32.partialorder %v4948_v14, %v5356_v53 }
 0x270   : > { %v5365_v48 = vcvt.s32.f32 %v2179_v50 }
 0x273   : > { %1931 = vmax.xlane.f32.xlu2 %v1930_v24  ;;  %2137 = vmin.xlane.f32.xlu0 %v5321_v51  ;;  %v1984_v24 = vsel %vm1857_vm4, %v5222_v46, -inf  ;;  %v1966_v46 = vsel %vm1857_vm4, %v5265_v21, -inf }
 0x275   : > { %v5369_v54 = vpop.permute.xlu1 %708  ;;  %v5384_v49 = vpop.permute.xlu0 %706 }
 0x276   : > { %7469 = vst [vmem:[#allocation69_spill] sm:$0xff] %v5369_v54  ;;  %v1993_v4 = vsel %vm1857_vm4, %v5384_v49, -inf }
 0x277   : > { %1973 = vmax.xlane.f32.xlu1 %v1972_v59  ;;  %v1939_v59 = vsel %vm1857_vm4, %v5207_v45, -inf  ;;  %7471 = vst [vmem:[#allocation71_spill] sm:$0xff] %v5384_v49 }
 0x27b   : > { %1985 = vmax.xlane.f32.xlu2 %v1984_v24  ;;  %2122 = vmin.xlane.f32.xlu0 %v5341_v43  ;;  %v1942_v24 = vsel %vm1857_vm4, %v5230_v29, -inf }
 0x27f   : > { %2242 = vmin.xlane.f32.xlu1 %v5348_v34 }
 0x283   : > { %1940 = vmax.xlane.f32.xlu2 %v1939_v59  ;;  %1943 = vmax.xlane.f32.xlu0 %v1942_v24  ;;  %v5376_v59 = vsel %vm1857_vm4, %v2065_v3, 2147483647  ;;  %v5378_v24 = vpop.permute.xlu2 %698  ;;  %v2067_v3 = vsel %vm2017_vm14, %v5164_v63, 21 }
 0x284   : > { %7470 = vst [vmem:[#allocation70_spill] sm:$0xff] %v5378_v24  ;;  %v2269_v57 = vshra.s32 %v5376_v59, 16  ;;  %v1981_v50 = vsel %vm1857_vm4, %v5378_v24, -inf  ;;  %v5400_v28 = vsel %vm1857_vm4, %v2067_v3, 2147483647 }
 0x285   : > { %7472 = vst [vmem:[#allocation72_spill] sm:$0xff] %v5400_v28  ;;  %v2299_v23 = vshra.s32 %v5400_v28, 16 }
 0x286   : > { %v5390_v16 = vcvt.s32.f32 %v2269_v57  ;;  %v1908_v57 = vpop.xlane.xlu0 %1907 }
 0x287   : > { %2182 = vmin.xlane.f32.xlu1 %v5365_v48  ;;  %v5407_v24 = vcvt.s32.f32 %v2299_v23  ;;  %vm2020_vm15 = vcmp.eq.f32.partialorder %v4916_v52, %v1908_v57  ;;  %v1996_v23 = vsel %vm1857_vm4, %v5369_v54, -inf  ;;  %v2060_v54 = vsel %vm2010_vm0, %v5164_v63, 21 }
 0x288   : > { %v2070_v3 = vsel %vm2020_vm15, %v5164_v63, 21  ;;  %v5445_v9 = vsel %vm1857_vm4, %v2060_v54, 2147483647 }
 0x289   : > { %7473 = vst [vmem:[#allocation73_spill] sm:$0xff] %v5407_v24  ;;  %v5424_v25 = vsel %vm1857_vm4, %v2070_v3, 2147483647 }
 0x28a   : > { %v2344_v52 = vshra.s32 %v5424_v25, 16  ;;  %7478 = vst [vmem:[#allocation78_spill] sm:$0xff] %v5445_v9 }
 0x28b   : > { %1970 = vmax.xlane.f32.xlu0 %v1969_v30  ;;  %1967 = vmax.xlane.f32.xlu2 %v1966_v46  ;;  %v5392_v30 = vpop.xlane.xlu1 %1910  ;;  %v2149_v46 = vshra.s32 %v5397_v12, 16 }
 0x28c   : > { %vm2021_vm7 = vcmp.eq.f32.partialorder %v4960_v8, %v5392_v30 }
 0x28e   : > { %v5414_v37 = vpop.permute.xlu0 %644 }
 0x28f   : > { %1982 = vmax.xlane.f32.xlu1 %v1981_v50  ;;  %v5405_v50 = vcvt.s32.f32 %v2149_v46  ;;  %7475 = vst [vmem:[#allocation75_spill] sm:$0xff] %v5414_v37  ;;  %v1957_v46 = vsel %vm1857_vm4, %v5350_v38, -inf  ;;  %v1948_v2 = vsel %vm1857_vm4, %v5414_v37, -inf }
 0x293   : > { %1979 = vmax.xlane.f32.xlu0 %v1978_v5  ;;  %2272 = vmin.xlane.f32.xlu2 %v5390_v16  ;;  %v5409_v56 = vpop.permute.xlu1 %646 }
 0x294   : > { %7474 = vst [vmem:[#allocation74_spill] sm:$0xff] %v5409_v56  ;;  %v1951_v10 = vsel %vm1857_vm4, %v5409_v56, -inf }
 0x296   : > { %v1926_v57 = vpop.xlane.xlu0 %1925 }
 0x297   : > { %vm2026_vm6 = vcmp.eq.f32.partialorder %v4967_v27, %v1926_v57 }
 0x29b   : > { %2152 = vmin.xlane.f32.xlu2 %v5405_v50  ;;  %2302 = vmin.xlane.f32.xlu0 %v5407_v24  ;;  %v5428_v24 = vcvt.s32.f32 %v2344_v52 }
 0x2a2   : > { %v5417_v5 = vpop.xlane.xlu1 %1928 }
 0x2a3   : > { %1958 = vmax.xlane.f32.xlu2 %v1957_v46  ;;  %1997 = vmax.xlane.f32.xlu0 %v1996_v23  ;;  %v5440_v46 = vpop.permute.xlu0 %678  ;;  %v2073_v23 = vsel %vm2023_vm1, %v5164_v63, 21  ;;  %vm2027_vm13 = vcmp.eq.f32.partialorder %v5132_v17, %v5417_v5 }
 0x2a4   : > { %7477 = vst [vmem:[#allocation77_spill] sm:$0xff] %v5440_v46  ;;  %v1975_v57 = vsel %vm1857_vm4, %v5440_v46, -inf }
 0x2a5   : > { %v1905_v13 = vpop.xlane.xlu2 %1904 }
 0x2a6   : > { %vm2019_vm5 = vcmp.eq.f32.partialorder %v4957_v1, %v1905_v13 }
 0x2a7   : > { %v2069_v54 = vsel %vm2019_vm5, %v5164_v63, 21 }
 0x2a8   : > { %v5467_v56 = vsel %vm1857_vm4, %v2069_v54, 2147483647 }
 0x2a9   : > { %v2329_v27 = vshra.s32 %v5467_v56, 16 }
 0x2aa   : > { %v5430_v28 = vpop.xlane.xlu1 %1937 }
 0x2ab   : > { %1994 = vmax.xlane.f32.xlu2 %v1993_v4  ;;  %2347 = vmin.xlane.f32.xlu0 %v5428_v24  ;;  %v2194_v4 = vshra.s32 %v5445_v9, 16  ;;  %v2076_v9 = vsel %vm2026_vm6, %v5164_v63, 21  ;;  %v5491_v47 = vcvt.s32.f32 %v2329_v27  ;;  %vm2030_vm14 = vcmp.eq.f32.partialorder %v5180_v42, %v5430_v28 }
 0x2ad   : > { %v5438_v3 = vpop.permute.xlu2 %710  ;;  %v5463_v1 = vcvt.s32.f32 %v2194_v4  ;;  %v5482_v4 = vsel %vm1857_vm4, %v2076_v9, 2147483647 }
 0x2ae   : > { %7476 = vst [vmem:[#allocation76_spill] sm:$0xff] %v5438_v3  ;;  %v1999_v60 = vsel %vm1857_vm4, %v5438_v3, -inf  ;;  %v5457_v3 = vsel %vm1857_vm4, %v2073_v23, 2147483647  ;;  %v2068_v23 = vsel %vm2018_vm2, %v5164_v63, 21  ;;  %v2434_v40 = vshra.s32 %v5482_v4, 16 }
 0x2af   : > { %2000 = vmax.xlane.f32.xlu1 %v1999_v60  ;;  %7479 = vst [vmem:[#allocation79_spill] sm:$0xff] %v5463_v1  ;;  %v2389_v13 = vshra.s32 %v5457_v3, 16 }
 0x2b0   : > { %7480 = vst [vmem:[#allocation80_spill] sm:$0xff] %v5482_v4  ;;  %v5504_v30 = vcvt.s32.f32 %v2434_v40 }
 0x2b1   : > { %v5474_v14 = vcvt.s32.f32 %v2389_v13 }
 0x2b2   : > { %v5450_v52 = vpop.xlane.xlu1 %1964  ;;  %7482 = vst [vmem:[#allocation82_spill] sm:$0xff] %v5504_v30 }
 0x2b3   : > { %1952 = vmax.xlane.f32.xlu0 %v1951_v10  ;;  %1949 = vmax.xlane.f32.xlu2 %v1948_v2  ;;  %v5485_v10 = vsel %vm1857_vm4, %v2068_v23, 2147483647  ;;  %v2072_v2 = vsel %vm2022_vm3, %v5164_v63, 21  ;;  %v2071_v23 = vsel %vm2021_vm7, %v5164_v63, 21  ;;  %vm2039_vm15 = vcmp.eq.f32.partialorder %v5184_v11, %v5450_v52 }
 0x2b4   : > { %7481 = vst [vmem:[#allocation81_spill] sm:$0xff] %v5485_v10  ;;  %v2314_v54 = vshra.s32 %v5485_v10, 16  ;;  %v5496_v9 = vsel %vm1857_vm4, %v2072_v2, 2147483647  ;;  %v5512_v2 = vsel %vm1857_vm4, %v2071_v23, 2147483647 }
 0x2b5   : > { %7485 = vst [vmem:[#allocation85_spill] sm:$0xff] %v5512_v2  ;;  %v2359_v31 = vshra.s32 %v5512_v2, 16  ;;  %v2089_v42 = vsel %vm2039_vm15, %v5164_v63, 21 }
 0x2b6   : > { %v1881_v60 = vpop.xlane.xlu0 %1880  ;;  %v5506_v27 = vcvt.s32.f32 %v2314_v54 }
 0x2b7   : > { %2197 = vmin.xlane.f32.xlu1 %v5463_v1  ;;  %vm2011_vm8 = vcmp.eq.f32.partialorder %v5030_v18, %v1881_v60  ;;  %v5534_v19 = vcvt.s32.f32 %v2359_v31 }
 0x2b8   : > { %7483 = vst [vmem:[#allocation83_spill] sm:$0xff] %v5506_v27 }
 0x2b9   : > { %7487 = vst [vmem:[#allocation87_spill] sm:$0xff] %v5534_v19 }
 0x2ba   : > { %v5477_v53 = vpop.xlane.xlu1 %1955 }
 0x2bb   : > { %2392 = vmin.xlane.f32.xlu0 %v5474_v14  ;;  %1976 = vmax.xlane.f32.xlu2 %v1975_v57  ;;  %v2374_v57 = vshra.s32 %v5496_v9, 16 }
 0x2bd   : > { %v5522_v61 = vcvt.s32.f32 %v2374_v57 }
 0x2be   : > { %v1962_v13 = vpop.xlane.xlu0 %1961 }
 0x2bf   : > { %vm2038_vm9 = vcmp.eq.f32.partialorder %v5176_v32, %v1962_v13  ;;  %2332 = vmin.xlane.f32.xlu1 %v5491_v47  ;;  %v2075_v32 = vsel %vm2025_vm10, %v5164_v63, 21 }
 0x2c0   : > { %v2088_v8 = vsel %vm2038_vm9, %v5164_v63, 21  ;;  %v5527_v23 = vsel %vm1857_vm4, %v2075_v32, 2147483647 }
 0x2c1   : > { %v5515_v13 = vsel %vm1857_vm4, %v2088_v8, 2147483647  ;;  %7486 = vst [vmem:[#allocation86_spill] sm:$0xff] %v5527_v23  ;;  %v2074_v8 = vsel %vm2024_vm11, %v5164_v63, 21 }
 0x2c2   : > { %v5509_v1 = vpop.xlane.xlu1 %1991  ;;  %v2614_v40 = vshra.s32 %v5515_v13, 16  ;;  %v5542_v32 = vsel %vm1857_vm4, %v2074_v8, 2147483647 }
 0x2c3   : > { %7484 = vst [vmem:[#allocation84_spill] sm:$0xff] %v5509_v1  ;;  %2437 = vmin.xlane.f32.xlu0 %v5504_v30  ;;  %2317 = vmin.xlane.f32.xlu2 %v5506_v27  ;;  %v2419_v1 = vshra.s32 %v5527_v23, 16  ;;  %v2404_v60 = vshra.s32 %v5542_v32, 16 }
 0x2c4   : > { %v5536_v57 = vcvt.s32.f32 %v2614_v40 }
 0x2c5   : > { %v5552_v18 = vcvt.s32.f32 %v2419_v1 }
 0x2c6   : > { %v1935_v54 = vpop.xlane.xlu0 %1934 }
 0x2c7   : > { %vm2029_vm12 = vcmp.eq.f32.partialorder %v5234_v0, %v1935_v54  ;;  %2377 = vmin.xlane.f32.xlu1 %v5522_v61  ;;  %v2061_v54 = vsel %vm2011_vm8, %v5164_v63, 21  ;;  %7488 = vst [vmem:[#allocation88_spill] sm:$0xff] %v5552_v18  ;;  %v5563_v0 = vcvt.s32.f32 %v2404_v60 }
 0x2c8   : > { %v2079_v20 = vsel %vm2029_vm12, %v5164_v63, 21  ;;  %v5559_v8 = vsel %vm1857_vm4, %v2061_v54, 2147483647 }
 0x2c9   : > { %v5545_v49 = vsel %vm1857_vm4, %v2079_v20, 2147483647  ;;  %7489 = vst [vmem:[#allocation89_spill] sm:$0xff] %v5559_v8  ;;  %v2077_v20 = vsel %vm2027_vm13, %v5164_v63, 21  ;;  %v2209_v17 = vshra.s32 %v5559_v8, 16  ;;  %v2080_v8 = vsel %vm2030_vm14, %v5164_v63, 21 }
 0x2ca   : > { %v5539_v2 = vpop.xlane.xlu1 %2227  ;;  %v2479_v31 = vshra.s32 %v5545_v49, 16  ;;  %v5571_v1 = vsel %vm1857_vm4, %v2077_v20, 2147483647  ;;  %v5589_v23 = vsel %vm1857_vm4, %v2080_v8, 2147483647 }
 0x2cb   : > { %2362 = vmin.xlane.f32.xlu2 %v5534_v19  ;;  %2617 = vmin.xlane.f32.xlu0 %v5536_v57  ;;  %7490 = vst [vmem:[#allocation90_spill] sm:$0xff] %v5571_v1  ;;  %v5577_v54 = vcvt.s32.f32 %v2209_v17  ;;  %v2449_v60 = vshra.s32 %v5571_v1, 16  ;;  %v2494_v28 = vshra.s32 %v5589_v23, 16  ;;  %vm2229_vm13 = vcmp.eq.f32.partialorder %v5267_v6, %v5539_v2 }
 0x2cc   : > { %v5565_v19 = vcvt.s32.f32 %v2479_v31 }
 0x2cd   : > { %7491 = vst [vmem:[#allocation91_spill] sm:$0xff] %v5577_v54  ;;  %v5598_v1 = vcvt.s32.f32 %v2494_v28 }
 0x2ce   : > { %v5556_v40 = vpop.xlane.xlu0 %2107 }
 0x2cf   : > { %2422 = vmin.xlane.f32.xlu1 %v5552_v18  ;;  %v5584_v18 = vcvt.s32.f32 %v2449_v60  ;;  %vm2109_vm1 = vcmp.eq.f32.partialorder %v5275_v62, %v5556_v40 }
 0x2d1   : > { %7492 = vst [vmem:[#allocation92_spill] sm:$0xff] %v5584_v18 }
 0x2d2   : > { %v5568_v5 = vpop.xlane.xlu1 %2287 }
 0x2d3   : > { %2407 = vmin.xlane.f32.xlu2 %v5563_v0  ;;  %2482 = vmin.xlane.f32.xlu0 %v5565_v19 }
 0x2d6   : > { %v5580_v31 = vpop.xlane.xlu0 %2257 }
 0x2d7   : > { %2212 = vmin.xlane.f32.xlu1 %v5577_v54  ;;  %v5603_v54 = vsel %vm1857_vm4, %v2089_v42, 2147483647  ;;  %vm2259_vm2 = vcmp.eq.f32.partialorder %v5291_v26, %v5580_v31 }
 0x2d8   : > { %7494 = vst [vmem:[#allocation94_spill] sm:$0xff] %v5603_v54  ;;  %v2629_v8 = vshra.s32 %v5603_v54, 16 }
 0x2da   : > { %v5586_v20 = vpop.xlane.xlu1 %1946  ;;  %v5611_v11 = vcvt.s32.f32 %v2629_v8  ;;  %v2238_v8 = vand.u32 65535, %v5338_v58  ;;  %v2178_v58 = vand.u32 65535, %v5353_v55  ;;  %v2133_v55 = vand.u32 65535, %v5311_v44 }
 0x2db   : > { %2452 = vmin.xlane.f32.xlu2 %v5584_v18  ;;  %v2118_v44 = vand.u32 65535, %v5326_v41 }
 0x2dc   : > { %7495 = vst [vmem:[#allocation95_spill] sm:$0xff] %v5611_v11  ;;  %v2180_v62 = vcvt.s32.f32 %v2178_v58 }
 0x2de   : > { %v5595_v17 = vpop.xlane.xlu0 %1988 }
 0x2df   : > { %7493 = vst [vmem:[#allocation93_spill] sm:$0xff] %v5595_v17 }
 0x2e2   : > { %v5600_v60 = vpop.xlane.xlu1 %2167 }
 0x2e3   : > { %2497 = vmin.xlane.f32.xlu2 %v5598_v1 }
 0x2e6   : > { %v1932_v18 = vpop.xlane.xlu2 %1931  ;;  %v5607_v30 = vpop.xlane.xlu0 %2137 }
 0x2e7   : > { %vm2028_vm0 = vcmp.eq.f32.partialorder %v5186_v39, %v1932_v18  ;;  %v2103_v39 = vand.u32 65535, %v5261_v33  ;;  %v2253_v33 = vand.u32 65535, %v5279_v35  ;;  %vm2139_vm3 = vcmp.eq.f32.partialorder %v5321_v51, %v5607_v30 }
 0x2e8   : > { %v2078_v52 = vsel %vm2028_vm0, %v5164_v63, 21  ;;  %v2268_v35 = vand.u32 65535, %v5376_v59  ;;  %v2148_v59 = vand.u32 65535, %v5397_v12  ;;  %vm2169_vm0 = vcmp.eq.f32.partialorder %v5315_v36, %v5600_v60 }
 0x2e9   : > { %v5614_v28 = vsel %vm1857_vm4, %v2078_v52, 2147483647  ;;  %v2105_v4 = vcvt.s32.f32 %v2103_v39  ;;  %v2255_v39 = vcvt.s32.f32 %v2253_v33 }
 0x2ea   : > { %7496 = vst [vmem:[#allocation96_spill] sm:$0xff] %v5614_v28  ;;  %v5616_v17 = vpop.xlane.xlu1 %1973  ;;  %v2464_v42 = vshra.s32 %v5614_v28, 16  ;;  %v2240_v28 = vcvt.s32.f32 %v2238_v8  ;;  %v2135_v8 = vcvt.s32.f32 %v2133_v55  ;;  %v2150_v41 = vcvt.s32.f32 %v2148_v59 }
 0x2eb   : > { %2632 = vmin.xlane.f32.xlu2 %v5611_v11  ;;  %v2110_v11 = vsel %vm2109_vm1, %v2105_v4, inf  ;;  %v2260_v4 = vsel %vm2259_vm2, %v2255_v39, inf  ;;  %v2120_v39 = vcvt.s32.f32 %v2118_v44 }
 0x2ec   : > { %v5620_v27 = vcvt.s32.f32 %v2464_v42  ;;  %v2140_v26 = vsel %vm2139_vm3, %v2135_v8, inf  ;;  %v2223_v8 = vand.u32 65535, %v5253_v7 }
 0x2ee   : > { %7497 = vst [vmem:[#allocation97_spill] sm:$0xff] %v5620_v27  ;;  %v5622_v54 = vpop.xlane.xlu2 %1985  ;;  %2467 = vmin.xlane.f32.xlu1 %v5620_v27  ;;  %v5625_v18 = vpop.xlane.xlu0 %2122 }
 0x2ef   : > { %7498 = vst [vmem:[#allocation98_spill] sm:$0xff] %v5622_v54  ;;  %vm2124_vm10 = vcmp.eq.f32.partialorder %v5341_v43, %v5625_v18 }
 0x2f0   : > { %v2125_v55 = vsel %vm2124_vm10, %v2120_v39, inf }
 0x2f2   : > { %v5629_v52 = vpop.xlane.xlu1 %2242 }
 0x2f3   : > { %7499 = vst [vmem:[#allocation99_spill] sm:$0xff] %v5629_v52  ;;  %vm2244_vm5 = vcmp.eq.f32.partialorder %v5348_v34, %v5629_v52 }
 0x2f4   : > { %v5635_v42 = vsel %vm2244_vm5, %v2240_v28, inf }
 0x2f6   : > { %v1941_v27 = vpop.xlane.xlu2 %1940  ;;  %2111 = vmin.xlane.f32.xlu1 %v2110_v11  ;;  %v1944_v10 = vpop.xlane.xlu0 %1943 }
 0x2f7   : > { %vm2031_vm7 = vcmp.eq.f32.partialorder %v5207_v45, %v1941_v27  ;;  %vm2032_vm8 = vcmp.eq.f32.partialorder %v5230_v29, %v1944_v10  ;;  %v2225_v10 = vcvt.s32.f32 %v2223_v8 }
 0x2f8   : > { %v2081_v51 = vsel %vm2031_vm7, %v5164_v63, 21 }
 0x2fa   : > { %v5639_v54 = vpop.xlane.xlu1 %2182 }
 0x2fb   : > { %7500 = vst [vmem:[#allocation100_spill] sm:$0xff] %v5639_v54  ;;  %vm2184_vm6 = vcmp.eq.f32.partialorder %v5365_v48, %v5639_v54  ;;  %v2270_v48 = vcvt.s32.f32 %v2268_v35  ;;  %v2328_v54 = vand.u32 65535, %v5467_v56  ;;  %v7504_v56 = vld [vmem:[#allocation50_spill] sm:$0xff] }
 0x2fc   : > { %v5645_v34 = vsel %vm2184_vm6, %v2180_v62, inf  ;;  %vm2036_vm2 = vcmp.eq.f32.partialorder %v7504_v56, %v5477_v53 }
 0x2fd   : > { %v2330_v36 = vcvt.s32.f32 %v2328_v54  ;;  %v2086_v54 = vsel %vm2036_vm2, %v5164_v63, 21 }
 0x2fe   : > { %v1968_v28 = vpop.xlane.xlu2 %1967  ;;  %2261 = vmin.xlane.f32.xlu1 %v2260_v4  ;;  %v1971_v11 = vpop.xlane.xlu0 %1970  ;;  %v5664_v4 = vsel %vm1857_vm4, %v2081_v51, 2147483647  ;;  %v5761_v56 = vsel %vm1857_vm4, %v2086_v54, 2147483647  ;;  %v7510_v54 = vld [vmem:[#allocation67_spill] sm:$0xff] }
 0x2ff   : > { %vm2040_vm11 = vcmp.eq.f32.partialorder %v5265_v21, %v1968_v28  ;;  %v2509_v43 = vshra.s32 %v5664_v4, 16  ;;  %vm2041_vm14 = vcmp.eq.f32.partialorder %v5297_v22, %v1971_v11 }
 0x300   : > { %v2090_v12 = vsel %vm2040_vm11, %v5164_v63, 21 }
 0x301   : > { %v5681_v44 = vsel %vm1857_vm4, %v2090_v12, 2147483647 }
 0x302   : > { %v2644_v51 = vshra.s32 %v5681_v44, 16  ;;  %v5693_v59 = vpop.xlane.xlu1 %1982 }
 0x304   : > { %v5696_v6 = vcvt.s32.f32 %v2644_v51 }
 0x306   : > { %v5651_v58 = vpop.xlane.xlu2 %2272  ;;  %2141 = vmin.xlane.f32.xlu1 %v2140_v26  ;;  %v5653_v33 = vpop.xlane.xlu0 %1979  ;;  %v5677_v26 = vcvt.s32.f32 %v2509_v43 }
 0x307   : > { %vm2274_vm9 = vcmp.eq.f32.partialorder %v5390_v16, %v5651_v58 }
 0x308   : > { %v2275_v62 = vsel %vm2274_vm9, %v2270_v48, inf  ;;  %v2082_v48 = vsel %vm2032_vm8, %v5164_v63, 21  ;;  %vm2044_vm9 = vcmp.eq.f32.partialorder %v7510_v54, %v5653_v33 }
 0x309   : > { %2276 = vmin.xlane.f32.xlu0 %v2275_v62  ;;  %v2230_v62 = vsel %vm2229_vm13, %v2225_v10, inf  ;;  %v5690_v7 = vsel %vm1857_vm4, %v2082_v48, 2147483647 }
 0x30a   : > { %v2524_v39 = vshra.s32 %v5690_v7, 16 }
 0x30c   : > { %v5704_v43 = vcvt.s32.f32 %v2524_v39  ;;  %v2163_v39 = vand.u32 65535, %v5302_v15 }
 0x30e   : > { %v5666_v27 = vpop.xlane.xlu2 %2152  ;;  %2126 = vmin.xlane.f32.xlu1 %v2125_v55  ;;  %v5668_v16 = vpop.xlane.xlu0 %2302  ;;  %v2091_v55 = vsel %vm2041_vm14, %v5164_v63, 21 }
 0x30f   : > { %vm2154_vm12 = vcmp.eq.f32.partialorder %v5405_v50, %v5666_v27  ;;  %v5707_v12 = vsel %vm1857_vm4, %v2091_v55, 2147483647  ;;  %v2388_v55 = vand.u32 65535, %v5457_v3 }
 0x310   : > { %v2155_v35 = vsel %vm2154_vm12, %v2150_v41, inf  ;;  %v2659_v8 = vshra.s32 %v5707_v12, 16 }
 0x311   : > { %2156 = vmin.xlane.f32.xlu0 %v2155_v35  ;;  %v2390_v45 = vcvt.s32.f32 %v2388_v55 }
 0x316   : > { %v1959_v50 = vpop.xlane.xlu2 %1958  ;;  %2512 = vmin.xlane.f32.xlu1 %v5677_v26  ;;  %v5686_v28 = vpop.xlane.xlu0 %1997 }
 0x317   : > { %vm2037_vm15 = vcmp.eq.f32.partialorder %v5350_v38, %v1959_v50 }
 0x318   : > { %v2087_v22 = vsel %vm2037_vm15, %v5164_v63, 21 }
 0x319   : > { %2231 = vmin.xlane.f32.xlu0 %v2230_v62  ;;  %v5715_v62 = vcvt.s32.f32 %v2659_v8  ;;  %v2165_v8 = vcvt.s32.f32 %v2163_v39  ;;  %v5734_v15 = vsel %vm1857_vm4, %v2087_v22, 2147483647 }
 0x31a   : > { %v2599_v52 = vshra.s32 %v5734_v15, 16 }
 0x31b   : > { %v2170_v3 = vsel %vm2169_vm0, %v2165_v8, inf  ;;  %v2613_v8 = vand.u32 65535, %v5515_v13 }
 0x31c   : > { %v5750_v55 = vcvt.s32.f32 %v2599_v52 }
 0x31e   : > { %v5699_v41 = vpop.xlane.xlu2 %1994  ;;  %2647 = vmin.xlane.f32.xlu1 %v5696_v6  ;;  %v5702_v35 = vpop.xlane.xlu0 %2347 }
 0x31f   : > { %vm2349_vm11 = vcmp.eq.f32.partialorder %v5428_v24, %v5702_v35 }
 0x321   : > { %2527 = vmin.xlane.f32.xlu0 %v5704_v43 }
 0x322   : > { %v5710_v11 = vpop.xlane.xlu1 %2000 }
 0x326   : > { %v1950_v48 = vpop.xlane.xlu2 %1949  ;;  %v5713_v10 = vpop.xlane.xlu0 %1952 }
 0x327   : > { %vm2034_vm10 = vcmp.eq.f32.partialorder %v5414_v37, %v1950_v48 }
 0x329   : > { %2662 = vmin.xlane.f32.xlu0 %v5715_v62 }
 0x32a   : > { %v5719_v51 = vpop.xlane.xlu1 %2197 }
 0x32b   : > { %7501 = vst [vmem:[#allocation101_spill] sm:$0xff] %v5719_v51 }
 0x32e   : > { %v5726_v29 = vpop.xlane.xlu2 %1976  ;;  %v5728_v21 = vpop.xlane.xlu0 %2392 }
 0x32f   : > { %7502 = vst [vmem:[#allocation102_spill] sm:$0xff] %v5728_v21  ;;  %vm2394_vm1 = vcmp.eq.f32.partialorder %v5474_v14, %v5728_v21  ;;  %v2615_v21 = vcvt.s32.f32 %v2613_v8  ;;  %v2343_v8 = vand.u32 65535, %v5424_v25  ;;  %vm2043_vm14 = vcmp.eq.f32.partialorder %v5440_v46, %v5726_v29 }
 0x330   : > { %v2395_v50 = vsel %vm2394_vm1, %v2390_v45, inf  ;;  %v2373_v45 = vand.u32 65535, %v5496_v9  ;;  %v7507_v9 = vld [vmem:[#allocation73_spill] sm:$0xff] }
 0x331   : > { %2171 = vmin.xlane.f32.xlu0 %v2170_v3  ;;  %2396 = vmin.xlane.f32.xlu1 %v2395_v50  ;;  %v7506_v50 = vld [vmem:[#allocation72_spill] sm:$0xff]  ;;  %vm2304_vm3 = vcmp.eq.f32.partialorder %v7507_v9, %v5668_v16  ;;  %v2084_v9 = vsel %vm2034_vm10, %v5164_v63, 21  ;;  %v2345_v48 = vcvt.s32.f32 %v2343_v8 }
 0x332   : > { %v5736_v38 = vpop.xlane.xlu1 %2332  ;;  %v2375_v3 = vcvt.s32.f32 %v2373_v45  ;;  %v2584_v45 = vshra.s32 %v5761_v56, 16  ;;  %v5800_v24 = vsel %vm1857_vm4, %v2084_v9, 2147483647  ;;  %v7515_v9 = vld [vmem:[#allocation64_spill] sm:$0xff] }
 0x333   : > { %7503 = vst [vmem:[#allocation103_spill] sm:$0xff] %v5736_v38  ;;  %vm2334_vm5 = vcmp.eq.f32.partialorder %v5491_v47, %v5736_v38  ;;  %vm2033_vm15 = vcmp.eq.f32.partialorder %v7515_v9, %v5586_v20 }
 0x334   : > { %v5741_v39 = vsel %vm2334_vm5, %v2330_v36, inf  ;;  %v2298_v36 = vand.u32 65535, %v7506_v50  ;;  %v2478_v50 = vand.u32 65535, %v5545_v49 }
 0x336   : > { %v5745_v14 = vpop.xlane.xlu2 %2317  ;;  %v5747_v22 = vpop.xlane.xlu0 %2437  ;;  %v2300_v13 = vcvt.s32.f32 %v2298_v36  ;;  %v5780_v36 = vcvt.s32.f32 %v2584_v45  ;;  %v2480_v25 = vcvt.s32.f32 %v2478_v50  ;;  %v7514_v50 = vld [vmem:[#allocation63_spill] sm:$0xff] }
 0x337   : > { %7505 = vst [vmem:[#allocation104_spill] sm:$0xff] %v5747_v22  ;;  %vm2289_vm13 = vcmp.eq.f32.partialorder %v7514_v50, %v5568_v5  ;;  %v7517_v50 = vld [vmem:[#allocation66_spill] sm:$0xff] }
 0x338   : > { %vm2042_vm0 = vcmp.eq.f32.partialorder %v7517_v50, %v5616_v17  ;;  %v7521_v17 = vld [vmem:[#allocation98_spill] sm:$0xff]  ;;  %v7526_v50 = vld [vmem:[#allocation96_spill] sm:$0xff] }
 0x339   : > { %2602 = vmin.xlane.f32.xlu1 %v5750_v55  ;;  %v2463_v54 = vand.u32 65535, %v7526_v50 }
 0x33a   : > { %v5755_v47 = vpop.xlane.xlu1 %2377 }
 0x33b   : > { %vm2379_vm6 = vcmp.eq.f32.partialorder %v5522_v61, %v5755_v47  ;;  %v2305_v61 = vsel %vm2304_vm3, %v2300_v13, inf  ;;  %v2465_v50 = vcvt.s32.f32 %v2463_v54  ;;  %v7536_v54 = vld [vmem:[#allocation79_spill] sm:$0xff] }
 0x33c   : > { %v2380_v53 = vsel %vm2379_vm6, %v2375_v3, inf }
 0x33d   : > { %2381 = vmin.xlane.f32.xlu2 %v2380_v53  ;;  %v2403_v53 = vand.u32 65535, %v5542_v32  ;;  %v7512_v32 = vld [vmem:[#allocation62_spill] sm:$0xff] }
 0x33e   : > { %v5765_v52 = vpop.xlane.xlu2 %2362  ;;  %v5767_v38 = vpop.xlane.xlu0 %2617  ;;  %v2283_v13 = vand.u32 65535, %v7512_v32 }
 0x33f   : > { %7508 = vst [vmem:[#allocation72_spill] sm:$0xff] %v5765_v52  ;;  %vm2619_vm7 = vcmp.eq.f32.partialorder %v5536_v57, %v5767_v38  ;;  %v2094_v57 = vsel %vm2044_vm9, %v5164_v63, 21  ;;  %v2405_v33 = vcvt.s32.f32 %v2403_v53  ;;  %v2554_v53 = vshra.s32 %v5800_v24, 16 }
 0x340   : > { %7509 = vst [vmem:[#allocation73_spill] sm:$0xff] %v5767_v38  ;;  %v5772_v3 = vsel %vm2619_vm7, %v2615_v21, inf  ;;  %v5797_v45 = vsel %vm1857_vm4, %v2094_v57, 2147483647  ;;  %v2350_v38 = vsel %vm2349_vm11, %v2345_v48, inf  ;;  %v2093_v57 = vsel %vm2043_vm14, %v5164_v63, 21 }
 0x341   : > { %2306 = vmin.xlane.f32.xlu1 %v2305_v61  ;;  %v5819_v32 = vcvt.s32.f32 %v2554_v53  ;;  %v5822_v29 = vsel %vm1857_vm4, %v2093_v57, 2147483647  ;;  %v2092_v57 = vsel %vm2042_vm0, %v5164_v63, 21  ;;  %vm2199_vm9 = vcmp.eq.f32.partialorder %v7536_v54, %v5719_v51  ;;  %v7541_v54 = vld [vmem:[#allocation88_spill] sm:$0xff] }
 0x342   : > { %v2689_v20 = vshra.s32 %v5822_v29, 16 }
 0x344   : > { %v5839_v53 = vcvt.s32.f32 %v2689_v20 }
 0x345   : > { %2587 = vmin.xlane.f32.xlu2 %v5780_v36 }
 0x346   : > { %v5787_v21 = vpop.xlane.xlu2 %2407  ;;  %v5789_v49 = vpop.xlane.xlu0 %2482 }
 0x347   : > { %7511 = vst [vmem:[#allocation105_spill] sm:$0xff] %v5789_v49  ;;  %vm2484_vm12 = vcmp.eq.f32.partialorder %v5565_v19, %v5789_v49  ;;  %vm2409_vm8 = vcmp.eq.f32.partialorder %v5563_v0, %v5787_v21  ;;  %v2285_v19 = vcvt.s32.f32 %v2283_v13  ;;  %v2704_v0 = vshra.s32 %v5797_v45, 16 }
 0x348   : > { %v2410_v61 = vsel %vm2409_vm8, %v2405_v33, inf  ;;  %v5802_v37 = vsel %vm2484_vm12, %v2480_v25, inf  ;;  %v2083_v13 = vsel %vm2033_vm15, %v5164_v63, 21  ;;  %v2493_v25 = vand.u32 65535, %v5589_v23 }
 0x349   : > { %7513 = vst [vmem:[#allocation62_spill] sm:$0xff] %v5802_v37  ;;  %2411 = vmin.xlane.f32.xlu0 %v2410_v61  ;;  %2351 = vmin.xlane.f32.xlu1 %v2350_v38  ;;  %v2290_v8 = vsel %vm2289_vm13, %v2285_v19, inf  ;;  %v5815_v38 = vpop.xlane.xlu1 %2422  ;;  %v5817_v48 = vcvt.s32.f32 %v2704_v0  ;;  %v5830_v61 = vsel %vm1857_vm4, %v2083_v13, 2147483647  ;;  %v7531_v37 = vld [vmem:[#allocation71_spill] sm:$0xff] }
 0x34a   : > { %7516 = vst [vmem:[#allocation63_spill] sm:$0xff] %v5815_v38  ;;  %v2495_v0 = vcvt.s32.f32 %v2493_v25  ;;  %v2539_v23 = vshra.s32 %v5830_v61, 16  ;;  %v7523_v25 = vld [vmem:[#allocation81_spill] sm:$0xff]  ;;  %vm2049_vm3 = vcmp.eq.f32.partialorder %v7531_v37, %v5699_v41  ;;  %v7537_v41 = vld [vmem:[#allocation70_spill] sm:$0xff]  ;;  %vm2424_vm11 = vcmp.eq.f32.partialorder %v7541_v54, %v5815_v38 }
 0x34b   : > { %v2313_v46 = vand.u32 65535, %v7523_v25  ;;  %vm2045_vm10 = vcmp.eq.f32.partialorder %v7537_v41, %v5693_v59  ;;  %v7542_v59 = vld [vmem:[#allocation74_spill] sm:$0xff]  ;;  %v2264_v54 = vcvt.f32.s32 %v5580_v31 }
 0x34c   : > { %v2095_v37 = vsel %vm2045_vm10, %v5164_v63, 21  ;;  %vm2035_vm12 = vcmp.eq.f32.partialorder %v7542_v59, %v5713_v10 }
 0x34d   : > { %2291 = vmin.xlane.f32.xlu2 %v2290_v8  ;;  %v2315_v25 = vcvt.s32.f32 %v2313_v46  ;;  %v7533_v46 = vld [vmem:[#allocation78_spill] sm:$0xff] }
 0x34e   : > { %v5813_v33 = vpop.xlane.xlu2 %2452 }
 0x351   : > { %2707 = vmin.xlane.f32.xlu0 %v5817_v48  ;;  %2557 = vmin.xlane.f32.xlu1 %v5819_v32  ;;  %v5845_v13 = vpop.xlane.xlu1 %2212 }
 0x352   : > { %7520 = vst [vmem:[#allocation108_spill] sm:$0xff] %v5845_v13 }
 0x355   : > { %2246 = vmin.xlane.f32.xlu2 %v5635_v42  ;;  %v7522_v42 = vld [vmem:[#allocation56_spill] sm:$0xff] }
 0x356   : > { %v5835_v19 = vpop.xlane.xlu2 %2497  ;;  %vm2046_vm5 = vcmp.eq.f32.partialorder %v7522_v42, %v7521_v17  ;;  %v7528_v17 = vld [vmem:[#allocation82_spill] sm:$0xff] }
 0x357   : > { %7518 = vst [vmem:[#allocation106_spill] sm:$0xff] %v5835_v19  ;;  %vm2499_vm1 = vcmp.eq.f32.partialorder %v5598_v1, %v5835_v19  ;;  %v7524_v1 = vld [vmem:[#allocation80_spill] sm:$0xff]  ;;  %v5853_v19 = vcvt.s32.f32 %v2539_v23  ;;  %v2096_v49 = vsel %vm2046_vm5, %v5164_v63, 21  ;;  %vm2439_vm6 = vcmp.eq.f32.partialorder %v7528_v17, %v5747_v22  ;;  %v7558_v22 = vld [vmem:[#allocation13_spill] sm:$0xff] }
 0x358   : > { %v5842_v8 = vsel %vm2499_vm1, %v2495_v0, inf  ;;  %v2433_v20 = vand.u32 65535, %v7524_v1  ;;  %v5856_v0 = vsel %vm1857_vm4, %v2092_v57, 2147483647  ;;  %v5867_v57 = vsel %vm1857_vm4, %v2096_v49, 2147483647 }
 0x359   : > { %7519 = vst [vmem:[#allocation107_spill] sm:$0xff] %v5842_v8  ;;  %2186 = vmin.xlane.f32.xlu0 %v5645_v34  ;;  %2692 = vmin.xlane.f32.xlu1 %v5839_v53  ;;  %v7527_v34 = vld [vmem:[#allocation83_spill] sm:$0xff]  ;;  %v2674_v23 = vshra.s32 %v5856_v0, 16  ;;  %v2099_v49 = vsel %vm2049_vm3, %v5164_v63, 21  ;;  %v3820_v51 = vadd.f32 -1.0, %v7558_v22  ;;  %v7564_v22 = vld [vmem:[#allocation57_spill] sm:$0xff] }
 0x35a   : > { %7525 = vst [vmem:[#allocation98_spill] sm:$0xff] %v5856_v0  ;;  %vm2319_vm2 = vcmp.eq.f32.partialorder %v7527_v34, %v5745_v14  ;;  %v2435_v9 = vcvt.s32.f32 %v2433_v20  ;;  %v7532_v34 = vld [vmem:[#allocation97_spill] sm:$0xff]  ;;  %v2193_v20 = vand.u32 65535, %v7533_v46 }
 0x35b   : > { %v2320_v1 = vsel %vm2319_vm2, %v2315_v25, inf  ;;  %7529 = vst [vmem:[#allocation81_spill] sm:$0xff] %v5867_v57  ;;  %v5876_v17 = vcvt.s32.f32 %v2674_v23  ;;  %v5891_v23 = vsel %vm1857_vm4, %v2099_v49, 2147483647 }
 0x35c   : > { %v2440_v8 = vsel %vm2439_vm6, %v2435_v9, inf  ;;  %v2734_v9 = vshra.s32 %v5867_v57, 16  ;;  %7540 = vst [vmem:[#allocation97_spill] sm:$0xff] %v5891_v23  ;;  %v2779_v49 = vshra.s32 %v5891_v23, 16  ;;  %vm3223_vm6 = vcmask 23568  }
 0x35d   : > { %2542 = vmin.xlane.f32.xlu2 %v5853_v19  ;;  %7534 = vst [vmem:[#allocation96_spill] sm:$0xff] %v5876_v17 }
 0x35e   : > { %v5888_v46 = vcvt.s32.f32 %v2734_v9  ;;  %v7543_v9 = vld [vmem:[#allocation85_spill] sm:$0xff]  ;;  %v5909_v59 = vcvt.s32.f32 %v2779_v49 }
 0x360   : > { %7539 = vst [vmem:[#allocation82_spill] sm:$0xff] %v5888_v46 }
 0x361   : > { %v5869_v42 = vpop.xlane.xlu1 %2467  ;;  %2321 = vmin.xlane.f32.xlu0 %v2320_v1  ;;  %2441 = vmin.xlane.f32.xlu1 %v2440_v8  ;;  %v2195_v8 = vcvt.s32.f32 %v2193_v20  ;;  %v7538_v1 = vld [vmem:[#allocation86_spill] sm:$0xff]  ;;  %7546 = vst [vmem:[#allocation79_spill] sm:$0xff] %v5909_v59 }
 0x362   : > { %7530 = vst [vmem:[#allocation80_spill] sm:$0xff] %v5869_v42  ;;  %vm2469_vm7 = vcmp.eq.f32.partialorder %v7532_v34, %v5869_v42  ;;  %v2418_v34 = vand.u32 65535, %v7538_v1  ;;  %v2114_v42 = vcvt.f32.s32 %v5556_v40  ;;  %v2358_v1 = vand.u32 65535, %v7543_v9 }
 0x363   : > { %v5879_v25 = vsel %vm2469_vm7, %v2465_v50, inf  ;;  %v2200_v50 = vsel %vm2199_vm9, %v2195_v8, inf  ;;  %v5903_v40 = vsel %vm1857_vm4, %v2095_v37, 2147483647 }
 0x364   : > { %7535 = vst [vmem:[#allocation83_spill] sm:$0xff] %v5879_v25  ;;  %v2420_v20 = vcvt.s32.f32 %v2418_v34  ;;  %v2115_v57 = vshll.u32 %v2114_v42, 16  ;;  %v2360_v10 = vcvt.s32.f32 %v2358_v1  ;;  %v2719_v9 = vshra.s32 %v5903_v40, 16  ;;  %v7549_v1 = vld [vmem:[#allocation6_spill] sm:$0xff] }
 0x365   : > { %2677 = vmin.xlane.f32.xlu2 %v5876_v17  ;;  %7544 = vst [vmem:[#allocation78_spill] sm:$0xff] %v5903_v40  ;;  %v2265_v42 = vshll.u32 %v2264_v54, 16  ;;  %v3812_v49 = vadd.f32 -1.0, %v7549_v1  ;;  %v7551_v40 = vld [vmem:[#allocation84_spill] sm:$0xff]  ;;  %v7553_v54 = vld [vmem:[#allocation7_spill] sm:$0xff]  ;;  %v2279_v1 = vcvt.f32.s32 %v5651_v58 }
 0x366   : > { %v2425_v41 = vsel %vm2424_vm11, %v2420_v20, inf }
 0x369   : > { %v2112_v25 = vpop.xlane.xlu1 %2111  ;;  %2201 = vmin.xlane.f32.xlu0 %v2200_v50  ;;  %2737 = vmin.xlane.f32.xlu1 %v5888_v46  ;;  %v2085_v50 = vsel %vm2035_vm12, %v5164_v63, 21  ;;  %v7545_v46 = vld [vmem:[#allocation87_spill] sm:$0xff] }
 0x36a   : > { %v2113_v8 = vcvt.f32.s32 %v2112_v25  ;;  %vm2364_vm8 = vcmp.eq.f32.partialorder %v7545_v46, %v5765_v52  ;;  %v5913_v25 = vsel %vm1857_vm4, %v2085_v50, 2147483647  ;;  %v5916_v46 = vcvt.s32.f32 %v2719_v9 }
 0x36b   : > { %7547 = vst [vmem:[#allocation86_spill] sm:$0xff] %v5913_v25  ;;  %v2365_v37 = vsel %vm2364_vm8, %v2360_v10, inf  ;;  %v2569_v31 = vshra.s32 %v5913_v25, 16  ;;  %v7552_v10 = vld [vmem:[#allocation60_spill] sm:$0xff]  ;;  %v7555_v25 = vld [vmem:[#allocation89_spill] sm:$0xff] }
 0x36c   : > { %v2116_v34 = vadd.s32 %v2115_v57, %v2113_v8  ;;  %7548 = vst [vmem:[#allocation88_spill] sm:$0xff] %v5916_v46  ;;  %v7550_v8 = vld [vmem:[#allocation4_spill] sm:$0xff]  ;;  %vm2048_vm13 = vcmp.eq.f32.partialorder %v7552_v10, %v7551_v40 }
 0x36d   : > { %2426 = vmin.xlane.f32.xlu2 %v2425_v41  ;;  %v3811_v50 = vadd.f32 -1.0, %v7550_v8  ;;  %v5926_v9 = vcvt.s32.f32 %v2569_v31  ;;  %v1811_v8 = vmul.f32 0.1904762, %v3812_v49  ;;  %v7556_v31 = vld [vmem:[#allocation9_spill] sm:$0xff]  ;;  %v7560_v49 = vld [vmem:[#allocation90_spill] sm:$0xff] }
 0x36e   : > { %v2822_v23 = vcvt.s32.f32 %v2116_v34  ;;  %v5935_v52 = vadd.f32 -1.0, %v7556_v31 }
 0x36f   : > { %7554 = vst [vmem:[#allocation85_spill] sm:$0xff] %v5926_v9  ;;  %v5932_v40 = vmul.f32 0.1904762, %v3811_v50  ;;  %v2448_v50 = vand.u32 65535, %v7560_v49 }
 0x370   : > { %v2870_v34 = vmul.f32 2.0, %v2822_v23 }
 0x371   : > { %v2262_v20 = vpop.xlane.xlu1 %2261  ;;  %2366 = vmin.xlane.f32.xlu0 %v2365_v37  ;;  %2782 = vmin.xlane.f32.xlu1 %v5909_v59  ;;  %v2144_v37 = vcvt.f32.s32 %v5607_v30 }
 0x372   : > { %v2263_v41 = vcvt.f32.s32 %v2262_v20  ;;  %v3810_v20 = vadd.f32 -1.0, %v7553_v54  ;;  %v2918_v23 = vadd.f32 1.0, %v2870_v34  ;;  %v7563_v34 = vld [vmem:[#allocation93_spill] sm:$0xff] }
 0x373   : > { %v2145_v30 = vshll.u32 %v2144_v37, 16  ;;  %v2280_v37 = vshll.u32 %v2279_v1, 16  ;;  %vm2047_vm0 = vcmp.eq.f32.partialorder %v7564_v22, %v7563_v34 }
 0x374   : > { %v2266_v57 = vadd.s32 %v2265_v42, %v2263_v41  ;;  %v2208_v42 = vand.u32 65535, %v7555_v25  ;;  %v2098_v41 = vsel %vm2048_vm13, %v5164_v63, 21  ;;  %v1809_v54 = vmul.f32 0.1904762, %v3810_v20  ;;  %v7562_v20 = vld [vmem:[#allocation91_spill] sm:$0xff] }
 0x375   : > { %2722 = vmin.xlane.f32.xlu2 %v5916_v46  ;;  %vm2214_vm15 = vcmp.eq.f32.partialorder %v7562_v20, %v5845_v13  ;;  %v2159_v20 = vcvt.f32.s32 %v5666_v27  ;;  %v2508_v27 = vand.u32 65535, %v5664_v4 }
 0x376   : > { %v2832_v59 = vcvt.s32.f32 %v2266_v57  ;;  %v2210_v0 = vcvt.s32.f32 %v2208_v42 }
 0x378   : > { %v2880_v38 = vmul.f32 2.0, %v2832_v59  ;;  %v7557_v59 = vld [vmem:[#allocation11_spill] sm:$0xff]  ;;  %v2215_v49 = vsel %vm2214_vm15, %v2210_v0, inf }
 0x379   : > { %v2142_v46 = vpop.xlane.xlu1 %2141  ;;  %2572 = vmin.xlane.f32.xlu0 %v5926_v9  ;;  %v3821_v25 = vadd.f32 -1.0, %v7557_v59  ;;  %v5940_v9 = vsel %vm1857_vm4, %v2098_v41, 2147483647 }
 0x37a   : > { %v2928_v57 = vadd.f32 1.0, %v2880_v38  ;;  %v2143_v10 = vcvt.f32.s32 %v2142_v46  ;;  %7559 = vst [vmem:[#allocation87_spill] sm:$0xff] %v5940_v9  ;;  %v7561_v38 = vld [vmem:[#allocation76_spill] sm:$0xff]  ;;  %v2764_v1 = vshra.s32 %v5940_v9, 16 }
 0x37b   : > { %vm2051_vm14 = vcmp.eq.f32.partialorder %v7561_v38, %v5710_v11  ;;  %v1820_v59 = vmul.f32 0.1904762, %v3821_v25  ;;  %v2097_v38 = vsel %vm2047_vm0, %v5164_v63, 21 }
 0x37c   : > { %v2146_v17 = vadd.s32 %v2145_v30, %v2143_v10  ;;  %v2277_v58 = vpop.xlane.xlu0 %2276  ;;  %v2129_v10 = vcvt.f32.s32 %v5625_v18  ;;  %v2976_v42 = vmul.f32 0.0952381, %v2928_v57  ;;  %v2966_v30 = vmul.f32 0.0952381, %v2918_v23 }
 0x37d   : > { %v2278_v46 = vcvt.f32.s32 %v2277_v58  ;;  %2336 = vmin.xlane.f32.xlu2 %v5741_v39  ;;  %v2101_v11 = vsel %vm2051_vm14, %v5164_v63, 21  ;;  %v1819_v39 = vmul.f32 0.1904762, %v3820_v51  ;;  %v2450_v18 = vcvt.s32.f32 %v2448_v50 }
 0x37e   : > { %v2824_v41 = vcvt.s32.f32 %v2146_v17  ;;  %v2130_v57 = vshll.u32 %v2129_v10, 16  ;;  %v5958_v9 = vcvt.s32.f32 %v2764_v1  ;;  %v3062_v0 = vadd.f32 %v2966_v30, %v1809_v54 }
 0x37f   : > { %v2281_v31 = vadd.s32 %v2280_v37, %v2278_v46  ;;  %v3072_v37 = vadd.f32 %v2976_v42, %v1819_v39  ;;  %v5956_v46 = vsel %vm1857_vm4, %v2101_v11, 2147483647  ;;  %v5961_v51 = vsel %vm1857_vm4, %v2097_v38, 2147483647  ;;  %v7565_v42 = vld [vmem:[#allocation92_spill] sm:$0xff] }
 0x380   : > { %v2872_v58 = vmul.f32 2.0, %v2824_v41  ;;  %v2160_v50 = vshll.u32 %v2159_v20, 16  ;;  %vm2454_vm1 = vcmp.eq.f32.partialorder %v7565_v42, %v5813_v33  ;;  %v2809_v54 = vshra.s32 %v5956_v46, 16 }
 0x381   : > { %v2833_v13 = vcvt.s32.f32 %v2281_v31  ;;  %v2127_v34 = vpop.xlane.xlu1 %2126  ;;  %2216 = vmin.xlane.f32.xlu0 %v2215_v49  ;;  %v3120_v30 = vmax.f32 %v3072_v37, 0.0  ;;  %v2234_v38 = vcvt.f32.s32 %v5539_v2  ;;  %v3110_v39 = vmax.f32 %v3062_v0, 0.0  ;;  %v7567_v2 = vld [vmem:[#allocation3_spill] sm:$0xff] }
 0x382   : > { %v2920_v17 = vadd.f32 1.0, %v2872_v58  ;;  %v2128_v23 = vcvt.f32.s32 %v2127_v34 }
 0x383   : > { %v2881_v25 = vmul.f32 2.0, %v2833_v13  ;;  %v3168_v0 = vmin.f32 %v3120_v30, 4.0  ;;  %v2235_v42 = vshll.u32 %v2234_v38, 16  ;;  %v1812_v38 = vmul.f32 0.1904762, %v5935_v52 }
 0x384   : > { %v2968_v41 = vmul.f32 0.0952381, %v2920_v17  ;;  %v2131_v31 = vadd.s32 %v2130_v57, %v2128_v23  ;;  %v2157_v49 = vpop.xlane.xlu0 %2156  ;;  %v2455_v57 = vsel %vm2454_vm1, %v2450_v18, inf  ;;  %v2749_v17 = vshra.s32 %v5961_v51, 16  ;;  %v7566_v23 = vld [vmem:[#allocation69_spill] sm:$0xff] }
 0x385   : > { %v2929_v10 = vadd.f32 1.0, %v2881_v25  ;;  %v2158_v58 = vcvt.f32.s32 %v2157_v49  ;;  %2767 = vmin.xlane.f32.xlu2 %v5958_v9  ;;  %vm2050_vm5 = vcmp.eq.f32.partialorder %v7566_v23, %v5686_v28  ;;  %v5978_v18 = vcvt.s32.f32 %v2809_v54 }
 0x386   : > { %v2823_v13 = vcvt.s32.f32 %v2131_v31  ;;  %v3064_v1 = vadd.f32 %v2968_v41, %v1811_v8  ;;  %v2510_v41 = vcvt.s32.f32 %v2508_v27 }
 0x387   : > { %v2977_v11 = vmul.f32 0.0952381, %v2929_v10  ;;  %v2161_v4 = vadd.s32 %v2160_v50, %v2158_v58  ;;  %v3158_v50 = vmin.f32 %v3110_v39, 4.0 }
 0x388   : > { %v2871_v34 = vmul.f32 2.0, %v2823_v13  ;;  %v3112_v20 = vmax.f32 %v3064_v1, 0.0 }
 0x389   : > { %v2825_v25 = vcvt.s32.f32 %v2161_v4  ;;  %v5972_v49 = vpop.xlane.xlu1 %2512  ;;  %2456 = vmin.xlane.f32.xlu0 %v2455_v57  ;;  %v3073_v8 = vadd.f32 %v2977_v11, %v1820_v59  ;;  %v2643_v59 = vand.u32 65535, %v5681_v44  ;;  %v5988_v4 = vcvt.s32.f32 %v2749_v17 }
 0x38a   : > { %v2919_v37 = vadd.f32 1.0, %v2871_v34  ;;  %vm2514_vm2 = vcmp.eq.f32.partialorder %v5677_v26, %v5972_v49  ;;  %3293 = vrot.lane.b32.xlu1 %v7567_v2, %s4198_s13  ;;  %v3160_v13 = vmin.f32 %v3112_v20, 4.0  ;;  %v2100_v26 = vsel %vm2050_vm5, %v5164_v63, 21 }
 0x38b   : > { %v2873_v31 = vmul.f32 2.0, %v2825_v25  ;;  %v3121_v10 = vmax.f32 %v3073_v8, 0.0  ;;  %v5980_v58 = vsel %vm2514_vm2, %v2510_v41, inf  ;;  %v3333_v44 = vmul.f32 16.0, %v3168_v0  ;;  %v7569_v0 = vld [vmem:[#allocation21_spill] sm:$0xff] }
 0x38c   : > { %v2967_v27 = vmul.f32 0.0952381, %v2919_v37  ;;  %v2232_v1 = vpop.xlane.xlu0 %2231  ;;  %v2523_v34 = vand.u32 65535, %v5690_v7  ;;  %v3215_v25 = vmul.f32 10.0, %v3158_v50  ;;  %v5994_v63 = vsel %vm1857_vm4, %v2100_v26, 2147483647 }
 0x38d   : > { %v2921_v11 = vadd.f32 1.0, %v2873_v31  ;;  %v2233_v54 = vcvt.f32.s32 %v2232_v1  ;;  %2812 = vmin.xlane.f32.xlu2 %v5978_v18  ;;  %v3169_v30 = vmin.f32 %v3121_v10, 4.0  ;;  %v3217_v28 = vmul.f32 10.0, %v3160_v13  ;;  %v7568_v7 = vld [vmem:[#allocation24_spill] sm:$0xff]  ;;  %3868 = vst.msk [vmem:[%s4665_s12 + $0x50] sm:$0xff] %vm3223_vm6, %v3333_v44 }
 0x38e   : > { %v3063_v39 = vadd.f32 %v2967_v27, %v5932_v40  ;;  %v2645_v41 = vcvt.s32.f32 %v2643_v59  ;;  %v3818_v31 = vadd.f32 -1.0, %v7569_v0  ;;  %v2794_v50 = vshra.s32 %v5994_v63, 16  ;;  %3224 = vst.msk [vmem:[%s4665_s12] sm:$0xff] %vm3223_vm6, %v3215_v25  ;;  %v7573_v0 = vld [vmem:[#allocation2_spill] sm:$0xff] }
 0x38f   : > { %v2969_v57 = vmul.f32 0.0952381, %v2921_v11  ;;  %v2236_v20 = vadd.s32 %v2235_v42, %v2233_v54  ;;  %v3334_v40 = vmul.f32 16.0, %v3169_v30  ;;  %v2525_v13 = vcvt.s32.f32 %v2523_v34  ;;  %3226 = vst.msk [vmem:[%s4665_s12 + $0x10] sm:$0xff] %vm3223_vm6, %v3217_v28 }
 0x390   : > { %v3111_v8 = vmax.f32 %v3063_v39, 0.0  ;;  %v6023_v30 = vcvt.s32.f32 %v2794_v50  ;;  %v2658_v44 = vand.u32 65535, %v5707_v12  ;;  %v2174_v12 = vcvt.f32.s32 %v5600_v60  ;;  %v6045_v50 = vpop.xlane.xlu2 %2632  ;;  %v7574_v60 = vld [vmem:[#allocation29_spill] sm:$0xff] }
 0x391   : > { %v2830_v17 = vcvt.s32.f32 %v2236_v20  ;;  %v5996_v37 = vpop.xlane.xlu1 %2647  ;;  %2752 = vmin.xlane.f32.xlu0 %v5988_v4  ;;  %v3065_v52 = vadd.f32 %v2969_v57, %v1812_v38  ;;  %3869 = vst.msk [vmem:[%s4665_s12 + $0x58] sm:$0xff] %vm3223_vm6, %v3334_v40  ;;  %v1817_v38 = vmul.f32 0.1904762, %v3818_v31 }
 0x392   : > { %vm2649_vm3 = vcmp.eq.f32.partialorder %v5696_v6, %v5996_v37  ;;  %3299 = vrot.lane.b32.xlu1 %v7568_v7, %s4198_s13  ;;  %v3159_v2 = vmin.f32 %v3111_v8, 4.0  ;;  %v2660_v25 = vcvt.s32.f32 %v2658_v44  ;;  %v2175_v7 = vshll.u32 %v2174_v12, 16 }
 0x393   : > { %v2878_v10 = vmul.f32 2.0, %v2830_v17  ;;  %v3113_v42 = vmax.f32 %v3065_v52, 0.0  ;;  %v6007_v59 = vsel %vm2649_vm3, %v2645_v41, inf  ;;  %v7572_v17 = vld [vmem:[#allocation22_spill] sm:$0xff] }
 0x394   : > { %v6011_v27 = vpop.xlane.xlu0 %2527  ;;  %v3216_v6 = vmul.f32 10.0, %v3159_v2 }
 0x395   : > { %v2926_v1 = vadd.f32 1.0, %v2878_v10  ;;  %vm2529_vm4 = vcmp.eq.f32.partialorder %v5704_v43, %v6011_v27  ;;  %v3161_v26 = vmin.f32 %v3113_v42, 4.0  ;;  %v7570_v43 = vld [vmem:[#allocation18_spill] sm:$0xff] }
 0x396   : > { %v6019_v11 = vsel %vm2529_vm4, %v2525_v13, inf  ;;  %3225 = vst.msk [vmem:[%s4665_s12 + $0x8] sm:$0xff] %vm3223_vm6, %v3216_v6  ;;  %v3814_v6 = vadd.f32 -1.0, %v7574_v60 }
 0x397   : > { %v2974_v54 = vmul.f32 0.0952381, %v2926_v1  ;;  %v3218_v39 = vmul.f32 10.0, %v3161_v26  ;;  %v2384_v26 = vcvt.f32.s32 %v5755_v47 }
 0x399   : > { %2797 = vmin.xlane.f32.xlu0 %v6023_v30  ;;  %v3070_v34 = vadd.f32 %v2974_v54, %v1817_v38  ;;  %3227 = vst.msk [vmem:[%s4665_s12 + $0x18] sm:$0xff] %vm3223_vm6, %v3218_v39  ;;  %v7576_v39 = vld [vmem:[#allocation28_spill] sm:$0xff]  ;;  %v2385_v47 = vshll.u32 %v2384_v26, 16  ;;  %v7582_v26 = vld [vmem:[#allocation17_spill] sm:$0xff] }
 0x39a   : > { %3405 = vrot.lane.b32.xlu1 %v7570_v43, %s4198_s13  ;;  %v7578_v43 = vld [vmem:[#allocation102_spill] sm:$0xff] }
 0x39b   : > { %v3118_v57 = vmax.f32 %v3070_v34, 0.0  ;;  %v1813_v34 = vmul.f32 0.1904762, %v3814_v6 }
 0x39c   : > { %v6031_v20 = vpop.xlane.xlu0 %2662 }
 0x39d   : > { %7571 = vst [vmem:[#allocation6_spill] sm:$0xff] %v6031_v20  ;;  %vm2664_vm7 = vcmp.eq.f32.partialorder %v5715_v62, %v6031_v20  ;;  %v3166_v28 = vmin.f32 %v3118_v57, 4.0  ;;  %v2598_v62 = vand.u32 65535, %v5734_v15  ;;  %v7577_v15 = vld [vmem:[#allocation5_spill] sm:$0xff]  ;;  %v2399_v57 = vcvt.f32.s32 %v7578_v43 }
 0x39e   : > { %v6035_v8 = vsel %vm2664_vm7, %v2660_v25, inf }
 0x39f   : > { %v3331_v41 = vmul.f32 16.0, %v3166_v28  ;;  %v2600_v1 = vcvt.s32.f32 %v2598_v62  ;;  %v2309_v28 = vcvt.f32.s32 %v5668_v16  ;;  %v7581_v16 = vld [vmem:[#allocation8_spill] sm:$0xff] }
 0x3a1   : > { %3866 = vst.msk [vmem:[%s4665_s12 + $0x40] sm:$0xff] %vm3223_vm6, %v3331_v41 }
 0x3a2   : > { %3411 = vrot.lane.b32.xlu1 %v7572_v17, %s4198_s13 }
 0x3a4   : > { %v2397_v52 = vpop.xlane.xlu1 %2396  ;;  %v2172_v40 = vpop.xlane.xlu0 %2171 }
 0x3a5   : > { %v2173_v2 = vcvt.f32.s32 %v2172_v40  ;;  %3291 = vrot.lane.b32.xlu2 %v7573_v0, %s4198_s13  ;;  %v2398_v17 = vcvt.f32.s32 %v2397_v52 }
 0x3a7   : > { %v2176_v31 = vadd.s32 %v2175_v7, %v2173_v2  ;;  %v2400_v7 = vshll.u32 %v2399_v57, 16  ;;  %v2583_v2 = vand.u32 65535, %v5761_v56 }
 0x3a9   : > { %v2826_v10 = vcvt.s32.f32 %v2176_v31  ;;  %v7579_v31 = vld [vmem:[#allocation15_spill] sm:$0xff]  ;;  %v2401_v52 = vadd.s32 %v2400_v7, %v2398_v17  ;;  %v2585_v57 = vcvt.s32.f32 %v2583_v2 }
 0x3aa   : > { %v3828_v62 = vadd.f32 -1.0, %v7579_v31 }
 0x3ab   : > { %v2874_v42 = vmul.f32 2.0, %v2826_v10  ;;  %v2310_v10 = vshll.u32 %v2309_v28, 16 }
 0x3ac   : > { %v6048_v13 = vpop.xlane.xlu1 %2602 }
 0x3ad   : > { %7575 = vst [vmem:[#allocation4_spill] sm:$0xff] %v6048_v13  ;;  %v2922_v54 = vadd.f32 1.0, %v2874_v42  ;;  %vm2604_vm9 = vcmp.eq.f32.partialorder %v5750_v55, %v6048_v13  ;;  %3297 = vrot.lane.b32.xlu2 %v7576_v39, %s4198_s13  ;;  %3289 = vrot.lane.b32.xlu0 %v7577_v15, %s4198_s13 }
 0x3ae   : > { %v6057_v38 = vsel %vm2604_vm9, %v2600_v1, inf  ;;  %v7580_v1 = vld [vmem:[#allocation42_spill] sm:$0xff] }
 0x3af   : > { %v2970_v44 = vmul.f32 0.0952381, %v2922_v54  ;;  %v3829_v54 = vadd.f32 -1.0, %v7582_v26  ;;  %v7588_v26 = vld [vmem:[#allocation44_spill] sm:$0xff] }
 0x3b0   : > { %v2382_v25 = vpop.xlane.xlu2 %2381 }
 0x3b1   : > { %v3066_v41 = vadd.f32 %v2970_v44, %v1813_v34  ;;  %v2383_v12 = vcvt.f32.s32 %v2382_v25  ;;  %v2354_v44 = vcvt.f32.s32 %v5702_v35  ;;  %v2414_v34 = vcvt.f32.s32 %v5787_v21  ;;  %v7585_v35 = vld [vmem:[#allocation46_spill] sm:$0xff] }
 0x3b2   : > { %v6082_v21 = vmul.f32 -1.442695, %v7585_v35 }
 0x3b3   : > { %v3114_v55 = vmax.f32 %v3066_v41, 0.0  ;;  %v2386_v40 = vadd.s32 %v2385_v47, %v2383_v12  ;;  %v1827_v47 = vmul.f32 0.1904762, %v3828_v62  ;;  %v2841_v41 = vcvt.s32.f32 %v2401_v52  ;;  %v7584_v12 = vld [vmem:[#allocation27_spill] sm:$0xff]  ;;  %v7587_v52 = vld [vmem:[#allocation20_spill] sm:$0xff] }
 0x3b4   : > { %v2307_v0 = vpop.xlane.xlu1 %2306  ;;  %v3823_v17 = vadd.f32 -1.0, %v7584_v12  ;;  %v2355_v62 = vshll.u32 %v2354_v44, 16  ;;  %4075 = vpow2.f32 %v6082_v21 }
 0x3b5   : > { %v3162_v42 = vmin.f32 %v3114_v55, 4.0  ;;  %v2840_v60 = vcvt.s32.f32 %v2386_v40  ;;  %v2308_v6 = vcvt.f32.s32 %v2307_v0  ;;  %3303 = vrot.lane.b32.xlu2 %v7580_v1, %s4198_s13  ;;  %3295 = vrot.lane.b32.xlu0 %v7581_v16, %s4198_s13  ;;  %v6079_v40 = vmul.f32 0.1904762, %v3829_v54  ;;  %v7586_v0 = vld [vmem:[#allocation49_spill] sm:$0xff] }
 0x3b6   : > { %v6085_v31 = vmul.f32 -1.442695, %v7586_v0 }
 0x3b7   : > { %v3219_v39 = vmul.f32 10.0, %v3162_v42  ;;  %v2888_v15 = vmul.f32 2.0, %v2840_v60  ;;  %v2311_v56 = vadd.s32 %v2310_v10, %v2308_v6  ;;  %v2415_v10 = vshll.u32 %v2414_v34, 16 }
 0x3b8   : > { %v6070_v43 = vpop.xlane.xlu2 %2587  ;;  %4077 = vpow2.f32 %v6085_v31 }
 0x3b9   : > { %7583 = vst [vmem:[#allocation84_spill] sm:$0xff] %v6070_v43  ;;  %v2936_v25 = vadd.f32 1.0, %v2888_v15  ;;  %v2835_v28 = vcvt.s32.f32 %v2311_v56  ;;  %vm2589_vm10 = vcmp.eq.f32.partialorder %v5780_v36, %v6070_v43  ;;  %v2294_v36 = vcvt.f32.s32 %v5568_v5 }
 0x3ba   : > { %3228 = vst.msk [vmem:[%s4665_s12 + $0x20] sm:$0xff] %vm3223_vm6, %v3219_v39  ;;  %v6077_v55 = vsel %vm2589_vm10, %v2585_v57, inf  ;;  %v7589_v39 = vld [vmem:[#allocation23_spill] sm:$0xff]  ;;  %v2889_v56 = vmul.f32 2.0, %v2841_v41  ;;  %v1822_v57 = vmul.f32 0.1904762, %v3823_v17 }
 0x3bb   : > { %v2984_v7 = vmul.f32 0.0952381, %v2936_v25  ;;  %v2883_v2 = vmul.f32 2.0, %v2835_v28  ;;  %v3822_v15 = vadd.f32 -1.0, %v7589_v39  ;;  %v7590_v25 = vld [vmem:[#allocation31_spill] sm:$0xff]  ;;  %v2295_v35 = vshll.u32 %v2294_v36, 16 }
 0x3bc   : > { %v2352_v42 = vpop.xlane.xlu1 %2351  ;;  %v2412_v60 = vpop.xlane.xlu0 %2411  ;;  %v3830_v5 = vadd.f32 -1.0, %v7590_v25  ;;  %v2703_v41 = vand.u32 65535, %v5797_v45  ;;  %v2937_v17 = vadd.f32 1.0, %v2889_v56  ;;  %v7595_v45 = vld [vmem:[#allocation10_spill] sm:$0xff]  ;;  %v7596_v56 = vld [vmem:[#allocation12_spill] sm:$0xff] }
 0x3bd   : > { %v2931_v6 = vadd.f32 1.0, %v2883_v2  ;;  %v2353_v1 = vcvt.f32.s32 %v2352_v42  ;;  %v2413_v16 = vcvt.f32.s32 %v2412_v60  ;;  %3403 = vrot.lane.b32.xlu2 %v7587_v52, %s4198_s13  ;;  %3301 = vrot.lane.b32.xlu0 %v7588_v26, %s4198_s13  ;;  %v3080_v54 = vadd.f32 %v2984_v7, %v1827_v47  ;;  %v7591_v2 = vld [vmem:[#allocation99_spill] sm:$0xff]  ;;  %v7592_v52 = vld [vmem:[#allocation41_spill] sm:$0xff] }
 0x3be   : > { %v2249_v0 = vcvt.f32.s32 %v7591_v2  ;;  %v2553_v42 = vand.u32 65535, %v5800_v24  ;;  %v3826_v43 = vadd.f32 -1.0, %v7592_v52 }
 0x3bf   : > { %v2979_v44 = vmul.f32 0.0952381, %v2931_v6  ;;  %v2356_v34 = vadd.s32 %v2355_v62, %v2353_v1  ;;  %v2416_v28 = vadd.s32 %v2415_v10, %v2413_v16  ;;  %v3128_v12 = vmax.f32 %v3080_v54, 0.0 }
 0x3c0   : > { %v2292_v60 = vpop.xlane.xlu2 %2291  ;;  %v1829_v6 = vmul.f32 0.1904762, %v3830_v5  ;;  %v2250_v16 = vshll.u32 %v2249_v0, 16  ;;  %v2555_v2 = vcvt.s32.f32 %v2553_v42  ;;  %v2985_v5 = vmul.f32 0.0952381, %v2937_v17 }
 0x3c1   : > { %v2838_v26 = vcvt.s32.f32 %v2356_v34  ;;  %v2842_v47 = vcvt.s32.f32 %v2416_v28  ;;  %v2293_v7 = vcvt.f32.s32 %v2292_v60  ;;  %v3075_v39 = vadd.f32 %v2979_v44, %v1822_v57 }
 0x3c2   : > { %v3176_v25 = vmin.f32 %v3128_v12, 4.0  ;;  %v1825_v28 = vmul.f32 0.1904762, %v3826_v43 }
 0x3c3   : > { %v2886_v62 = vmul.f32 2.0, %v2838_v26  ;;  %v2890_v10 = vmul.f32 2.0, %v2842_v47  ;;  %v2296_v1 = vadd.s32 %v2295_v35, %v2293_v7  ;;  %v3123_v36 = vmax.f32 %v3075_v39, 0.0 }
 0x3c4   : > { %v6098_v54 = vpop.xlane.xlu1 %2557  ;;  %v6100_v24 = vpop.xlane.xlu0 %2707  ;;  %v3446_v34 = vmul.f32 33.0, %v3176_v25  ;;  %v2705_v35 = vcvt.s32.f32 %v2703_v41  ;;  %v2688_v47 = vand.u32 65535, %v5822_v29 }
 0x3c5   : > { %7593 = vst [vmem:[#allocation7_spill] sm:$0xff] %v6098_v54  ;;  %v2934_v60 = vadd.f32 1.0, %v2886_v62  ;;  %v2938_v57 = vadd.f32 1.0, %v2890_v10  ;;  %v2834_v44 = vcvt.s32.f32 %v2296_v1  ;;  %vm2559_vm11 = vcmp.eq.f32.partialorder %v5819_v32, %v6098_v54  ;;  %3409 = vrot.lane.b32.xlu2 %v7595_v45, %s4198_s13  ;;  %3407 = vrot.lane.b32.xlu0 %v7596_v56, %s4198_s13  ;;  %v7597_v32 = vld [vmem:[#allocation100_spill] sm:$0xff]  ;;  %v7598_v10 = vld [vmem:[#allocation19_spill] sm:$0xff] }
 0x3c6   : > { %7594 = vst [vmem:[#allocation89_spill] sm:$0xff] %v6100_v24  ;;  %vm2709_vm12 = vcmp.eq.f32.partialorder %v5817_v48, %v6100_v24  ;;  %v3171_v12 = vmin.f32 %v3123_v36, 4.0  ;;  %v6112_v52 = vsel %vm2559_vm11, %v2555_v2, inf  ;;  %v2189_v26 = vcvt.f32.s32 %v7597_v32  ;;  %v4076_v32 = vpop.eup %4075  ;;  %v7624_v24 = vld [vmem:[#allocation108_spill] sm:$0xff] }
 0x3c7   : > { %3900 = vst.msk [vmem:[%s4665_s12 + $0x90] sm:$0xff] %vm3223_vm6, %v3446_v34  ;;  %v2982_v43 = vmul.f32 0.0952381, %v2934_v60  ;;  %v2986_v0 = vmul.f32 0.0952381, %v2938_v57  ;;  %v2882_v42 = vmul.f32 2.0, %v2834_v44  ;;  %v3081_v2 = vadd.f32 %v2985_v5, %v6079_v40 }
 0x3c8   : > { %v2247_v7 = vpop.xlane.xlu2 %2246  ;;  %v3336_v39 = vmul.f32 16.0, %v3171_v12  ;;  %v6116_v17 = vsel %vm2709_vm12, %v2705_v35, inf  ;;  %v3819_v1 = vadd.f32 -1.0, %v7598_v10  ;;  %v1821_v36 = vmul.f32 0.1904762, %v3822_v15  ;;  %v7601_v35 = vld [vmem:[#allocation47_spill] sm:$0xff] }
 0x3c9   : > { %v2930_v25 = vadd.f32 1.0, %v2882_v42  ;;  %v2248_v48 = vcvt.f32.s32 %v2247_v7  ;;  %v3078_v62 = vadd.f32 %v2982_v43, %v1825_v28  ;;  %v3082_v41 = vadd.f32 %v2986_v0, %v1829_v6 }
 0x3ca   : > { %3871 = vst.msk [vmem:[%s4665_s12 + $0x68] sm:$0xff] %vm3223_vm6, %v3336_v39  ;;  %v2538_v44 = vand.u32 65535, %v5830_v61  ;;  %v2690_v6 = vcvt.s32.f32 %v2688_v47  ;;  %v3129_v28 = vmax.f32 %v3081_v2, 0.0  ;;  %v2190_v15 = vshll.u32 %v2189_v26, 16 }
 0x3cb   : > { %v2978_v34 = vmul.f32 0.0952381, %v2930_v25  ;;  %v2251_v60 = vadd.s32 %v2250_v16, %v2248_v48  ;;  %v3126_v29 = vmax.f32 %v3078_v62, 0.0  ;;  %v3130_v57 = vmax.f32 %v3082_v41, 0.0  ;;  %v7600_v16 = vld [vmem:[#allocation25_spill] sm:$0xff]  ;;  %v4078_v41 = vpop.eup %4077 }
 0x3cc   : > { %v6125_v45 = vpop.xlane.xlu1 %2692  ;;  %2621 = vmin.xlane.f32.xlu1 %v5772_v3  ;;  %v2187_v21 = vpop.xlane.xlu0 %2186  ;;  %v3764_v43 = vmul.f32 -1.442695, %v7601_v35  ;;  %v3177_v42 = vmin.f32 %v3129_v28, 4.0  ;;  %v2540_v7 = vcvt.s32.f32 %v2538_v44  ;;  %v2324_v25 = vcvt.f32.s32 %v5745_v14  ;;  %v7603_v14 = vld [vmem:[#allocation98_spill] sm:$0xff] }
 0x3cd   : > { %7599 = vst [vmem:[#allocation9_spill] sm:$0xff] %v6125_v45  ;;  %v3074_v56 = vadd.f32 %v2978_v34, %v1821_v36  ;;  %v2831_v40 = vcvt.s32.f32 %v2251_v60  ;;  %vm2694_vm8 = vcmp.eq.f32.partialorder %v5839_v53, %v6125_v45  ;;  %3413 = vrot.lane.b32.xlu0 %v7600_v16, %s4198_s13  ;;  %v2188_v5 = vcvt.f32.s32 %v2187_v21  ;;  %v7604_v44 = vld [vmem:[#allocation26_spill] sm:$0xff] }
 0x3ce   : > { %v6132_v31 = vsel %vm2694_vm8, %v2690_v6, inf  ;;  %v3174_v61 = vmin.f32 %v3126_v29, 4.0  ;;  %v3178_v12 = vmin.f32 %v3130_v57, 4.0  ;;  %v3447_v2 = vmul.f32 33.0, %v3177_v42  ;;  %v7605_v6 = vld [vmem:[#allocation62_spill] sm:$0xff] }
 0x3cf   : > { %v3122_v3 = vmax.f32 %v3074_v56, 0.0  ;;  %v2879_v0 = vmul.f32 2.0, %v2831_v40  ;;  %v2191_v26 = vadd.s32 %v2190_v15, %v2188_v5  ;;  %4079 = vpow2.f32 %v3764_v43 }
 0x3d0   : > { %v6135_v47 = vpop.xlane.xlu2 %2542  ;;  %v3444_v53 = vmul.f32 33.0, %v3174_v61  ;;  %v3448_v39 = vmul.f32 33.0, %v3178_v12  ;;  %v1818_v34 = vmul.f32 0.1904762, %v3819_v1  ;;  %v2673_v57 = vand.u32 65535, %v7603_v14  ;;  %3901 = vst.msk [vmem:[%s4665_s12 + $0x98] sm:$0xff] %vm3223_vm6, %v3447_v2 }
 0x3d1   : > { %7602 = vst [vmem:[#allocation11_spill] sm:$0xff] %v6135_v47  ;;  %v3170_v48 = vmin.f32 %v3122_v3, 4.0  ;;  %v2927_v62 = vadd.f32 1.0, %v2879_v0  ;;  %vm2544_vm13 = vcmp.eq.f32.partialorder %v5853_v19, %v6135_v47  ;;  %v2827_v10 = vcvt.s32.f32 %v2191_v26 }
 0x3d2   : > { %v6140_v36 = vsel %vm2544_vm13, %v2540_v7, inf  ;;  %3898 = vst.msk [vmem:[%s4665_s12 + $0x80] sm:$0xff] %vm3223_vm6, %v3444_v53  ;;  %v3815_v21 = vadd.f32 -1.0, %v7604_v44  ;;  %v2325_v15 = vshll.u32 %v2324_v25, 16  ;;  %v6153_v1 = vadd.f32 1.0, %v4076_v32  ;;  %v7607_v53 = vld [vmem:[#allocation96_spill] sm:$0xff] }
 0x3d3   : > { %v3335_v60 = vmul.f32 16.0, %v3170_v48  ;;  %v2975_v29 = vmul.f32 0.0952381, %v2927_v62  ;;  %3902 = vst.msk [vmem:[%s4665_s12 + $0xa0] sm:$0xff] %vm3223_vm6, %v3448_v39  ;;  %v2875_v19 = vmul.f32 2.0, %v2827_v10  ;;  %v2675_v3 = vcvt.s32.f32 %v2673_v57  ;;  %v7608_v32 = vld [vmem:[#allocation101_spill] sm:$0xff] }
 0x3d4   : > { %2486 = vmin.xlane.f32.xlu1 %v7605_v6  ;;  %v2322_v28 = vpop.xlane.xlu0 %2321  ;;  %v1814_v12 = vmul.f32 0.1904762, %v3815_v21  ;;  %v6157_v42 = vadd.f32 1.0, %v4078_v41  ;;  %4081 = vrcp.f32 %v6153_v1  ;;  %v2204_v39 = vcvt.f32.s32 %v7608_v32  ;;  %v2442_v48 = vpop.xlane.xlu1 %2441  ;;  %v7609_v10 = vld [vmem:[#allocation104_spill] sm:$0xff]  ;;  %v7610_v41 = vld [vmem:[#allocation35_spill] sm:$0xff] }
 0x3d5   : > { %v3071_v56 = vadd.f32 %v2975_v29, %v1818_v34  ;;  %v2323_v40 = vcvt.f32.s32 %v2322_v28  ;;  %3870 = vst.msk [vmem:[%s4665_s12 + $0x60] sm:$0xff] %vm3223_vm6, %v3335_v60  ;;  %v2923_v16 = vadd.f32 1.0, %v2875_v19  ;;  %v4080_v0 = vpop.eup %4079  ;;  %v2444_v2 = vcvt.f32.s32 %v7609_v10 }
 0x3d6   : > { %v3824_v29 = vadd.f32 -1.0, %v7610_v41  ;;  %v6167_v14 = vadd.f32 1.0, %v4080_v0  ;;  %v2443_v21 = vcvt.f32.s32 %v2442_v48  ;;  %4083 = vrcp.f32 %v6157_v42 }
 0x3d7   : > { %v3119_v5 = vmax.f32 %v3071_v56, 0.0  ;;  %v2326_v61 = vadd.s32 %v2325_v15, %v2323_v40  ;;  %v2971_v35 = vmul.f32 0.0952381, %v2923_v16  ;;  %v2205_v6 = vshll.u32 %v2204_v39, 16 }
 0x3d8   : > { %v6155_v43 = vpop.xlane.xlu2 %2677  ;;  %v2445_v56 = vshll.u32 %v2444_v2, 16  ;;  %v1823_v16 = vmul.f32 0.1904762, %v3824_v29  ;;  %4085 = vrcp.f32 %v6167_v14  ;;  %v7613_v2 = vld [vmem:[#allocation45_spill] sm:$0xff]  ;;  %vm1427_vm15 = vweird.f32 %v6153_v1 }
 0x3d9   : > { %7606 = vst [vmem:[#allocation13_spill] sm:$0xff] %v6155_v43  ;;  %v3167_v26 = vmin.f32 %v3119_v5, 4.0  ;;  %v2836_v7 = vcvt.s32.f32 %v2326_v61  ;;  %vm2679_vm14 = vcmp.eq.f32.partialorder %v7607_v53, %v6155_v43  ;;  %v3067_v25 = vadd.f32 %v2971_v35, %v1814_v12  ;;  %v7611_v61 = vld [vmem:[#allocation48_spill] sm:$0xff] }
 0x3da   : > { %v6163_v62 = vsel %vm2679_vm14, %v2675_v3, inf  ;;  %v6172_v5 = vpop.eup %4081  ;;  %v3773_v12 = vmul.f32 -1.442695, %v7611_v61  ;;  %v2446_v53 = vadd.s32 %v2445_v56, %v2443_v21  ;;  %v2219_v54 = vcvt.f32.s32 %v7624_v24 }
 0x3db   : > { %v3332_v34 = vmul.f32 16.0, %v3167_v26  ;;  %v2884_v60 = vmul.f32 2.0, %v2836_v7  ;;  %v3115_v57 = vmax.f32 %v3067_v25, 0.0  ;;  %v7612_v26 = vld [vmem:[#allocation72_spill] sm:$0xff]  ;;  %v1423_v25 = vmul.f32 %v6172_v5, %v6153_v1 }
 0x3dc   : > { %v2202_v44 = vpop.xlane.xlu0 %2201  ;;  %v2369_v7 = vcvt.f32.s32 %v7612_v26  ;;  %v6181_v10 = vpop.eup %4083  ;;  %4087 = vpow2.f32 %v3773_v12  ;;  %vm1428_vm0 = vweird.f32 %v6172_v5  ;;  %vm1277_vm9 = vweird.f32 %v6157_v42 }
 0x3dd   : > { %v2932_v19 = vadd.f32 1.0, %v2884_v60  ;;  %3867 = vst.msk [vmem:[%s4665_s12 + $0x48] sm:$0xff] %vm3223_vm6, %v3332_v34  ;;  %v3163_v28 = vmin.f32 %v3115_v57, 4.0  ;;  %v2203_v15 = vcvt.f32.s32 %v2202_v44  ;;  %v3816_v34 = vadd.f32 -1.0, %v7613_v2  ;;  %v6213_v47 = vpop.xlane.xlu1 %2737  ;;  %vm6232_vm2 = vmor %vm1427_vm15, %vm1428_vm0 }
 0x3de   : > { %v2370_v29 = vshll.u32 %v2369_v7, 16  ;;  %v2844_v57 = vcvt.s32.f32 %v2446_v53  ;;  %v1424_v56 = vsub.f32 1.0, %v1423_v25  ;;  %vm1278_vm10 = vweird.f32 %v6181_v10 }
 0x3df   : > { %v2980_v40 = vmul.f32 0.0952381, %v2932_v19  ;;  %v3220_v35 = vmul.f32 10.0, %v3163_v28  ;;  %v2206_v3 = vadd.s32 %v2205_v6, %v2203_v15  ;;  %v6184_v19 = vpop.eup %4085  ;;  %v6188_v28 = vmul.f32 %v6181_v10, %v6157_v42  ;;  %vm6318_vm12 = vmor %vm1277_vm9, %vm1278_vm10 }
 0x3e0   : > { %v2427_v0 = vpop.xlane.xlu2 %2426  ;;  %v1815_v61 = vmul.f32 0.1904762, %v3816_v34  ;;  %v6195_v26 = vmul.f32 %v6184_v19, %v6167_v14  ;;  %v2892_v7 = vmul.f32 2.0, %v2844_v57  ;;  %v7617_v57 = vld [vmem:[#allocation86_spill] sm:$0xff]  ;;  %vm1308_vm7 = vweird.f32 %v6184_v19 }
 0x3e1   : > { %v3076_v32 = vadd.f32 %v2980_v40, %v1823_v16  ;;  %v2828_v39 = vcvt.s32.f32 %v2206_v3  ;;  %3229 = vst.msk [vmem:[%s4665_s12 + $0x28] sm:$0xff] %vm3223_vm6, %v3220_v35  ;;  %v7614_v40 = vld [vmem:[#allocation63_spill] sm:$0xff]  ;;  %v2428_v25 = vcvt.f32.s32 %v2427_v0  ;;  %vm1307_vm8 = vweird.f32 %v6167_v14 }
 0x3e2   : > { %v2429_v16 = vcvt.f32.s32 %v7614_v40  ;;  %vm6330_vm13 = vmor %vm1307_vm8, %vm1308_vm7 }
 0x3e3   : > { %v3124_v48 = vmax.f32 %v3076_v32, 0.0  ;;  %v2876_v60 = vmul.f32 2.0, %v2828_v39  ;;  %v4088_v32 = vpop.eup %4087  ;;  %v7615_v39 = vld [vmem:[#allocation56_spill] sm:$0xff] }
 0x3e4   : > { %v2367_v41 = vpop.xlane.xlu0 %2366  ;;  %v2430_v40 = vshll.u32 %v2429_v16, 16  ;;  %v6209_v0 = vadd.f32 1.0, %v4088_v32  ;;  %v7622_v16 = vld [vmem:[#allocation85_spill] sm:$0xff] }
 0x3e5   : > { %v2368_v44 = vcvt.f32.s32 %v2367_v41  ;;  %v2924_v21 = vadd.f32 1.0, %v2876_v60  ;;  %v3172_v6 = vmin.f32 %v3124_v48, 4.0  ;;  %v3780_v48 = vmul.f32 -1.442695, %v7615_v39 }
 0x3e6   : > { %v1425_v60 = vmul.f32 %v6172_v5, %v1424_v56  ;;  %v1431_v41 = vand.u32 2147483647, %v6153_v1  ;;  %v7620_v56 = vld [vmem:[#allocation81_spill] sm:$0xff]  ;;  %v2431_v45 = vadd.s32 %v2430_v40, %v2428_v25 }
 0x3e7   : > { %v2371_v15 = vadd.s32 %v2370_v29, %v2368_v44  ;;  %v2972_v12 = vmul.f32 0.0952381, %v2924_v21  ;;  %v3337_v3 = vmul.f32 16.0, %v3172_v6  ;;  %v7616_v29 = vld [vmem:[#allocation39_spill] sm:$0xff]  ;;  %v2568_v21 = vand.u32 65535, %v7617_v57 }
 0x3e8   : > { %v6191_v35 = vpop.xlane.xlu2 %2722  ;;  %v3827_v44 = vadd.f32 -1.0, %v7616_v29  ;;  %v7618_v6 = vld [vmem:[#allocation103_spill] sm:$0xff]  ;;  %4089 = vpow2.f32 %v3780_v48  ;;  %vm6247_vm3 = vcmp.eq.f32.partialorder %v1431_v41, 8.507059e+37 }
 0x3e9   : > { %v2839_v53 = vcvt.s32.f32 %v2371_v15  ;;  %v3068_v2 = vadd.f32 %v2972_v12, %v1815_v61  ;;  %3872 = vst.msk [vmem:[%s4665_s12 + $0x70] sm:$0xff] %vm3223_vm6, %v3337_v3  ;;  %v2339_v15 = vcvt.f32.s32 %v7618_v6  ;;  %v2940_v61 = vadd.f32 1.0, %v2892_v7  ;;  %v7621_v57 = vld [vmem:[#allocation83_spill] sm:$0xff] }
 0x3ea   : > { %v1433_v3 = vand.u32 2147483648, %v6153_v1  ;;  %v1826_v32 = vmul.f32 0.1904762, %v3827_v44  ;;  %4091 = vrcp.f32 %v6209_v0  ;;  %v1274_v44 = vsub.f32 1.0, %v6188_v28  ;;  %v7634_v41 = vld [vmem:[#allocation95_spill] sm:$0xff] }
 0x3eb   : > { %v2887_v34 = vmul.f32 2.0, %v2839_v53  ;;  %v3116_v43 = vmax.f32 %v3068_v2, 0.0  ;;  %v2733_v53 = vand.u32 65535, %v7620_v56  ;;  %v7623_v2 = vld [vmem:[#allocation55_spill] sm:$0xff]  ;;  %v2570_v56 = vcvt.s32.f32 %v2568_v21 }
 0x3ec   : > { %v6207_v39 = vpop.xlane.xlu0 %2572  ;;  %v3832_v7 = vadd.f32 -1.0, %v7623_v2  ;;  %v2988_v20 = vmul.f32 0.0952381, %v2940_v61  ;;  %v2220_v61 = vshll.u32 %v2219_v54, 16  ;;  %vm2634_vm4 = vcmp.eq.f32.partialorder %v7634_v41, %v6045_v50  ;;  %v7638_v41 = vld [vmem:[#allocation50_spill] sm:$0xff] }
 0x3ed   : > { %7619 = vst [vmem:[#allocation90_spill] sm:$0xff] %v6207_v39  ;;  %v2935_v12 = vadd.f32 1.0, %v2887_v34  ;;  %v3164_v29 = vmin.f32 %v3116_v43, 4.0  ;;  %vm2574_vm1 = vcmp.eq.f32.partialorder %v7622_v16, %v6207_v39  ;;  %v2340_v34 = vshll.u32 %v2339_v15, 16  ;;  %v7625_v43 = vld [vmem:[#allocation82_spill] sm:$0xff]  ;;  %v7628_v15 = vld [vmem:[#allocation59_spill] sm:$0xff] }
 0x3ee   : > { %2471 = vmin.xlane.f32.xlu2 %v7621_v57  ;;  %vm2739_vm5 = vcmp.eq.f32.partialorder %v7625_v43, %v6213_v47  ;;  %v2735_v57 = vcvt.s32.f32 %v2733_v53  ;;  %v1426_v16 = vadd.f32 %v6172_v5, %v1425_v60  ;;  %v6223_v39 = vsel %vm2574_vm1, %v2570_v56, inf  ;;  %v4090_v21 = vpop.eup %4089  ;;  %v7629_v56 = vld [vmem:[#allocation37_spill] sm:$0xff] }
 0x3ef   : > { %v2983_v6 = vmul.f32 0.0952381, %v2935_v12  ;;  %v3221_v48 = vmul.f32 10.0, %v3164_v29  ;;  %v2843_v12 = vcvt.s32.f32 %v2431_v45  ;;  %v1831_v45 = vmul.f32 0.1904762, %v3832_v7 }
 0x3f0   : > { %v2337_v13 = vpop.xlane.xlu2 %2336  ;;  %v3763_v60 = vmul.f32 -1.442695, %v7628_v15  ;;  %v2740_v29 = vsel %vm2739_vm5, %v2735_v57, inf  ;;  %v1430_v7 = vsel %vm6232_vm2, %v6172_v5, %v1426_v16  ;;  %v3825_v54 = vadd.f32 -1.0, %v7629_v56  ;;  %v7630_v15 = vld [vmem:[#allocation107_spill] sm:$0xff] }
 0x3f1   : > { %v2338_v25 = vcvt.f32.s32 %v2337_v13  ;;  %v3079_v40 = vadd.f32 %v2983_v6, %v1826_v32  ;;  %3230 = vst.msk [vmem:[%s4665_s12 + $0x30] sm:$0xff] %vm3223_vm6, %v3221_v48  ;;  %v1304_v6 = vsub.f32 1.0, %v6195_v26  ;;  %v2891_v48 = vmul.f32 2.0, %v2843_v12  ;;  %v7631_v26 = vld [vmem:[#allocation94_spill] sm:$0xff] }
 0x3f2   : > { %4093 = vpow2.f32 %v3763_v60  ;;  %v1434_v12 = vor.u32 1.1754944e-38, %v1433_v3  ;;  %vm1442_vm1 = vweird.f32 %v6209_v0 }
 0x3f3   : > { %v2341_v24 = vadd.s32 %v2340_v34, %v2338_v25  ;;  %v3127_v13 = vmax.f32 %v3079_v40, 0.0  ;;  %v3084_v34 = vadd.f32 %v2988_v20, %v1831_v45  ;;  %v1305_v45 = vmul.f32 %v6184_v19, %v1304_v6 }
 0x3f4   : > { %v2217_v53 = vpop.xlane.xlu0 %2216  ;;  %v2939_v60 = vadd.f32 1.0, %v2891_v48 }
 0x3f5   : > { %v2837_v32 = vcvt.s32.f32 %v2341_v24  ;;  %v2218_v2 = vcvt.f32.s32 %v2217_v53  ;;  %v3175_v1 = vmin.f32 %v3127_v13, 4.0  ;;  %v3132_v57 = vmax.f32 %v3084_v34, 0.0  ;;  %v6251_v13 = vpop.eup %4091  ;;  %v7636_v34 = vld [vmem:[#allocation53_spill] sm:$0xff] }
 0x3f6   : > { %2741 = vmin.xlane.f32.xlu2 %v2740_v29  ;;  %v2628_v24 = vand.u32 65535, %v7631_v26  ;;  %v1824_v53 = vmul.f32 0.1904762, %v3825_v54  ;;  %v3765_v56 = vmul.f32 -1.442695, %v7636_v34  ;;  %v1438_v48 = vmul.f32 %v6251_v13, %v6209_v0 }
 0x3f7   : > { %v2885_v25 = vmul.f32 2.0, %v2837_v32  ;;  %v2221_v40 = vadd.s32 %v2220_v61, %v2218_v2  ;;  %2501 = vmin.xlane.f32.xlu0 %v7630_v15  ;;  %v3445_v43 = vmul.f32 33.0, %v3175_v1  ;;  %v6257_v61 = vadd.f32 1.0, %v4090_v21  ;;  %v7635_v32 = vld [vmem:[#allocation43_spill] sm:$0xff] }
 0x3f8   : > { %v3180_v29 = vmin.f32 %v3132_v57, 4.0  ;;  %v3817_v3 = vadd.f32 -1.0, %v7635_v32  ;;  %v2630_v6 = vcvt.s32.f32 %v2628_v24  ;;  %v4094_v57 = vpop.eup %4093  ;;  %v2987_v26 = vmul.f32 0.0952381, %v2939_v60 }
 0x3f9   : > { %v2933_v5 = vadd.f32 1.0, %v2885_v25  ;;  %v2829_v16 = vcvt.s32.f32 %v2221_v40  ;;  %3899 = vst.msk [vmem:[%s4665_s12 + $0x88] sm:$0xff] %vm3223_vm6, %v3445_v43  ;;  %v7637_v25 = vld [vmem:[#allocation33_spill] sm:$0xff]  ;;  %v1275_v43 = vmul.f32 %v6181_v10, %v1274_v44  ;;  %v1435_v24 = vsel %vm6247_vm3, %v1434_v12, %v1430_v7 }
 0x3fa   : > { %v3831_v40 = vadd.f32 -1.0, %v7637_v25  ;;  %v3450_v21 = vmul.f32 33.0, %v3180_v29  ;;  %4095 = vrcp.f32 %v6257_v61  ;;  %v1283_v29 = vand.u32 2147483648, %v6157_v42 }
 0x3fb   : > { %v2981_v2 = vmul.f32 0.0952381, %v2933_v5  ;;  %v2877_v1 = vmul.f32 2.0, %v2829_v16  ;;  %v2635_v5 = vsel %vm2634_vm4, %v2630_v6, inf  ;;  %v6276_v16 = vadd.f32 %v6184_v19, %v1305_v45  ;;  %v7639_v6 = vld [vmem:[#allocation61_spill] sm:$0xff] }
 0x3fc   : > { %v6263_v28 = vpop.xlane.xlu0 %2456  ;;  %3904 = vst.msk [vmem:[%s4665_s12 + $0xb0] sm:$0xff] %vm3223_vm6, %v3450_v21  ;;  %4097 = vpow2.f32 %v3765_v56  ;;  %v1830_v20 = vmul.f32 0.1904762, %v3831_v40  ;;  %v6284_v7 = vadd.f32 1.0, %v4094_v57  ;;  %v6287_v45 = vadd.f32 %v6181_v10, %v1275_v43 }
 0x3fd   : > { %v2925_v54 = vadd.f32 1.0, %v2877_v1  ;;  %v3077_v15 = vadd.f32 %v2981_v2, %v1824_v53  ;;  %v1816_v53 = vmul.f32 0.1904762, %v3817_v3  ;;  %v3770_v32 = vmul.f32 -1.442695, %v7638_v41 }
 0x3fe   : > { %2516 = vmin.xlane.f32.xlu2 %v5980_v58  ;;  %v2748_v58 = vand.u32 65535, %v5961_v51  ;;  %v3083_v2 = vadd.f32 %v2987_v26, %v1830_v20  ;;  %v3781_v1 = vmul.f32 -1.442695, %v7564_v22  ;;  %v2459_v51 = vcvt.f32.s32 %v5813_v33  ;;  %v7651_v20 = vld [vmem:[#allocation79_spill] sm:$0xff] }
 0x3ff   : > { %v2973_v44 = vmul.f32 0.0952381, %v2925_v54  ;;  %2636 = vmin.xlane.f32.xlu0 %v2635_v5  ;;  %v3125_v60 = vmax.f32 %v3077_v15, 0.0  ;;  %v1439_v56 = vsub.f32 1.0, %v1438_v48  ;;  %v3774_v25 = vmul.f32 -1.442695, %v7639_v6 }
 0x400   : > { %v2750_v21 = vcvt.s32.f32 %v2748_v58  ;;  %v3131_v15 = vmax.f32 %v3083_v2, 0.0  ;;  %v6297_v43 = vpop.eup %4095  ;;  %4099 = vrcp.f32 %v6284_v7  ;;  %v2458_v26 = vcvt.f32.s32 %v6263_v28  ;;  %v6312_v58 = vpop.xlane.xlu2 %2767 }
 0x401   : > { %v3069_v12 = vadd.f32 %v2973_v44, %v1816_v53  ;;  %v3173_v3 = vmin.f32 %v3125_v60, 4.0  ;;  %4101 = vpow2.f32 %v3770_v32  ;;  %v1281_v48 = vand.u32 2147483647, %v6157_v42 }
 0x402   : > { %v4098_v33 = vpop.eup %4097  ;;  %v3179_v5 = vmin.f32 %v3131_v15, 4.0  ;;  %4103 = vpow2.f32 %v3781_v1  ;;  %v2460_v53 = vshll.u32 %v2459_v51, 16  ;;  %v1440_v28 = vmul.f32 %v6251_v13, %v1439_v56 }
 0x403   : > { %v3117_v34 = vmax.f32 %v3069_v12, 0.0  ;;  %v3338_v54 = vmul.f32 16.0, %v3173_v3  ;;  %4105 = vpow2.f32 %v3774_v25  ;;  %v6322_v12 = vadd.f32 1.0, %v4098_v33 }
 0x404   : > { %v6295_v40 = vpop.xlane.xlu0 %2752  ;;  %v2461_v41 = vadd.s32 %v2460_v53, %v2458_v26  ;;  %v1313_v32 = vand.u32 2147483648, %v6167_v14  ;;  %v1747_v3 = vmul.f32 2.0, %v1435_v24  ;;  %v1284_v2 = vor.u32 1.1754944e-38, %v1283_v29 }
 0x405   : > { %v3165_v57 = vmin.f32 %v3117_v34, 4.0  ;;  %vm2754_vm11 = vcmp.eq.f32.partialorder %v5988_v4, %v6295_v40  ;;  %3873 = vst.msk [vmem:[%s4665_s12 + $0x78] sm:$0xff] %vm3223_vm6, %v3338_v54  ;;  %v1543_v4 = vmul.f32 %v6297_v43, %v6257_v61  ;;  %v1311_v1 = vand.u32 2147483647, %v6167_v14 }
 0x406   : > { %2651 = vmin.xlane.f32.xlu2 %v6007_v59  ;;  %v2755_v22 = vsel %vm2754_vm11, %v2750_v21, inf  ;;  %v7640_v59 = vld [vmem:[#allocation87_spill] sm:$0xff]  ;;  %v6337_v51 = vpop.eup %4099  ;;  %vm2769_vm14 = vcmp.eq.f32.partialorder %v5958_v9, %v6312_v58  ;;  %v1280_v24 = vsel %vm6318_vm12, %v6181_v10, %v6287_v45  ;;  %vm6345_vm15 = vcmp.eq.f32.partialorder %v1281_v48, 8.507059e+37 }
 0x407   : > { %v3222_v44 = vmul.f32 10.0, %v3165_v57  ;;  %2756 = vmin.xlane.f32.xlu1 %v2755_v22  ;;  %2591 = vmin.xlane.f32.xlu0 %v6077_v55  ;;  %v2763_v60 = vand.u32 65535, %v7640_v59  ;;  %v3449_v55 = vmul.f32 33.0, %v3179_v5  ;;  %v1310_v14 = vsel %vm6330_vm13, %v6184_v19, %v6276_v16  ;;  %v4102_v34 = vpop.eup %4101  ;;  %v7647_v57 = vld [vmem:[#allocation58_spill] sm:$0xff]  ;;  %v7648_v22 = vld [vmem:[#allocation97_spill] sm:$0xff]  ;;  %v6367_v5 = vpop.xlane.xlu1 %2782 }
 0x408   : > { %v1544_v6 = vsub.f32 1.0, %v1543_v4  ;;  %v1441_v25 = vadd.f32 %v6251_v13, %v1440_v28  ;;  %vm1443_vm0 = vweird.f32 %v6251_v13  ;;  %v4104_v21 = vpop.eup %4103  ;;  %4107 = vrcp.f32 %v6322_v12 }
 0x409   : > { %3231 = vst.msk [vmem:[%s4665_s12 + $0x38] sm:$0xff] %vm3223_vm6, %v3222_v44  ;;  %v2765_v56 = vcvt.s32.f32 %v2763_v60  ;;  %v2845_v10 = vcvt.s32.f32 %v2461_v41  ;;  %v1314_v45 = vor.u32 1.1754944e-38, %v1313_v32  ;;  %v1448_v54 = vand.u32 2147483648, %v6209_v0  ;;  %v4106_v15 = vpop.eup %4105  ;;  %vm6374_vm2 = vmor %vm1442_vm1, %vm1443_vm0 }
 0x40a   : > { %3903 = vst.msk [vmem:[%s4665_s12 + $0xa8] sm:$0xff] %vm3223_vm6, %v3449_v55  ;;  %v3766_v26 = vmul.f32 -1.442695, %v7647_v57  ;;  %v1446_v16 = vand.u32 2147483647, %v6209_v0  ;;  %v6364_v33 = vadd.f32 1.0, %v4102_v34  ;;  %v1545_v53 = vmul.f32 %v6297_v43, %v1544_v6 }
 0x40b   : > { %v2770_v19 = vsel %vm2769_vm14, %v2765_v56, inf  ;;  %v2778_v48 = vand.u32 65535, %v7648_v22  ;;  %vm1312_vm5 = vcmp.eq.f32.partialorder %v1311_v1, 8.507059e+37  ;;  %v6378_v0 = vadd.f32 1.0, %v4104_v21 }
 0x40c   : > { %v1315_v44 = vsel %vm1312_vm5, %v1314_v45, %v1310_v14  ;;  %v1288_v28 = vmul.f32 %v6337_v51, %v6284_v7  ;;  %v6386_v4 = vadd.f32 1.0, %v4106_v15  ;;  %v2893_v59 = vmul.f32 2.0, %v2845_v10  ;;  %v7653_v10 = vld [vmem:[#allocation52_spill] sm:$0xff] }
 0x40d   : > { %v1449_v60 = vor.u32 1.1754944e-38, %v1448_v54  ;;  %4109 = vpow2.f32 %v3766_v26  ;;  %vm2784_vm3 = vcmp.eq.f32.partialorder %v7651_v20, %v6367_v5  ;;  %v3844_v55 = vadd.f32 -1.0, %v1747_v3 }
 0x40e   : > { %2606 = vmin.xlane.f32.xlu2 %v6057_v38  ;;  %v1285_v38 = vsel %vm6345_vm15, %v1284_v2, %v1280_v24  ;;  %vm1447_vm4 = vcmp.eq.f32.partialorder %v1446_v16, 8.507059e+37  ;;  %v6390_v41 = vpop.eup %4107  ;;  %4111 = vrcp.f32 %v6364_v33  ;;  %v2780_v32 = vcvt.s32.f32 %v2778_v48 }
 0x40f   : > { %2531 = vmin.xlane.f32.xlu1 %v6019_v11  ;;  %2771 = vmin.xlane.f32.xlu0 %v2770_v19  ;;  %v1445_v11 = vsel %vm6374_vm2, %v6251_v13, %v1441_v25  ;;  %v1737_v2 = vmul.f32 2.0, %v1285_v38  ;;  %4113 = vrcp.f32 %v6378_v0  ;;  %v1546_v42 = vadd.f32 %v6297_v43, %v1545_v53  ;;  %v7652_v25 = vld [vmem:[#allocation60_spill] sm:$0xff] }
 0x410   : > { %v1450_v13 = vsel %vm1447_vm4, %v1449_v60, %v1445_v11  ;;  %vm1548_vm7 = vweird.f32 %v6297_v43  ;;  %v1739_v1 = vmul.f32 2.0, %v1315_v44  ;;  %4115 = vrcp.f32 %v6386_v4 }
 0x411   : > { %v2941_v24 = vadd.f32 1.0, %v2893_v59  ;;  %v2785_v29 = vsel %vm2784_vm3, %v2780_v32, inf  ;;  %v1289_v3 = vsub.f32 1.0, %v1288_v28  ;;  %v1318_v14 = vmul.f32 %v6390_v41, %v6322_v12 }
 0x412   : > { %v1551_v34 = vand.u32 2147483647, %v6257_v61  ;;  %v1553_v56 = vand.u32 2147483648, %v6257_v61  ;;  %v1748_v6 = vmul.f32 2.0, %v1450_v13  ;;  %v3782_v21 = vmul.f32 -1.442695, %v7652_v25 }
 0x413   : > { %vm1547_vm9 = vweird.f32 %v6257_v61  ;;  %v3833_v45 = vadd.f32 -1.0, %v7653_v10  ;;  %v4110_v54 = vpop.eup %4109  ;;  %v6406_v15 = vmul.f32 0.1904762, %v3844_v55  ;;  %v1296_v57 = vand.u32 2147483647, %v6284_v7  ;;  %v7661_v25 = vld [vmem:[#allocation78_spill] sm:$0xff] }
 0x414   : > { %v1298_v26 = vand.u32 2147483648, %v6284_v7  ;;  %v6410_v19 = vadd.f32 -1.0, %v1737_v2  ;;  %vm6414_vm10 = vmor %vm1547_vm9, %vm1548_vm7  ;;  %v2989_v61 = vmul.f32 0.0952381, %v2941_v24  ;;  %v1290_v22 = vmul.f32 %v6337_v51, %v1289_v3  ;;  %v7659_v24 = vld [vmem:[#allocation65_spill] sm:$0xff] }
 0x415   : > { %v1550_v48 = vsel %vm6414_vm10, %v6297_v43, %v1546_v42  ;;  %v6426_v38 = vadd.f32 -1.0, %v1739_v1  ;;  %vm1552_vm11 = vcmp.eq.f32.partialorder %v1551_v34, 8.507059e+37  ;;  %v1554_v53 = vor.u32 1.1754944e-38, %v1553_v56 }
 0x416   : > { %2786 = vmin.xlane.f32.xlu2 %v2785_v29  ;;  %v1319_v44 = vsub.f32 1.0, %v1318_v14  ;;  %v6430_v11 = vadd.f32 -1.0, %v1748_v6  ;;  %v6434_v59 = vadd.f32 1.0, %v4110_v54  ;;  %4117 = vpow2.f32 %v3782_v21  ;;  %v7660_v14 = vld [vmem:[#allocation68_spill] sm:$0xff] }
 0x417   : > { %2666 = vmin.xlane.f32.xlu1 %v6035_v8  ;;  %2546 = vmin.xlane.f32.xlu0 %v6140_v36  ;;  %v6418_v8 = vpop.eup %4111  ;;  %v6420_v36 = vpop.permute.xlu1 %3293  ;;  %vm1292_vm12 = vweird.f32 %v6284_v7  ;;  %v1832_v60 = vmul.f32 0.1904762, %v3833_v45  ;;  %vm1293_vm8 = vweird.f32 %v6337_v51  ;;  %vm6438_vm13 = vcmp.eq.f32.partialorder %v1296_v57, 8.507059e+37 }
 0x418   : > { %7656 = vst [vmem:[#allocation91_spill] sm:$0xff] %v6420_v36  ;;  %v6428_v9 = vpop.eup %4113  ;;  %v1299_v20 = vor.u32 1.1754944e-38, %v1298_v26  ;;  %v1555_v55 = vsel %vm1552_vm11, %v1554_v53, %v1550_v48  ;;  %v1393_v32 = vmul.f32 %v6418_v8, %v6364_v33  ;;  %v1291_v2 = vadd.f32 %v6337_v51, %v1290_v22  ;;  %v6461_v45 = vpop.xlane.xlu0 %2797  ;;  %vm6467_vm15 = vmor %vm1292_vm12, %vm1293_vm8  ;;  %v7664_v22 = vld [vmem:[#allocation88_spill] sm:$0xff] }
 0x419   : > { %v6432_v28 = vpop.eup %4115  ;;  %vm1322_vm14 = vweird.f32 %v6322_v12  ;;  %v3085_v13 = vadd.f32 %v2989_v61, %v1832_v60  ;;  %v1558_v42 = vmul.f32 %v6428_v9, %v6378_v0  ;;  %v3775_v29 = vmul.f32 -1.442695, %v7659_v24 }
 0x41a   : > { %v1453_v1 = vmul.f32 %v6432_v28, %v6386_v4  ;;  %v1320_v3 = vmul.f32 %v6390_v41, %v1319_v44  ;;  %4119 = vrcp.f32 %v6434_v59  ;;  %v3771_v34 = vmul.f32 -1.442695, %v7660_v14 }
 0x41b   : > { %v6457_v56 = vmul.f32 2.0, %v1555_v55  ;;  %v3133_v6 = vmax.f32 %v3085_v13, 0.0  ;;  %v2718_v21 = vand.u32 65535, %v7661_v25  ;;  %v2793_v10 = vand.u32 65535, %v5994_v63  ;;  %v7670_v25 = vld [vmem:[#allocation64_spill] sm:$0xff] }
 0x41c   : > { %v4118_v54 = vpop.eup %4117  ;;  %v1295_v57 = vsel %vm6467_vm15, %v6337_v51, %v1291_v2  ;;  %vm1323_vm0 = vweird.f32 %v6390_v41  ;;  %v1394_v63 = vsub.f32 1.0, %v1393_v32  ;;  %4121 = vpow2.f32 %v3775_v29  ;;  %v6512_v29 = vpop.xlane.xlu2 %2812 }
 0x41d   : > { %v3181_v26 = vmin.f32 %v3133_v6, 4.0  ;;  %v1321_v7 = vadd.f32 %v6390_v41, %v1320_v3  ;;  %v1454_v16 = vsub.f32 1.0, %v1453_v1  ;;  %v1559_v61 = vsub.f32 1.0, %v1558_v42  ;;  %vm6506_vm4 = vmor %vm1322_vm14, %vm1323_vm0 }
 0x41e   : > { %2561 = vmin.xlane.f32.xlu2 %v6112_v52  ;;  %4123 = vpow2.f32 %v3771_v34  ;;  %vm2724_vm1 = vcmp.eq.f32.partialorder %v7664_v22, %v6191_v35  ;;  %vm2799_vm5 = vcmp.eq.f32.partialorder %v6023_v30, %v6461_v45  ;;  %v6484_v53 = vadd.f32 1.0, %v4118_v54 }
 0x41f   : > { %2711 = vmin.xlane.f32.xlu1 %v6116_v17  ;;  %2681 = vmin.xlane.f32.xlu0 %v6163_v62  ;;  %v1326_v17 = vand.u32 2147483647, %v6322_v12  ;;  %v1328_v62 = vand.u32 2147483648, %v6322_v12  ;;  %v6480_v48 = vpop.permute.xlu1 %3299  ;;  %v3451_v51 = vmul.f32 33.0, %v3181_v26  ;;  %v2795_v44 = vcvt.s32.f32 %v2793_v10 }
 0x420   : > { %7665 = vst [vmem:[#allocation93_spill] sm:$0xff] %v6480_v48  ;;  %v2720_v60 = vcvt.s32.f32 %v2718_v21  ;;  %v1300_v55 = vsel %vm6438_vm13, %v1299_v20, %v1295_v57  ;;  %v6488_v32 = vpop.eup %4119  ;;  %v1395_v42 = vmul.f32 %v6418_v8, %v1394_v63  ;;  %vm1397_vm3 = vweird.f32 %v6364_v33  ;;  %v7678_v20 = vld [vmem:[#allocation71_spill] sm:$0xff] }
 0x421   : > { %vm6490_vm2 = vcmp.eq.f32.partialorder %v1326_v17, 8.507059e+37  ;;  %v1329_v13 = vor.u32 1.1754944e-38, %v1328_v62  ;;  %3905 = vst.msk [vmem:[%s4665_s12 + $0xb8] sm:$0xff] %vm3223_vm6, %v3451_v51  ;;  %v2800_v30 = vsel %vm2799_vm5, %v2795_v44, inf  ;;  %v1560_v1 = vmul.f32 %v6428_v9, %v1559_v61 }
 0x422   : > { %v2725_v43 = vsel %vm2724_vm1, %v2720_v60, inf  ;;  %v1401_v24 = vand.u32 2147483647, %v6364_v33  ;;  %v1325_v3 = vsel %vm6506_vm4, %v6390_v41, %v1321_v7  ;;  %v1455_v14 = vmul.f32 %v6432_v28, %v1454_v16  ;;  %v4122_v34 = vpop.eup %4121 }
 0x423   : > { %v1403_v12 = vand.u32 2147483648, %v6364_v33  ;;  %v1333_v6 = vmul.f32 %v6488_v32, %v6434_v59  ;;  %4125 = vrcp.f32 %v6484_v53  ;;  %v3767_v21 = vmul.f32 -1.442695, %v7670_v25  ;;  %v7680_v25 = vld [vmem:[#allocation67_spill] sm:$0xff] }
 0x424   : > { %v2808_v10 = vand.u32 65535, %v5956_v46  ;;  %v4124_v52 = vpop.eup %4123  ;;  %vm1562_vm6 = vweird.f32 %v6378_v0  ;;  %v1566_v17 = vand.u32 2147483647, %v6378_v0  ;;  %v1396_v41 = vadd.f32 %v6418_v8, %v1395_v42 }
 0x425   : > { %vm1398_vm7 = vweird.f32 %v6418_v8  ;;  %v1330_v62 = vsel %vm6490_vm2, %v1329_v13, %v1325_v3  ;;  %v1561_v54 = vadd.f32 %v6428_v9, %v1560_v1  ;;  %vm1563_vm9 = vweird.f32 %v6428_v9 }
 0x426   : > { %2696 = vmin.xlane.f32.xlu2 %v6132_v31  ;;  %v1738_v31 = vmul.f32 2.0, %v1300_v55  ;;  %v1568_v57 = vand.u32 2147483648, %v6378_v0  ;;  %v6533_v63 = vadd.f32 1.0, %v4122_v34  ;;  %vm2814_vm10 = vcmp.eq.f32.partialorder %v5978_v18, %v6512_v29  ;;  %vm6543_vm12 = vmor %vm1397_vm3, %vm1398_vm7 }
 0x427   : > { %2801 = vmin.xlane.f32.xlu1 %v2800_v30  ;;  %2726 = vmin.xlane.f32.xlu0 %v2725_v43  ;;  %v1456_v46 = vadd.f32 %v6432_v28, %v1455_v14  ;;  %vm1458_vm11 = vweird.f32 %v6432_v28  ;;  %v6539_v26 = vadd.f32 1.0, %v4124_v52  ;;  %4127 = vpow2.f32 %v3767_v21  ;;  %v6547_v22 = vpop.permute.xlu1 %3405  ;;  %vm6552_vm8 = vmor %vm1562_vm6, %vm1563_vm9 }
 0x428   : > { %v2810_v7 = vcvt.s32.f32 %v2808_v10  ;;  %v1334_v61 = vsub.f32 1.0, %v1333_v6  ;;  %7673 = vst [vmem:[#allocation57_spill] sm:$0xff] %v6547_v22  ;;  %v1463_v51 = vand.u32 2147483648, %v6386_v4  ;;  %v1400_v44 = vsel %vm6543_vm12, %v6418_v8, %v1396_v41 }
 0x429   : > { %vm1402_vm13 = vcmp.eq.f32.partialorder %v1401_v24, 8.507059e+37  ;;  %v1404_v33 = vor.u32 1.1754944e-38, %v1403_v12  ;;  %v6559_v60 = vpop.eup %4125  ;;  %vm1457_vm14 = vweird.f32 %v6386_v4  ;;  %v1461_v2 = vand.u32 2147483647, %v6386_v4  ;;  %v6581_v24 = vpop.permute.xlu2 %3291 }
 0x42a   : > { %v2815_v55 = vsel %vm2814_vm10, %v2810_v7, inf  ;;  %v1565_v0 = vsel %vm6552_vm8, %v6428_v9, %v1561_v54  ;;  %4129 = vrcp.f32 %v6533_v63  ;;  %v1740_v13 = vmul.f32 2.0, %v1330_v62  ;;  %vm6569_vm15 = vmor %vm1457_vm14, %vm1458_vm11  ;;  %7679 = vst [vmem:[#allocation92_spill] sm:$0xff] %v6581_v24 }
 0x42b   : > { %vm1567_vm0 = vcmp.eq.f32.partialorder %v1566_v17, 8.507059e+37  ;;  %v1569_v42 = vor.u32 1.1754944e-38, %v1568_v57  ;;  %4131 = vrcp.f32 %v6539_v26  ;;  %v1460_v4 = vsel %vm6569_vm15, %v6432_v28, %v1456_v46 }
 0x42c   : > { %v1405_v30 = vsel %vm1402_vm13, %v1404_v33, %v1400_v44  ;;  %v1335_v9 = vmul.f32 %v6488_v32, %v1334_v61  ;;  %v1573_v43 = vmul.f32 %v6559_v60, %v6484_v53  ;;  %v3783_v1 = vmul.f32 -1.442695, %v7678_v20 }
 0x42d   : > { %v1464_v3 = vor.u32 1.1754944e-38, %v1463_v51  ;;  %v1570_v14 = vsel %vm1567_vm0, %v1569_v42, %v1565_v0  ;;  %v4128_v12 = vpop.eup %4127  ;;  %v6584_v34 = vmul.f32 0.1904762, %v6410_v19  ;;  %v3852_v6 = vadd.f32 -1.0, %v6457_v56 }
 0x42e   : > { %v6588_v28 = vmul.f32 0.1904762, %v6426_v38  ;;  %vm1462_vm1 = vcmp.eq.f32.partialorder %v1461_v2, 8.507059e+37  ;;  %v3778_v21 = vmul.f32 -1.442695, %v7680_v25  ;;  %v3835_v10 = vadd.f32 -1.0, %v1738_v31 }
 0x42f   : > { %2816 = vmin.xlane.f32.xlu0 %v2815_v55  ;;  %v1465_v52 = vsel %vm1462_vm1, %v1464_v3, %v1460_v4  ;;  %v1745_v17 = vmul.f32 2.0, %v1405_v30  ;;  %v3837_v41 = vadd.f32 -1.0, %v1740_v13  ;;  %v1756_v62 = vmul.f32 2.0, %v1570_v14  ;;  %v7681_v31 = vld [vmem:[#allocation75_spill] sm:$0xff]  ;;  %v6605_v51 = vpop.permute.xlu1 %3411  ;;  %v7688_v25 = vld [vmem:[#allocation73_spill] sm:$0xff] }
 0x430   : > { %v1336_v54 = vadd.f32 %v6488_v32, %v1335_v9  ;;  %vm1338_vm5 = vweird.f32 %v6488_v32  ;;  %v6593_v57 = vpop.eup %4129  ;;  %v6595_v19 = vadd.f32 1.0, %v4128_v12  ;;  %4133 = vpow2.f32 %v3783_v1  ;;  %7682 = vst [vmem:[#allocation69_spill] sm:$0xff] %v6605_v51  ;;  %v7687_v12 = vld [vmem:[#allocation70_spill] sm:$0xff] }
 0x431   : > { %v6598_v38 = vmul.f32 0.1904762, %v6430_v11  ;;  %v1574_v56 = vsub.f32 1.0, %v1573_v43  ;;  %v6600_v46 = vpop.eup %4131  ;;  %v3768_v7 = vmul.f32 -1.442695, %v7681_v31  ;;  %v1749_v16 = vmul.f32 2.0, %v1465_v52  ;;  %v6633_v1 = vpop.permute.xlu2 %3297 }
 0x432   : > { %vm1337_vm2 = vweird.f32 %v6434_v59  ;;  %v1343_v61 = vand.u32 2147483648, %v6434_v59  ;;  %4135 = vpow2.f32 %v3778_v21  ;;  %v6607_v18 = vmul.f32 0.1904762, %v3852_v6  ;;  %7686 = vst [vmem:[#allocation24_spill] sm:$0xff] %v6633_v1 }
 0x433   : > { %v3842_v44 = vadd.f32 -1.0, %v1745_v17  ;;  %vm6611_vm3 = vmor %vm1337_vm2, %vm1338_vm5  ;;  %v1341_v33 = vand.u32 2147483647, %v6434_v59  ;;  %v6616_v55 = vmul.f32 0.1904762, %v3835_v10  ;;  %v3853_v0 = vadd.f32 -1.0, %v1756_v62  ;;  %v6629_v59 = vpop.permute.xlu0 %3289 }
 0x434   : > { %v6618_v2 = vmul.f32 0.1904762, %v3837_v41  ;;  %v1340_v13 = vsel %vm6611_vm3, %v6488_v32, %v1336_v54  ;;  %v1468_v8 = vmul.f32 %v6593_v57, %v6533_v63  ;;  %v1408_v42 = vmul.f32 %v6600_v46, %v6539_v26  ;;  %7685 = vst [vmem:[#allocation3_spill] sm:$0xff] %v6629_v59 }
 0x435   : > { %4137 = vrcp.f32 %v6595_v19  ;;  %v1575_v4 = vmul.f32 %v6559_v60, %v1574_v56  ;;  %v3846_v30 = vadd.f32 -1.0, %v1749_v16  ;;  %v1344_v9 = vor.u32 1.1754944e-38, %v1343_v61  ;;  %v7689_v56 = vld [vmem:[#allocation34_spill] sm:$0xff] }
 0x436   : > { %4139 = vpow2.f32 %v3768_v7  ;;  %v1581_v43 = vand.u32 2147483647, %v6484_v53  ;;  %v4134_v20 = vpop.eup %4133  ;;  %v3784_v32 = vmul.f32 -1.442695, %v7566_v23  ;;  %v6635_v3 = vmul.f32 0.1904762, %v3842_v44 }
 0x437   : > { %vm1342_vm4 = vcmp.eq.f32.partialorder %v1341_v33, 8.507059e+37  ;;  %v1583_v14 = vand.u32 2147483648, %v6484_v53  ;;  %v3779_v6 = vmul.f32 -1.442695, %v7687_v12  ;;  %v2624_v21 = vcvt.f32.s32 %v7688_v25  ;;  %v7696_v25 = vld [vmem:[#allocation38_spill] sm:$0xff] }
 0x438   : > { %v6640_v10 = vmul.f32 0.1904762, %v3853_v0  ;;  %v1345_v52 = vsel %vm1342_vm4, %v1344_v9, %v1340_v13  ;;  %v4136_v17 = vpop.eup %4135  ;;  %v1409_v41 = vsub.f32 1.0, %v1408_v42  ;;  %v1576_v62 = vadd.f32 %v6559_v60, %v1575_v4  ;;  %v7703_v4 = vld [vmem:[#allocation77_spill] sm:$0xff] }
 0x439   : > { %vm1578_vm6 = vweird.f32 %v6559_v60  ;;  %v1469_v23 = vsub.f32 1.0, %v1468_v8  ;;  %v6644_v54 = vadd.f32 1.0, %v4134_v20  ;;  %v6648_v31 = vmul.f32 0.1904762, %v3846_v30 }
 0x43a   : > { %vm1577_vm7 = vweird.f32 %v6484_v53  ;;  %vm6651_vm9 = vcmp.eq.f32.partialorder %v1581_v43, 8.507059e+37  ;;  %4141 = vpow2.f32 %v3784_v32  ;;  %v1416_v44 = vand.u32 2147483647, %v6539_v26  ;;  %v7692_v53 = vld [vmem:[#allocation36_spill] sm:$0xff]  ;;  %v7695_v32 = vld [vmem:[#allocation66_spill] sm:$0xff] }
 0x43b   : > { %v6655_v16 = vpop.eup %4137  ;;  %v1741_v11 = vmul.f32 2.0, %v1345_v52  ;;  %v1584_v33 = vor.u32 1.1754944e-38, %v1583_v14  ;;  %v6658_v13 = vadd.f32 1.0, %v4136_v17  ;;  %4143 = vpow2.f32 %v3779_v6  ;;  %vm6664_vm10 = vmor %vm1577_vm7, %vm1578_vm6  ;;  %v7697_v52 = vld [vmem:[#allocation105_spill] sm:$0xff] }
 0x43c   : > { %v4140_v0 = vpop.eup %4139  ;;  %v2625_v8 = vshll.u32 %v2624_v21, 16  ;;  %v1410_v30 = vmul.f32 %v6600_v46, %v1409_v41  ;;  %v1580_v9 = vsel %vm6664_vm10, %v6559_v60, %v1576_v62  ;;  %v1470_v43 = vmul.f32 %v6593_v57, %v1469_v23  ;;  %v6688_v41 = vpop.permute.xlu0 %3295 }
 0x43d   : > { %vm1472_vm11 = vweird.f32 %v6533_v63  ;;  %v1348_v20 = vmul.f32 %v6655_v16, %v6595_v19  ;;  %4145 = vrcp.f32 %v6644_v54  ;;  %v3776_v14 = vmul.f32 -1.442695, %v7695_v32  ;;  %7698 = vst [vmem:[#allocation21_spill] sm:$0xff] %v6688_v41 }
 0x43e   : > { %3415 = vrot.lane.b32.xlu2 %v7689_v56, %s4198_s13  ;;  %v6678_v6 = vadd.f32 1.0, %v4140_v0  ;;  %vm1412_vm12 = vweird.f32 %v6539_v26  ;;  %v1418_v60 = vand.u32 2147483648, %v6539_v26  ;;  %v6684_v21 = vadd.f32 -1.0, %v1741_v11  ;;  %v6696_v0 = vpop.permute.xlu2 %3303 }
 0x43f   : > { %v2622_v61 = vpop.xlane.xlu1 %2621  ;;  %4147 = vrcp.f32 %v6658_v13  ;;  %v2489_v17 = vcvt.f32.s32 %v7697_v52  ;;  %vm6690_vm8 = vcmp.eq.f32.partialorder %v1416_v44, 8.507059e+37  ;;  %v1585_v56 = vsel %vm6651_vm9, %v1584_v33, %v1580_v9  ;;  %7701 = vst [vmem:[#allocation18_spill] sm:$0xff] %v6696_v0 }
 0x440   : > { %v2623_v42 = vcvt.f32.s32 %v2622_v61  ;;  %3417 = vrot.lane.b32.xlu1 %v7692_v53, %s4198_s13  ;;  %v4142_v61 = vpop.eup %4141  ;;  %vm1413_vm13 = vweird.f32 %v6600_v46  ;;  %v1471_v11 = vadd.f32 %v6593_v57, %v1470_v43  ;;  %vm1473_vm14 = vweird.f32 %v6593_v57  ;;  %v7702_v53 = vld [vmem:[#allocation14_spill] sm:$0xff] }
 0x441   : > { %4149 = vpow2.f32 %v3776_v14  ;;  %v1411_v7 = vadd.f32 %v6600_v46, %v1410_v30  ;;  %v1349_v33 = vsub.f32 1.0, %v1348_v20  ;;  %v3777_v9 = vmul.f32 -1.442695, %v7703_v4  ;;  %vm6718_vm15 = vmor %vm1472_vm11, %vm1473_vm14 }
 0x442   : > { %v2626_v12 = vadd.s32 %v2625_v8, %v2623_v42  ;;  %v1478_v8 = vand.u32 2147483648, %v6533_v63  ;;  %v4144_v42 = vpop.eup %4143  ;;  %4151 = vrcp.f32 %v6678_v6  ;;  %v1476_v43 = vand.u32 2147483647, %v6533_v63  ;;  %vm6728_vm0 = vmor %vm1412_vm12, %vm1413_vm13 }
 0x443   : > { %3518 = vrot.lane.b32.xlu0 %v7696_v25, %s4198_s13  ;;  %v6708_v25 = vpop.eup %4145  ;;  %v6710_v52 = vadd.f32 1.0, %v4142_v61  ;;  %v2490_v14 = vshll.u32 %v2489_v17, 16  ;;  %v6722_v20 = vadd.f32 1.0, %v4144_v42  ;;  %v1475_v61 = vsel %vm6718_vm15, %v6593_v57, %v1471_v11 }
 0x444   : > { %v2856_v62 = vcvt.s32.f32 %v2626_v12  ;;  %v1757_v12 = vmul.f32 2.0, %v1585_v56  ;;  %v1419_v56 = vor.u32 1.1754944e-38, %v1418_v60  ;;  %v1479_v63 = vor.u32 1.1754944e-38, %v1478_v8  ;;  %v7709_v60 = vld [vmem:[#allocation30_spill] sm:$0xff] }
 0x445   : > { %v1415_v42 = vsel %vm6728_vm0, %v6600_v46, %v1411_v7  ;;  %v1350_v26 = vmul.f32 %v6655_v16, %v1349_v33  ;;  %4153 = vpow2.f32 %v3777_v9  ;;  %vm1477_vm1 = vcmp.eq.f32.partialorder %v1476_v43, 8.507059e+37  ;;  %v7710_v7 = vld [vmem:[#allocation76_spill] sm:$0xff] }
 0x446   : > { %v2904_v44 = vmul.f32 2.0, %v2856_v62  ;;  %3520 = vrot.lane.b32.xlu2 %v7702_v53, %s4198_s13  ;;  %v7704_v53 = vld [vmem:[#allocation40_spill] sm:$0xff]  ;;  %v3854_v30 = vadd.f32 -1.0, %v1757_v12  ;;  %4155 = vrcp.f32 %v6710_v52  ;;  %v1480_v8 = vsel %vm1477_vm1, %v1479_v63, %v1475_v61  ;;  %v6755_v12 = vpop.permute.xlu0 %3301  ;;  %v6759_v17 = vpop.permute.xlu2 %3403 }
 0x447   : > { %v2487_v32 = vpop.xlane.xlu1 %2486  ;;  %4157 = vrcp.f32 %v6722_v20  ;;  %v3785_v33 = vmul.f32 -1.442695, %v7710_v7  ;;  %v1420_v9 = vsel %vm6690_vm8, %v1419_v56, %v1415_v42  ;;  %7711 = vst [vmem:[#allocation22_spill] sm:$0xff] %v6755_v12  ;;  %vm1353_vm5 = vweird.f32 %v6655_v16 }
 0x448   : > { %v2952_v62 = vadd.f32 1.0, %v2904_v44  ;;  %v2488_v0 = vcvt.f32.s32 %v2487_v32  ;;  %3516 = vrot.lane.b32.xlu1 %v7704_v53, %s4198_s13  ;;  %v6735_v44 = vpop.eup %4147  ;;  %v1588_v53 = vmul.f32 %v6708_v25, %v6644_v54  ;;  %7712 = vst [vmem:[#allocation2_spill] sm:$0xff] %v6759_v17  ;;  %vm1352_vm2 = vweird.f32 %v6595_v19 }
 0x449   : > { %v4150_v57 = vpop.eup %4149  ;;  %v1513_v46 = vmul.f32 %v6735_v44, %v6658_v13  ;;  %v1356_v63 = vand.u32 2147483647, %v6595_v19  ;;  %4159 = vpow2.f32 %v3785_v33  ;;  %vm6773_vm3 = vmor %vm1352_vm2, %vm1353_vm5  ;;  %v1750_v1 = vmul.f32 2.0, %v1480_v8 }
 0x44a   : > { %v3000_v4 = vmul.f32 0.0952381, %v2952_v62  ;;  %v2491_v32 = vadd.s32 %v2490_v14, %v2488_v0  ;;  %v6747_v14 = vpop.eup %4151  ;;  %v1589_v61 = vsub.f32 1.0, %v1588_v53  ;;  %vm1592_vm6 = vweird.f32 %v6644_v54 }
 0x44b   : > { %3524 = vrot.lane.b32.xlu0 %v7709_v60, %s4198_s13  ;;  %v1363_v23 = vmul.f32 %v6747_v14, %v6678_v6  ;;  %v4154_v60 = vpop.eup %4153  ;;  %vm1357_vm4 = vcmp.eq.f32.partialorder %v1356_v63, 8.507059e+37  ;;  %vm1593_vm7 = vweird.f32 %v6708_v25  ;;  %vm1517_vm9 = vweird.f32 %v6658_v13 }
 0x44c   : > { %v3096_v0 = vadd.f32 %v3000_v4, %v6406_v15  ;;  %v2847_v11 = vcvt.s32.f32 %v2491_v32  ;;  %v1351_v15 = vadd.f32 %v6655_v16, %v1350_v26  ;;  %v1358_v4 = vand.u32 2147483648, %v6595_v19  ;;  %v6777_v19 = vpop.eup %4155  ;;  %vm6827_vm13 = vmor %vm1592_vm6, %vm1593_vm7 }
 0x44d   : > { %v6764_v32 = vadd.f32 1.0, %v4150_v57  ;;  %v6769_v26 = vmul.f32 0.1904762, %v6684_v21  ;;  %v6782_v33 = vpop.eup %4157  ;;  %v1746_v21 = vmul.f32 2.0, %v1420_v9  ;;  %v6786_v17 = vadd.f32 1.0, %v4154_v60 }
 0x44e   : > { %v3144_v43 = vmax.f32 %v3096_v0, 0.0  ;;  %v2895_v62 = vmul.f32 2.0, %v2847_v11  ;;  %v6771_v0 = vmul.f32 0.1904762, %v3854_v30  ;;  %v1514_v11 = vsub.f32 1.0, %v1513_v46 }
 0x44f   : > { %v1590_v30 = vmul.f32 %v6708_v25, %v1589_v61  ;;  %4161 = vrcp.f32 %v6764_v32  ;;  %v1364_v8 = vsub.f32 1.0, %v1363_v23  ;;  %v1603_v61 = vmul.f32 %v6777_v19, %v6710_v52  ;;  %v6803_v23 = vpop.permute.xlu0 %3407 }
 0x450   : > { %v3192_v56 = vmin.f32 %v3144_v43, 4.0  ;;  %v2943_v42 = vadd.f32 1.0, %v2895_v62  ;;  %v1355_v43 = vsel %vm6773_vm3, %v6655_v16, %v1351_v15  ;;  %v1359_v62 = vor.u32 1.1754944e-38, %v1358_v4  ;;  %7715 = vst [vmem:[#allocation29_spill] sm:$0xff] %v6803_v23  ;;  %v7746_v23 = vld [vmem:[#allocation89_spill] sm:$0xff] }
 0x451   : > { %v1596_v16 = vand.u32 2147483647, %v6644_v54  ;;  %v1515_v9 = vmul.f32 %v6735_v44, %v1514_v11  ;;  %v1528_v63 = vmul.f32 %v6782_v33, %v6722_v20  ;;  %vm1518_vm10 = vweird.f32 %v6735_v44 }
 0x452   : > { %v2991_v57 = vmul.f32 0.0952381, %v2943_v42  ;;  %v3349_v7 = vmul.f32 30.0, %v3192_v56  ;;  %v1360_v15 = vsel %vm1357_vm4, %v1359_v62, %v1355_v43  ;;  %v4160_v56 = vpop.eup %4159  ;;  %v1591_v42 = vadd.f32 %v6708_v25, %v1590_v30  ;;  %vm6819_vm8 = vmor %vm1517_vm9, %vm1518_vm10 }
 0x453   : > { %4163 = vrcp.f32 %v6786_v17  ;;  %v1365_v53 = vmul.f32 %v6747_v14, %v1364_v8  ;;  %v1523_v11 = vand.u32 2147483648, %v6658_v13  ;;  %vm1367_vm11 = vweird.f32 %v6678_v6 }
 0x454   : > { %v3087_v46 = vadd.f32 %v2991_v57, %v6616_v55  ;;  %3367 = vrot.lane.b32.xlu2 %v3349_v7, %s4199_s14  ;;  %v1598_v55 = vand.u32 2147483648, %v6644_v54  ;;  %v6807_v57 = vpop.permute.xlu2 %3409  ;;  %vm1368_vm12 = vweird.f32 %v6747_v14  ;;  %v1516_v7 = vadd.f32 %v6735_v44, %v1515_v9 }
 0x455   : > { %7716 = vst [vmem:[#allocation28_spill] sm:$0xff] %v6807_v57  ;;  %v1521_v43 = vand.u32 2147483647, %v6658_v13  ;;  %v6813_v30 = vpop.eup %4161  ;;  %v6815_v62 = vadd.f32 1.0, %v4160_v56  ;;  %v1529_v48 = vsub.f32 1.0, %v1528_v63  ;;  %v3843_v57 = vadd.f32 -1.0, %v1746_v21  ;;  %vm6844_vm15 = vmor %vm1367_vm11, %vm1368_vm12 }
 0x456   : > { %v3135_v4 = vmax.f32 %v3087_v46, 0.0  ;;  %v3847_v56 = vadd.f32 -1.0, %v1750_v1  ;;  %v1742_v22 = vmul.f32 2.0, %v1360_v15  ;;  %v1595_v13 = vsel %vm6827_vm13, %v6708_v25, %v1591_v42 }
 0x457   : > { %vm1597_vm14 = vcmp.eq.f32.partialorder %v1596_v16, 8.507059e+37  ;;  %v1366_v21 = vadd.f32 %v6747_v14, %v1365_v53  ;;  %v1483_v54 = vmul.f32 %v6813_v30, %v6764_v32  ;;  %v1599_v63 = vor.u32 1.1754944e-38, %v1598_v55 }
 0x458   : > { %v3183_v60 = vmin.f32 %v3135_v4, 4.0  ;;  %v1604_v4 = vsub.f32 1.0, %v1603_v61  ;;  %v1371_v61 = vand.u32 2147483647, %v6678_v6  ;;  %v1520_v25 = vsel %vm6819_vm8, %v6735_v44, %v1516_v7 }
 0x459   : > { %v1524_v16 = vor.u32 1.1754944e-38, %v1523_v11  ;;  %v6851_v15 = vpop.eup %4163  ;;  %4165 = vrcp.f32 %v6815_v62  ;;  %vm1522_vm0 = vcmp.eq.f32.partialorder %v1521_v43, 8.507059e+37  ;;  %v1530_v42 = vmul.f32 %v6782_v33, %v1529_v48 }
 0x45a   : > { %v3233_v46 = vmul.f32 13.0, %v3183_v60  ;;  %v1373_v60 = vand.u32 2147483648, %v6678_v6  ;;  %v1605_v55 = vmul.f32 %v6777_v19, %v1604_v4  ;;  %v1600_v53 = vsel %vm1597_vm14, %v1599_v63, %v1595_v13 }
 0x45b   : > { %v6856_v6 = vmul.f32 0.1904762, %v3847_v56  ;;  %v1370_v8 = vsel %vm6844_vm15, %v6747_v14, %v1366_v21  ;;  %vm1372_vm1 = vcmp.eq.f32.partialorder %v1371_v61, 8.507059e+37  ;;  %vm1607_vm5 = vweird.f32 %v6710_v52 }
 0x45c   : > { %3250 = vrot.lane.b32.xlu2 %v3233_v46, %s4199_s14  ;;  %v3839_v46 = vadd.f32 -1.0, %v1742_v22  ;;  %v1374_v9 = vor.u32 1.1754944e-38, %v1373_v60  ;;  %vm1608_vm2 = vweird.f32 %v6777_v19  ;;  %v1498_v44 = vmul.f32 %v6851_v15, %v6786_v17  ;;  %v6868_v22 = vpop.permute.xlu0 %3413 }
 0x45d   : > { %v1525_v48 = vsel %vm1522_vm0, %v1524_v16, %v1520_v25  ;;  %v1484_v7 = vsub.f32 1.0, %v1483_v54  ;;  %v1613_v43 = vand.u32 2147483648, %v6710_v52  ;;  %7723 = vst [vmem:[#allocation5_spill] sm:$0xff] %v6868_v22  ;;  %v1606_v4 = vadd.f32 %v6777_v19, %v1605_v55  ;;  %vm6878_vm4 = vmor %vm1607_vm5, %vm1608_vm2 }
 0x45e   : > { %v1611_v14 = vand.u32 2147483647, %v6710_v52  ;;  %v1531_v56 = vadd.f32 %v6782_v33, %v1530_v42  ;;  %vm1533_vm3 = vweird.f32 %v6782_v33  ;;  %v6874_v60 = vmul.f32 0.1904762, %v3843_v57 }
 0x45f   : > { %v1758_v13 = vmul.f32 2.0, %v1600_v53  ;;  %v1375_v21 = vsel %vm1372_vm1, %v1374_v9, %v1370_v8  ;;  %v1538_v54 = vand.u32 2147483648, %v6722_v20  ;;  %v6883_v63 = vpop.eup %4165  ;;  %v6885_v1 = vmul.f32 0.1904762, %v3839_v46 }
 0x460   : > { %v1493_v25 = vand.u32 2147483648, %v6764_v32  ;;  %vm1532_vm6 = vweird.f32 %v6722_v20  ;;  %v1536_v57 = vand.u32 2147483647, %v6722_v20  ;;  %v1753_v16 = vmul.f32 2.0, %v1525_v48 }
 0x461   : > { %v6865_v11 = vpop.xlane.xlu2 %2471  ;;  %v1485_v55 = vmul.f32 %v6813_v30, %v1484_v7  ;;  %v1499_v52 = vsub.f32 1.0, %v1498_v44  ;;  %v1614_v42 = vor.u32 1.1754944e-38, %v1613_v43  ;;  %vm6893_vm7 = vmor %vm1532_vm6, %vm1533_vm3  ;;  %v1743_v9 = vmul.f32 2.0, %v1375_v21  ;;  %v7728_v44 = vld [vmem:[#allocation106_spill] sm:$0xff] }
 0x462   : > { %v1610_v46 = vsel %vm6878_vm4, %v6777_v19, %v1606_v4  ;;  %vm1612_vm9 = vcmp.eq.f32.partialorder %v1611_v14, 8.507059e+37  ;;  %v1535_v20 = vsel %vm6893_vm7, %v6782_v33, %v1531_v56  ;;  %v1618_v8 = vmul.f32 %v6883_v63, %v6815_v62  ;;  %v7730_v19 = vld [vmem:[#allocation80_spill] sm:$0xff] }
 0x463   : > { %v2504_v48 = vcvt.f32.s32 %v7728_v44  ;;  %v6906_v7 = vadd.f32 -1.0, %v1758_v13  ;;  %v1539_v43 = vor.u32 1.1754944e-38, %v1538_v54  ;;  %vm1487_vm10 = vweird.f32 %v6764_v32 }
 0x464   : > { %v6910_v51 = vor.u32 1.1754944e-38, %v1493_v25  ;;  %vm1537_vm11 = vcmp.eq.f32.partialorder %v1536_v57, 8.507059e+37  ;;  %v2474_v4 = vcvt.f32.s32 %v7730_v19  ;;  %v1500_v33 = vmul.f32 %v6851_v15, %v1499_v52 }
 0x465   : > { %7729 = vst [vmem:[#allocation102_spill] sm:$0xff] %v6906_v7  ;;  %v1615_v56 = vsel %vm1612_vm9, %v1614_v42, %v1610_v46  ;;  %v1540_v61 = vsel %vm1537_vm11, %v1539_v43, %v1535_v20  ;;  %v3840_v59 = vadd.f32 -1.0, %v1743_v9  ;;  %v3850_v44 = vadd.f32 -1.0, %v1753_v16 }
 0x466   : > { %v6915_v13 = vadd.f32 %v6813_v30, %v1485_v55  ;;  %vm1488_vm12 = vweird.f32 %v6813_v30  ;;  %v2505_v54 = vshll.u32 %v2504_v48, 16  ;;  %v2473_v25 = vcvt.f32.s32 %v6865_v11 }
 0x467   : > { %v1619_v57 = vsub.f32 1.0, %v1618_v8  ;;  %v1506_v19 = vand.u32 2147483647, %v6786_v17  ;;  %v1508_v12 = vand.u32 2147483648, %v6786_v17  ;;  %v1759_v52 = vmul.f32 2.0, %v1615_v56  ;;  %vm6923_vm8 = vmor %vm1487_vm10, %vm1488_vm12 }
 0x468   : > { %v1754_v42 = vmul.f32 2.0, %v1540_v61  ;;  %v2475_v46 = vshll.u32 %v2474_v4, 16  ;;  %v1501_v55 = vadd.f32 %v6851_v15, %v1500_v33  ;;  %vm1503_vm13 = vweird.f32 %v6851_v15 }
 0x469   : > { %v2742_v14 = vpop.xlane.xlu2 %2741  ;;  %v2519_v11 = vcvt.f32.s32 %v5972_v49  ;;  %v6930_v9 = vmul.f32 0.1904762, %v3850_v44  ;;  %vm1502_vm14 = vweird.f32 %v6786_v17  ;;  %v2744_v48 = vcvt.f32.s32 %v6213_v47 }
 0x46a   : > { %v2502_v53 = vpop.xlane.xlu0 %2501  ;;  %v2476_v43 = vadd.s32 %v2475_v46, %v2473_v25  ;;  %v1620_v4 = vmul.f32 %v6883_v63, %v1619_v57  ;;  %v6939_v33 = vmul.f32 0.1904762, %v3840_v59  ;;  %vm6941_vm15 = vmor %vm1502_vm14, %vm1503_vm13  ;;  %vm6945_vm0 = vcmp.eq.f32.partialorder %v1506_v19, 8.507059e+37 }
 0x46b   : > { %v2503_v21 = vcvt.f32.s32 %v2502_v53  ;;  %v6949_v61 = vadd.f32 -1.0, %v1759_v52  ;;  %v6951_v53 = vadd.f32 -1.0, %v1754_v42  ;;  %v2743_v17 = vcvt.f32.s32 %v2742_v14 }
 0x46c   : > { %v1505_v59 = vsel %vm6941_vm15, %v6851_v15, %v1501_v55  ;;  %v2520_v25 = vshll.u32 %v2519_v11, 16  ;;  %vm1623_vm1 = vweird.f32 %v6883_v63  ;;  %v1628_v52 = vand.u32 2147483648, %v6815_v62 }
 0x46d   : > { %v2506_v20 = vadd.s32 %v2505_v54, %v2503_v21  ;;  %v1509_v54 = vor.u32 1.1754944e-38, %v1508_v12  ;;  %v2745_v46 = vshll.u32 %v2744_v48, 16  ;;  %v2846_v42 = vcvt.s32.f32 %v2476_v43 }
 0x46e   : > { %v6960_v14 = vadd.f32 %v6883_v63, %v1620_v4  ;;  %v2654_v15 = vcvt.f32.s32 %v5996_v37  ;;  %vm1622_vm5 = vweird.f32 %v6815_v62  ;;  %v2759_v48 = vcvt.f32.s32 %v6295_v40 }
 0x46f   : > { %v2848_v21 = vcvt.s32.f32 %v2506_v20  ;;  %v6966_v55 = vsel %vm6945_vm0, %v1509_v54, %v1505_v59  ;;  %v2746_v11 = vadd.s32 %v2745_v46, %v2743_v17  ;;  %vm6973_vm2 = vmor %vm1622_vm5, %vm1623_vm1  ;;  %v1626_v37 = vand.u32 2147483647, %v6815_v62  ;;  %v7740_v59 = vld [vmem:[#allocation6_spill] sm:$0xff]  ;;  %v7741_v46 = vld [vmem:[#allocation4_spill] sm:$0xff] }
 0x470   : > { %7737 = vst [vmem:[#allocation15_spill] sm:$0xff] %v6966_v55  ;;  %v6978_v4 = vor.u32 1.1754944e-38, %v1628_v52  ;;  %v2894_v49 = vmul.f32 2.0, %v2846_v42  ;;  %v2669_v54 = vcvt.f32.s32 %v7740_v59  ;;  %v2609_v62 = vcvt.f32.s32 %v7741_v46 }
 0x471   : > { %v2896_v47 = vmul.f32 2.0, %v2848_v21  ;;  %v2517_v44 = vpop.xlane.xlu2 %2516  ;;  %v2639_v21 = vcvt.f32.s32 %v6045_v50  ;;  %v2864_v52 = vcvt.s32.f32 %v2746_v11  ;;  %vm6993_vm3 = vcmp.eq.f32.partialorder %v1626_v37, 8.507059e+37 }
 0x472   : > { %v2518_v57 = vcvt.f32.s32 %v2517_v44  ;;  %2576 = vmin.xlane.f32.xlu1 %v6223_v39  ;;  %v2637_v19 = vpop.xlane.xlu0 %2636  ;;  %v2534_v39 = vcvt.f32.s32 %v6011_v27  ;;  %v2655_v44 = vshll.u32 %v2654_v15, 16  ;;  %v2942_v40 = vadd.f32 1.0, %v2894_v49 }
 0x473   : > { %v2944_v20 = vadd.f32 1.0, %v2896_v47  ;;  %v2638_v17 = vcvt.f32.s32 %v2637_v19  ;;  %v2640_v47 = vshll.u32 %v2639_v21, 16  ;;  %v2760_v19 = vshll.u32 %v2759_v48, 16 }
 0x474   : > { %v2521_v12 = vadd.s32 %v2520_v25, %v2518_v57  ;;  %v6986_v57 = vshll.u32 %v2534_v39, 16  ;;  %v6990_v59 = vshll.u32 %v2669_v54, 16  ;;  %v7743_v39 = vld [vmem:[#allocation7_spill] sm:$0xff]  ;;  %v2912_v48 = vmul.f32 2.0, %v2864_v52 }
 0x475   : > { %v2992_v56 = vmul.f32 0.0952381, %v2944_v20  ;;  %v2641_v15 = vadd.s32 %v2640_v47, %v2638_v17  ;;  %v2714_v49 = vcvt.f32.s32 %v7746_v23  ;;  %v2774_v47 = vcvt.f32.s32 %v6312_v58 }
 0x476   : > { %v2849_v43 = vcvt.s32.f32 %v2521_v12  ;;  %v7742_v12 = vld [vmem:[#allocation84_spill] sm:$0xff]  ;;  %v2990_v54 = vmul.f32 0.0952381, %v2942_v40  ;;  %v2960_v23 = vadd.f32 1.0, %v2912_v48  ;;  %vm3272_vm6 = vcmask 31768  }
 0x477   : > { %v3088_v27 = vadd.f32 %v2992_v56, %v6588_v28  ;;  %v2594_v28 = vcvt.f32.s32 %v7742_v12  ;;  %vm3313_vm7 = vcmask 56352  }
 0x478   : > { %v2897_v25 = vmul.f32 2.0, %v2849_v43  ;;  %v2564_v43 = vcvt.f32.s32 %v7743_v39 }
 0x479   : > { %v3136_v20 = vmax.f32 %v3088_v27, 0.0  ;;  %v2652_v42 = vpop.xlane.xlu2 %2651  ;;  %v2610_v27 = vshll.u32 %v2609_v62, 16  ;;  %v2595_v12 = vshll.u32 %v2594_v28, 16  ;;  %v7748_v28 = vld [vmem:[#allocation11_spill] sm:$0xff] }
 0x47a   : > { %v2945_v56 = vadd.f32 1.0, %v2897_v25  ;;  %v2653_v8 = vcvt.f32.s32 %v2652_v42  ;;  %v2757_v22 = vpop.xlane.xlu1 %2756  ;;  %v2592_v36 = vpop.xlane.xlu0 %2591 }
 0x47b   : > { %v3184_v21 = vmin.f32 %v3136_v20, 4.0  ;;  %v2758_v41 = vcvt.f32.s32 %v2757_v22  ;;  %v2857_v20 = vcvt.s32.f32 %v2641_v15  ;;  %v2593_v62 = vcvt.f32.s32 %v2592_v36 }
 0x47c   : > { %v2993_v24 = vmul.f32 0.0952381, %v2945_v56  ;;  %v2656_v46 = vadd.s32 %v2655_v44, %v2653_v8  ;;  %v7001_v8 = vshll.u32 %v2564_v43, 16  ;;  %v3086_v43 = vadd.f32 %v2990_v54, %v6584_v34 }
 0x47d   : > { %v2761_v25 = vadd.s32 %v2760_v19, %v2758_v41  ;;  %v3234_v42 = vmul.f32 13.0, %v3184_v21  ;;  %v7747_v41 = vld [vmem:[#allocation9_spill] sm:$0xff]  ;;  %v2549_v19 = vcvt.f32.s32 %v7748_v28  ;;  %v2596_v36 = vadd.s32 %v2595_v12, %v2593_v62 }
 0x47e   : > { %v3089_v17 = vadd.f32 %v2993_v24, %v6618_v2  ;;  %v2858_v22 = vcvt.s32.f32 %v2656_v46  ;;  %v2699_v52 = vcvt.f32.s32 %v7747_v41  ;;  %v7749_v2 = vld [vmem:[#allocation13_spill] sm:$0xff]  ;;  %v3008_v28 = vmul.f32 0.0952381, %v2960_v23 }
 0x47f   : > { %v2865_v56 = vcvt.s32.f32 %v2761_v25  ;;  %3252 = vrot.lane.b32.xlu0 %v3234_v42, %s4199_s14  ;;  %v2684_v39 = vcvt.f32.s32 %v7749_v2  ;;  %v2775_v42 = vshll.u32 %v2774_v47, 16  ;;  %v7017_v34 = vshll.u32 %v2714_v49, 16 }
 0x480   : > { %v3137_v37 = vmax.f32 %v3089_v17, 0.0  ;;  %v2906_v44 = vmul.f32 2.0, %v2858_v22  ;;  %v2905_v17 = vmul.f32 2.0, %v2857_v20  ;;  %v7019_v54 = vshll.u32 %v2699_v52, 16 }
 0x481   : > { %v2913_v21 = vmul.f32 2.0, %v2865_v56  ;;  %v2607_v24 = vpop.xlane.xlu2 %2606  ;;  %v2550_v20 = vshll.u32 %v2549_v19, 16  ;;  %v7023_v23 = vshll.u32 %v2684_v39, 16  ;;  %v3104_v49 = vadd.f32 %v3008_v28, %v6607_v18 }
 0x482   : > { %v3185_v58 = vmin.f32 %v3137_v37, 4.0  ;;  %v2954_v40 = vadd.f32 1.0, %v2906_v44  ;;  %v2608_v15 = vcvt.f32.s32 %v2607_v24  ;;  %v2532_v46 = vpop.xlane.xlu1 %2531  ;;  %v2772_v25 = vpop.xlane.xlu0 %2771  ;;  %v7750_v37 = vsel %vm6973_vm2, %v6883_v63, %v6960_v14 }
 0x483   : > { %v2961_v22 = vadd.f32 1.0, %v2913_v21  ;;  %v2773_v41 = vcvt.f32.s32 %v2772_v25  ;;  %v7015_v47 = vsel %vm6993_vm3, %v6978_v4, %v7750_v37  ;;  %v3134_v44 = vmax.f32 %v3086_v43, 0.0 }
 0x484   : > { %v2611_v7 = vadd.s32 %v2610_v27, %v2608_v15  ;;  %v3235_v55 = vmul.f32 13.0, %v3185_v58  ;;  %v3002_v48 = vmul.f32 0.0952381, %v2954_v40  ;;  %v2953_v62 = vadd.f32 1.0, %v2905_v17 }
 0x485   : > { %v3009_v56 = vmul.f32 0.0952381, %v2961_v22  ;;  %v2776_v12 = vadd.s32 %v2775_v42, %v2773_v41  ;;  %v2854_v63 = vcvt.s32.f32 %v2596_v36  ;;  %v2789_v4 = vcvt.f32.s32 %v6367_v5  ;;  %v7751_v42 = vld [vmem:[#allocation16_spill] sm:$0xff] }
 0x486   : > { %v2855_v27 = vcvt.s32.f32 %v2611_v7  ;;  %3254 = vrot.lane.b32.xlu2 %v3235_v55, %s4199_s14  ;;  %v3098_v52 = vadd.f32 %v3002_v48, %v6648_v31  ;;  %v2729_v55 = vcvt.f32.s32 %v6191_v35  ;;  %v2533_v24 = vcvt.f32.s32 %v2532_v46 }
 0x487   : > { %v3105_v50 = vadd.f32 %v3009_v56, %v6640_v10  ;;  %v2866_v11 = vcvt.s32.f32 %v2776_v12  ;;  %v3182_v39 = vmin.f32 %v3134_v44, 4.0  ;;  %v3001_v40 = vmul.f32 0.0952381, %v2953_v62 }
 0x488   : > { %v2903_v14 = vmul.f32 2.0, %v2855_v27  ;;  %v2902_v5 = vmul.f32 2.0, %v2854_v63  ;;  %v3152_v17 = vmax.f32 %v3104_v49, 0.0  ;;  %v3146_v22 = vmax.f32 %v3098_v52, 0.0 }
 0x489   : > { %v3153_v7 = vmax.f32 %v3105_v50, 0.0  ;;  %v2787_v21 = vpop.xlane.xlu2 %2786  ;;  %v2914_v2 = vmul.f32 2.0, %v2866_v11  ;;  %v2790_v46 = vshll.u32 %v2789_v4, 16  ;;  %v2536_v41 = vadd.s32 %v6986_v57, %v2533_v24 }
 0x48a   : > { %v2951_v19 = vadd.f32 1.0, %v2903_v14  ;;  %v2667_v58 = vpop.xlane.xlu1 %2666  ;;  %v2547_v10 = vpop.xlane.xlu0 %2546  ;;  %v7033_v56 = vshll.u32 %v2729_v55, 16  ;;  %v2804_v37 = vcvt.f32.s32 %v6461_v45  ;;  %v3097_v27 = vadd.f32 %v3001_v40, %v6598_v38 }
 0x48b   : > { %v3201_v15 = vmin.f32 %v3153_v7, 4.0  ;;  %v2668_v25 = vcvt.f32.s32 %v2667_v58  ;;  %3522 = vrot.lane.b32.xlu1 %v7751_v42, %s4198_s13  ;;  %v2962_v43 = vadd.f32 1.0, %v2914_v2  ;;  %v2548_v31 = vcvt.f32.s32 %v2547_v10 }
 0x48c   : > { %v2999_v18 = vmul.f32 0.0952381, %v2951_v19  ;;  %v2950_v44 = vadd.f32 1.0, %v2902_v5  ;;  %v3200_v63 = vmin.f32 %v3152_v17, 4.0  ;;  %v3194_v14 = vmin.f32 %v3146_v22, 4.0 }
 0x48d   : > { %v2671_v35 = vadd.s32 %v6990_v59, %v2668_v25  ;;  %v3463_v36 = vmul.f32 23.0, %v3201_v15  ;;  %v3010_v28 = vmul.f32 0.0952381, %v2962_v43  ;;  %v2551_v48 = vadd.s32 %v2550_v20, %v2548_v31 }
 0x48e   : > { %v3095_v62 = vadd.f32 %v2999_v18, %v6874_v60  ;;  %v3232_v20 = vmul.f32 13.0, %v3182_v39  ;;  %v2850_v4 = vcvt.s32.f32 %v2536_v41  ;;  %v2788_v52 = vcvt.f32.s32 %v2787_v21 }
 0x48f   : > { %v2859_v12 = vcvt.s32.f32 %v2671_v35  ;;  %3482 = vrot.lane.b32.xlu0 %v3463_v36, %s4199_s14  ;;  %v3106_v59 = vadd.f32 %v3010_v28, %v6771_v0  ;;  %v2851_v50 = vcvt.s32.f32 %v2551_v48  ;;  %v3145_v55 = vmax.f32 %v3097_v27, 0.0 }
 0x490   : > { %v2998_v0 = vmul.f32 0.0952381, %v2950_v44  ;;  %v3143_v60 = vmax.f32 %v3095_v62, 0.0  ;;  %v3351_v21 = vmul.f32 30.0, %v3194_v14  ;;  %v2898_v25 = vmul.f32 2.0, %v2850_v4 }
 0x491   : > { %v2907_v57 = vmul.f32 2.0, %v2859_v12  ;;  %v2562_v11 = vpop.xlane.xlu2 %2561  ;;  %v3154_v49 = vmax.f32 %v3106_v59, 0.0  ;;  %v2899_v45 = vmul.f32 2.0, %v2851_v50  ;;  %v2791_v42 = vadd.s32 %v2790_v46, %v2788_v52 }
 0x492   : > { %v2712_v7 = vpop.xlane.xlu1 %2711  ;;  %v7040_v38 = vpop.xlane.xlu0 %2681  ;;  %v2563_v24 = vcvt.f32.s32 %v2562_v11  ;;  %v2805_v43 = vshll.u32 %v2804_v37, 16  ;;  %v3193_v35 = vmin.f32 %v3145_v55, 4.0  ;;  %v3094_v36 = vadd.f32 %v2998_v0, %v6635_v3 }
 0x493   : > { %v2955_v19 = vadd.f32 1.0, %v2907_v57  ;;  %v2713_v2 = vcvt.f32.s32 %v2712_v7  ;;  %3248 = vrot.lane.b32.xlu1 %v3232_v20, %s4199_s14  ;;  %v3202_v58 = vmin.f32 %v3154_v49, 4.0  ;;  %v2947_v10 = vadd.f32 1.0, %v2899_v45 }
 0x494   : > { %v2566_v39 = vadd.s32 %v7001_v8, %v2563_v24  ;;  %v3191_v41 = vmin.f32 %v3143_v60, 4.0  ;;  %v3462_v27 = vmul.f32 23.0, %v3200_v63  ;;  %v2946_v37 = vadd.f32 1.0, %v2898_v25 }
 0x495   : > { %v3003_v40 = vmul.f32 0.0952381, %v2955_v19  ;;  %v2716_v15 = vadd.s32 %v7017_v34, %v2713_v2  ;;  %v2995_v5 = vmul.f32 0.0952381, %v2947_v10  ;;  %v3464_v18 = vmul.f32 23.0, %v3202_v58 }
 0x496   : > { %v2852_v17 = vcvt.s32.f32 %v2566_v39  ;;  %v2867_v12 = vcvt.s32.f32 %v2791_v42  ;;  %v3348_v4 = vmul.f32 30.0, %v3191_v41  ;;  %v7752_v52 = vand.u32 2147483647, %v6764_v32 }
 0x497   : > { %v3099_v31 = vadd.f32 %v3003_v40, %v6856_v6  ;;  %v2862_v22 = vcvt.s32.f32 %v2716_v15  ;;  %3371 = vrot.lane.b32.xlu0 %v3351_v21, %s4199_s14  ;;  %v3091_v8 = vadd.f32 %v2995_v5, %v6885_v1  ;;  %3484 = vrot.lane.b32.xlu2 %v3464_v18, %s4199_s14  ;;  %v2683_v6 = vcvt.f32.s32 %v7040_v38 }
 0x498   : > { %v2900_v28 = vmul.f32 2.0, %v2852_v17  ;;  %vm7055_vm4 = vcmp.eq.f32.partialorder %v7752_v52, 8.507059e+37  ;;  %v2819_v55 = vcvt.f32.s32 %v6512_v29  ;;  %v3142_v19 = vmax.f32 %v3094_v36, 0.0 }
 0x499   : > { %v3147_v34 = vmax.f32 %v3099_v31, 0.0  ;;  %v2910_v46 = vmul.f32 2.0, %v2862_v22  ;;  %v2697_v48 = vpop.xlane.xlu2 %2696  ;;  %v3139_v1 = vmax.f32 %v3091_v8, 0.0  ;;  %v2994_v24 = vmul.f32 0.0952381, %v2946_v37 }
 0x49a   : > { %v2698_v44 = vcvt.f32.s32 %v2697_v48  ;;  %v2802_v62 = vpop.xlane.xlu1 %2801  ;;  %v2727_v59 = vpop.xlane.xlu0 %2726  ;;  %v2948_v14 = vadd.f32 1.0, %v2900_v28  ;;  %v2915_v0 = vmul.f32 2.0, %v2867_v12  ;;  %v1760_v32 = vmul.f32 2.0, %v7015_v47 }
 0x49b   : > { %v3195_v50 = vmin.f32 %v3147_v34, 4.0  ;;  %v2958_v3 = vadd.f32 1.0, %v2910_v46  ;;  %v2803_v57 = vcvt.f32.s32 %v2802_v62  ;;  %3480 = vrot.lane.b32.xlu1 %v3462_v27, %s4199_s14  ;;  %v2728_v20 = vcvt.f32.s32 %v2727_v59 }
 0x49c   : > { %v2701_v11 = vadd.s32 %v7019_v54, %v2698_v44  ;;  %v2996_v49 = vmul.f32 0.0952381, %v2948_v14  ;;  %v3187_v58 = vmin.f32 %v3139_v1, 4.0  ;;  %v2686_v10 = vadd.s32 %v7023_v23, %v2683_v6  ;;  %v7756_v6 = vld [vmem:[#allocation15_spill] sm:$0xff] }
 0x49d   : > { %v3006_v63 = vmul.f32 0.0952381, %v2958_v3  ;;  %v2806_v7 = vadd.s32 %v2805_v43, %v2803_v57  ;;  %v3352_v38 = vmul.f32 30.0, %v3195_v50  ;;  %v2731_v2 = vadd.s32 %v7033_v56, %v2728_v20 }
 0x49e   : > { %v3092_v54 = vadd.f32 %v2996_v49, %v6939_v33  ;;  %v2861_v40 = vcvt.s32.f32 %v2701_v11  ;;  %v3350_v25 = vmul.f32 30.0, %v3193_v35  ;;  %v2820_v33 = vshll.u32 %v2819_v55, 16 }
 0x49f   : > { %v2868_v60 = vcvt.s32.f32 %v2806_v7  ;;  %3365 = vrot.lane.b32.xlu0 %v3348_v4, %s4199_s14  ;;  %v2863_v39 = vcvt.s32.f32 %v2731_v2  ;;  %3373 = vrot.lane.b32.xlu2 %v3352_v38, %s4199_s14  ;;  %v3102_v15 = vadd.f32 %v3006_v63, %v6930_v9  ;;  %v3190_v42 = vmin.f32 %v3142_v19, 4.0 }
 0x4a0   : > { %v3140_v29 = vmax.f32 %v3092_v54, 0.0  ;;  %v3090_v5 = vadd.f32 %v2994_v24, %v6769_v26  ;;  %v2963_v43 = vadd.f32 1.0, %v2915_v0  ;;  %v2860_v22 = vcvt.s32.f32 %v2686_v10 }
 0x4a1   : > { %v2916_v21 = vmul.f32 2.0, %v2868_v60  ;;  %v7067_v56 = vpop.permute.xlu2 %3415  ;;  %v2911_v18 = vmul.f32 2.0, %v2863_v39  ;;  %v2909_v36 = vmul.f32 2.0, %v2861_v40  ;;  %v3237_v9 = vmul.f32 13.0, %v3187_v58 }
 0x4a2   : > { %v2817_v47 = vpop.xlane.xlu0 %2816  ;;  %v3188_v31 = vmin.f32 %v3140_v29, 4.0  ;;  %v3150_v8 = vmax.f32 %v3102_v15, 0.0  ;;  %v7755_v26 = vsel %vm6923_vm8, %v6813_v30, %v6915_v13  ;;  %v1855_v48 = vmul.f32 0.1904762, %v6949_v61 }
 0x4a3   : > { %v2964_v23 = vadd.f32 1.0, %v2916_v21  ;;  %v2818_v17 = vcvt.f32.s32 %v2817_v47  ;;  %3369 = vrot.lane.b32.xlu1 %v3350_v25, %s4199_s14  ;;  %v2959_v41 = vadd.f32 1.0, %v2911_v18  ;;  %v1495_v46 = vsel %vm7055_vm4, %v6910_v51, %v7755_v26 }
 0x4a4   : > { %v3238_v35 = vmul.f32 13.0, %v3188_v31  ;;  %v1850_v27 = vmul.f32 0.1904762, %v6951_v53  ;;  %v3138_v12 = vmax.f32 %v3090_v5, 0.0  ;;  %v1752_v44 = vmul.f32 2.0, %v7756_v6  ;;  %v7757_v53 = vld [vmem:[#allocation102_spill] sm:$0xff] }
 0x4a5   : > { %v3012_v34 = vmul.f32 0.0952381, %v2964_v23  ;;  %v2821_v28 = vadd.s32 %v2820_v33, %v2818_v17  ;;  %v3007_v37 = vmul.f32 0.0952381, %v2959_v41  ;;  %v3857_v62 = vadd.f32 -1.0, %v1760_v32  ;;  %v7759_v23 = vld [vmem:[#allocation74_spill] sm:$0xff] }
 0x4a6   : > { %v3011_v16 = vmul.f32 0.0952381, %v2963_v43  ;;  %v2908_v50 = vmul.f32 2.0, %v2860_v22  ;;  %v3347_v30 = vmul.f32 30.0, %v3190_v42  ;;  %v3198_v13 = vmin.f32 %v3150_v8, 4.0  ;;  %v7758_v42 = vld [vmem:[#allocation29_spill] sm:$0xff] }
 0x4a7   : > { %v2869_v59 = vcvt.s32.f32 %v2821_v28  ;;  %3258 = vrot.lane.b32.xlu0 %v3237_v9, %s4199_s14  ;;  %v3103_v14 = vadd.f32 %v3007_v37, %v1850_v27  ;;  %3260 = vrot.lane.b32.xlu2 %v3238_v35, %s4199_s14  ;;  %v2957_v51 = vadd.f32 1.0, %v2909_v36  ;;  %v3108_v3 = vadd.f32 %v3012_v34, %v1855_v48  ;;  %v7760_v8 = vld [vmem:[#allocation92_spill] sm:$0xff]  ;;  %v7762_v27 = vld [vmem:[#allocation51_spill] sm:$0xff] }
 0x4a8   : > { %v1854_v1 = vmul.f32 0.1904762, %v7757_v53  ;;  %v1751_v20 = vmul.f32 2.0, %v1495_v46  ;;  %v3849_v4 = vadd.f32 -1.0, %v1752_v44  ;;  %v1856_v49 = vmul.f32 0.1904762, %v3857_v62 }
 0x4a9   : > { %v2917_v61 = vmul.f32 2.0, %v2869_v59  ;;  %v7084_v57 = vpop.permute.xlu2 %3520  ;;  %v3151_v11 = vmax.f32 %v3103_v14, 0.0  ;;  %v3186_v52 = vmin.f32 %v3138_v12, 4.0  ;;  %v2956_v7 = vadd.f32 1.0, %v2908_v50  ;;  %v7761_v35 = vld [vmem:[#allocation32_spill] sm:$0xff] }
 0x4aa   : > { %v3107_v45 = vadd.f32 %v3011_v16, %v1854_v1  ;;  %v3005_v55 = vmul.f32 0.0952381, %v2957_v51  ;;  %v3156_v19 = vmax.f32 %v3108_v3, 0.0  ;;  %v3460_v2 = vmul.f32 23.0, %v3198_v13  ;;  %v7763_v51 = vld [vmem:[#allocation90_spill] sm:$0xff] }
 0x4ab   : > { %v2965_v63 = vadd.f32 1.0, %v2917_v61  ;;  %3363 = vrot.lane.b32.xlu1 %v3347_v30, %s4199_s14  ;;  %v3199_v38 = vmin.f32 %v3151_v11, 4.0  ;;  %v3848_v54 = vadd.f32 -1.0, %v1751_v20  ;;  %v1848_v60 = vmul.f32 0.1904762, %v3849_v4  ;;  %v7764_v61 = vld [vmem:[#allocation21_spill] sm:$0xff] }
 0x4ac   : > { %v3155_v58 = vmax.f32 %v3107_v45, 0.0  ;;  %v3004_v10 = vmul.f32 0.0952381, %v2956_v7  ;;  %v3204_v39 = vmin.f32 %v3156_v19, 4.0  ;;  %v3236_v21 = vmul.f32 13.0, %v3186_v52 }
 0x4ad   : > { %v3013_v24 = vmul.f32 0.0952381, %v2965_v63  ;;  %v3461_v0 = vmul.f32 23.0, %v3199_v38  ;;  %v3101_v40 = vadd.f32 %v3005_v55, %v1848_v60  ;;  %v1847_v25 = vmul.f32 0.1904762, %v3848_v54 }
 0x4ae   : > { %v3203_v5 = vmin.f32 %v3155_v58, 4.0  ;;  %v3466_v43 = vmul.f32 23.0, %v3204_v39  ;;  %v3769_v17 = vmul.f32 -1.442695, %v7759_v23  ;;  %v2579_v3 = vcvt.f32.s32 %v7763_v51  ;;  %v7765_v58 = vld [vmem:[#allocation91_spill] sm:$0xff] }
 0x4af   : > { %v3109_v32 = vadd.f32 %v3013_v24, %v1856_v49  ;;  %3476 = vrot.lane.b32.xlu0 %v3460_v2, %s4199_s14  ;;  %3478 = vrot.lane.b32.xlu2 %v3461_v0, %s4199_s14  ;;  %v3100_v18 = vadd.f32 %v3004_v10, %v1847_v25  ;;  %v3149_v47 = vmax.f32 %v3101_v40, 0.0 }
 0x4b0   : > { %v3465_v9 = vmul.f32 23.0, %v3203_v5  ;;  %4167 = vpow2.f32 %v3769_v17  ;;  %v2580_v4 = vshll.u32 %v2579_v3, 16 }
 0x4b1   : > { %v3157_v29 = vmax.f32 %v3109_v32, 0.0  ;;  %v3368_v15 = vpop.permute.xlu2 %3367  ;;  %v3148_v22 = vmax.f32 %v3100_v18, 0.0  ;;  %v3197_v36 = vmin.f32 %v3149_v47, 4.0  ;;  %v7769_v18 = vld [vmem:[#allocation3_spill] sm:$0xff] }
 0x4b2   : > { %3876 = vst.msk [vmem:[%s4665_s12 + $0x50] sm:$0xff] %vm3272_vm6, %v3368_v15  ;;  %v7111_v6 = vpop.permute.xlu1 %3417 }
 0x4b3   : > { %v3205_v33 = vmin.f32 %v3157_v29, 4.0  ;;  %3884 = vst.msk [vmem:[%s4665_s12 + $0x50] sm:$0xff] %vm3313_vm7, %v7758_v42  ;;  %3256 = vrot.lane.b32.xlu1 %v3236_v21, %s4199_s14  ;;  %v3196_v34 = vmin.f32 %v3148_v22, 4.0  ;;  %v3354_v28 = vmul.f32 30.0, %v3197_v36  ;;  %v7766_v29 = vld [vmem:[#allocation5_spill] sm:$0xff]  ;;  %v7768_v42 = vld [vmem:[#allocation22_spill] sm:$0xff] }
 0x4b4   : > { %v7771_v36 = vld [vmem:[#allocation57_spill] sm:$0xff] }
 0x4b5   : > { %v3467_v31 = vmul.f32 23.0, %v3205_v33  ;;  %v3353_v26 = vmul.f32 30.0, %v3196_v34  ;;  %v3519_v50 = vpop.permute.xlu0 %3518  ;;  %v7767_v33 = vld [vmem:[#allocation54_spill] sm:$0xff] }
 0x4b6   : > { %v4168_v46 = vpop.eup %4167 }
 0x4b7   : > { %3488 = vrot.lane.b32.xlu0 %v3466_v43, %s4199_s14  ;;  %3490 = vrot.lane.b32.xlu2 %v3467_v31, %s4199_s14  ;;  %v1255_v48 = vadd.f32 1.0, %v4168_v46  ;;  %v7770_v31 = vld [vmem:[#allocation69_spill] sm:$0xff]  ;;  %v7775_v46 = vld [vmem:[#allocation24_spill] sm:$0xff] }
 0x4b9   : > { %v3251_v41 = vpop.permute.xlu2 %3250  ;;  %4169 = vrcp.f32 %v1255_v48  ;;  %v1388_v14 = vand.u32 2147483648, %v1255_v48  ;;  %vm1382_vm10 = vweird.f32 %v1255_v48  ;;  %v1386_v13 = vand.u32 2147483647, %v1255_v48 }
 0x4ba   : > { %3274 = vst.msk [vmem:[%s4665_s12 + $0x8] sm:$0xff] %vm3272_vm6, %v3251_v41  ;;  %v7113_v59 = vpop.permute.xlu1 %3516 }
 0x4bb   : > { %3315 = vst.msk [vmem:[%s4665_s12 + $0x8] sm:$0xff] %vm3313_vm7, %v7760_v8  ;;  %3486 = vrot.lane.b32.xlu1 %v3465_v9, %s4199_s14  ;;  %v1389_v1 = vor.u32 1.1754944e-38, %v1388_v14  ;;  %vm1387_vm12 = vcmp.eq.f32.partialorder %v1386_v13, 8.507059e+37  ;;  %v7772_v9 = vld [vmem:[#allocation28_spill] sm:$0xff]  ;;  %v7773_v8 = vld [vmem:[#allocation93_spill] sm:$0xff] }
 0x4bd   : > { %v3525_v45 = vpop.permute.xlu0 %3524 }
 0x4bf   : > { %3377 = vrot.lane.b32.xlu0 %v3354_v28, %s4199_s14  ;;  %3526 = vrot.lane.b32.xlu2 %v7761_v35, %s4198_s13  ;;  %v4170_v37 = vpop.eup %4169  ;;  %v7774_v28 = vld [vmem:[#allocation2_spill] sm:$0xff] }
 0x4c0   : > { %v1378_v12 = vmul.f32 %v4170_v37, %v1255_v48  ;;  %vm1383_vm9 = vweird.f32 %v4170_v37 }
 0x4c1   : > { %vm1384_vm11 = vmor %vm1382_vm10, %vm1383_vm9 }
 0x4c2   : > { %v1379_v44 = vsub.f32 1.0, %v1378_v12 }
 0x4c3   : > { %3375 = vrot.lane.b32.xlu1 %v3353_v26, %s4199_s14 }
 0x4c4   : > { %v1380_v62 = vmul.f32 %v4170_v37, %v1379_v44 }
 0x4c6   : > { %v1381_v16 = vadd.f32 %v4170_v37, %v1380_v62 }
 0x4c7   : > { %3530 = vrot.lane.b32.xlu0 %v7762_v27, %s4198_s13 }
 0x4c8   : > { %v1385_v53 = vsel %vm1384_vm11, %v4170_v37, %v1381_v16  ;;  %v7776_v16 = vld [vmem:[#allocation18_spill] sm:$0xff] }
 0x4c9   : > { %v1390_v11 = vsel %vm1387_vm12, %v1389_v1, %v1385_v53 }
 0x4ca   : > { %v1744_v63 = vmul.f32 2.0, %v1390_v11 }
 0x4cc   : > { %v3841_v38 = vadd.f32 -1.0, %v1744_v63 }
 0x4ce   : > { %v1840_v24 = vmul.f32 0.1904762, %v3841_v38 }
 0x4e0   : > { %v3255_v30 = vpop.permute.xlu2 %3254 }
 0x4e1   : > { %3276 = vst.msk [vmem:[%s4665_s12 + $0x18] sm:$0xff] %vm3272_vm6, %v3255_v30 }
 0x4e2   : > { %3317 = vst.msk [vmem:[%s4665_s12 + $0x18] sm:$0xff] %vm3313_vm7, %v7764_v61 }
 0x4e5   : > { %v2577_v20 = vpop.xlane.xlu1 %2576 }
 0x4e6   : > { %v2578_v49 = vcvt.f32.s32 %v2577_v20 }
 0x4e8   : > { %v2581_v52 = vadd.s32 %v2580_v4, %v2578_v49 }
 0x4ea   : > { %v2853_v7 = vcvt.s32.f32 %v2581_v52 }
 0x4ec   : > { %v2901_v55 = vmul.f32 2.0, %v2853_v7 }
 0x4ee   : > { %v2949_v19 = vadd.f32 1.0, %v2901_v55 }
 0x4f0   : > { %v2997_v2 = vmul.f32 0.0952381, %v2949_v19 }
 0x4f1   : > { %v3253_v0 = vpop.permute.xlu0 %3252  ;;  %v3485_v60 = vpop.permute.xlu2 %3484 }
 0x4f2   : > { %v3093_v54 = vadd.f32 %v2997_v2, %v1840_v24  ;;  %3275 = vst.msk [vmem:[%s4665_s12 + $0x10] sm:$0xff] %vm3272_vm6, %v3253_v0 }
 0x4f3   : > { %3910 = vst.msk [vmem:[%s4665_s12 + $0xa0] sm:$0xff] %vm3272_vm6, %v3485_v60 }
 0x4f4   : > { %v3141_v32 = vmax.f32 %v3093_v54, 0.0  ;;  %3918 = vst.msk [vmem:[%s4665_s12 + $0xa0] sm:$0xff] %vm3313_vm7, %v3525_v45 }
 0x4f5   : > { %3316 = vst.msk [vmem:[%s4665_s12 + $0x10] sm:$0xff] %vm3313_vm7, %v7765_v58 }
 0x4f6   : > { %v3189_v10 = vmin.f32 %v3141_v32, 4.0 }
 0x4f8   : > { %v3239_v40 = vmul.f32 13.0, %v3189_v10 }
 0x4f9   : > { %v3374_v39 = vpop.permute.xlu2 %3373 }
 0x4fa   : > { %3262 = vrot.lane.b32.xlu1 %v3239_v40, %s4199_s14  ;;  %3879 = vst.msk [vmem:[%s4665_s12 + $0x68] sm:$0xff] %vm3272_vm6, %v3374_v39 }
 0x4fb   : > { %3887 = vst.msk [vmem:[%s4665_s12 + $0x68] sm:$0xff] %vm3313_vm7, %v7766_v29 }
 0x4fd   : > { %v3523_v15 = vpop.permute.xlu1 %3522 }
 0x501   : > { %v3483_v21 = vpop.permute.xlu0 %3482  ;;  %v3261_v25 = vpop.permute.xlu2 %3260 }
 0x502   : > { %3909 = vst.msk [vmem:[%s4665_s12 + $0x98] sm:$0xff] %vm3272_vm6, %v3483_v21  ;;  %3528 = vrot.lane.b32.xlu1 %v7767_v33, %s4198_s13 }
 0x503   : > { %3279 = vst.msk [vmem:[%s4665_s12 + $0x30] sm:$0xff] %vm3272_vm6, %v3261_v25 }
 0x504   : > { %3320 = vst.msk [vmem:[%s4665_s12 + $0x30] sm:$0xff] %vm3313_vm7, %v7768_v42 }
 0x505   : > { %3917 = vst.msk [vmem:[%s4665_s12 + $0x98] sm:$0xff] %vm3313_vm7, %v3523_v15  ;;  %v3249_v5 = vpop.permute.xlu1 %3248 }
 0x506   : > { %3273 = vst.msk [vmem:[%s4665_s12] sm:$0xff] %vm3272_vm6, %v3249_v5 }
 0x507   : > { %3314 = vst.msk [vmem:[%s4665_s12] sm:$0xff] %vm3313_vm7, %v7769_v18 }
 0x509   : > { %v3372_v47 = vpop.permute.xlu0 %3371  ;;  %v3479_v43 = vpop.permute.xlu2 %3478 }
 0x50a   : > { %3878 = vst.msk [vmem:[%s4665_s12 + $0x60] sm:$0xff] %vm3272_vm6, %v3372_v47 }
 0x50b   : > { %3907 = vst.msk [vmem:[%s4665_s12 + $0x88] sm:$0xff] %vm3272_vm6, %v3479_v43 }
 0x50c   : > { %3915 = vst.msk [vmem:[%s4665_s12 + $0x88] sm:$0xff] %vm3313_vm7, %v3519_v50 }
 0x50d   : > { %3886 = vst.msk [vmem:[%s4665_s12 + $0x60] sm:$0xff] %vm3313_vm7, %v7770_v31  ;;  %v3481_v23 = vpop.permute.xlu1 %3480 }
 0x50e   : > { %3908 = vst.msk [vmem:[%s4665_s12 + $0x90] sm:$0xff] %vm3272_vm6, %v3481_v23 }
 0x50f   : > { %3916 = vst.msk [vmem:[%s4665_s12 + $0x90] sm:$0xff] %vm3313_vm7, %v7084_v57 }
 0x511   : > { %v3366_v17 = vpop.permute.xlu0 %3365  ;;  %v3491_v22 = vpop.permute.xlu2 %3490 }
 0x512   : > { %3875 = vst.msk [vmem:[%s4665_s12 + $0x48] sm:$0xff] %vm3272_vm6, %v3366_v17 }
 0x513   : > { %3913 = vst.msk [vmem:[%s4665_s12 + $0xb8] sm:$0xff] %vm3272_vm6, %v3491_v22 }
 0x514   : > { %3883 = vst.msk [vmem:[%s4665_s12 + $0x48] sm:$0xff] %vm3313_vm7, %v7771_v36 }
 0x515   : > { %v3370_v41 = vpop.permute.xlu1 %3369 }
 0x516   : > { %3877 = vst.msk [vmem:[%s4665_s12 + $0x58] sm:$0xff] %vm3272_vm6, %v3370_v41 }
 0x517   : > { %3885 = vst.msk [vmem:[%s4665_s12 + $0x58] sm:$0xff] %vm3313_vm7, %v7772_v9 }
 0x519   : > { %v3259_v57 = vpop.permute.xlu0 %3258  ;;  %v3527_v37 = vpop.permute.xlu2 %3526 }
 0x51a   : > { %3278 = vst.msk [vmem:[%s4665_s12 + $0x28] sm:$0xff] %vm3272_vm6, %v3259_v57 }
 0x51b   : > { %3319 = vst.msk [vmem:[%s4665_s12 + $0x28] sm:$0xff] %vm3313_vm7, %v7773_v8 }
 0x51d   : > { %v3364_v34 = vpop.permute.xlu1 %3363 }
 0x51e   : > { %3874 = vst.msk [vmem:[%s4665_s12 + $0x40] sm:$0xff] %vm3272_vm6, %v3364_v34 }
 0x51f   : > { %3882 = vst.msk [vmem:[%s4665_s12 + $0x40] sm:$0xff] %vm3313_vm7, %v7774_v28 }
 0x521   : > { %v3477_v35 = vpop.permute.xlu0 %3476 }
 0x522   : > { %3906 = vst.msk [vmem:[%s4665_s12 + $0x80] sm:$0xff] %vm3272_vm6, %v3477_v35 }
 0x523   : > { %3914 = vst.msk [vmem:[%s4665_s12 + $0x80] sm:$0xff] %vm3313_vm7, %v7113_v59 }
 0x525   : > { %v3257_v26 = vpop.permute.xlu1 %3256 }
 0x526   : > { %3277 = vst.msk [vmem:[%s4665_s12 + $0x20] sm:$0xff] %vm3272_vm6, %v3257_v26 }
 0x527   : > { %3318 = vst.msk [vmem:[%s4665_s12 + $0x20] sm:$0xff] %vm3313_vm7, %v7775_v46 }
 0x529   : > { %v3489_v48 = vpop.permute.xlu0 %3488 }
 0x52a   : > { %3912 = vst.msk [vmem:[%s4665_s12 + $0xb0] sm:$0xff] %vm3272_vm6, %v3489_v48 }
 0x52d   : > { %v3487_v27 = vpop.permute.xlu1 %3486 }
 0x52e   : > { %3911 = vst.msk [vmem:[%s4665_s12 + $0xa8] sm:$0xff] %vm3272_vm6, %v3487_v27 }
 0x52f   : > { %3919 = vst.msk [vmem:[%s4665_s12 + $0xa8] sm:$0xff] %vm3313_vm7, %v3527_v37 }
 0x531   : > { %v3378_v12 = vpop.permute.xlu0 %3377 }
 0x532   : > { %3881 = vst.msk [vmem:[%s4665_s12 + $0x78] sm:$0xff] %vm3272_vm6, %v3378_v12 }
 0x533   : > { %3889 = vst.msk [vmem:[%s4665_s12 + $0x78] sm:$0xff] %vm3313_vm7, %v7111_v6 }
 0x535   : > { %v3376_v44 = vpop.permute.xlu1 %3375 }
 0x536   : > { %3880 = vst.msk [vmem:[%s4665_s12 + $0x70] sm:$0xff] %vm3272_vm6, %v3376_v44 }
 0x537   : > { %3888 = vst.msk [vmem:[%s4665_s12 + $0x70] sm:$0xff] %vm3313_vm7, %v7067_v56 }
 0x539   : > { %v3531_v62 = vpop.permute.xlu0 %3530 }
 0x53a   : > { %3921 = vst.msk [vmem:[%s4665_s12 + $0xb8] sm:$0xff] %vm3313_vm7, %v3531_v62 }
 0x56c   : > { %v3263_v59 = vpop.permute.xlu1 %3262 }
 0x56d   : > { %3280 = vst.msk [vmem:[%s4665_s12 + $0x38] sm:$0xff] %vm3272_vm6, %v3263_v59 }
 0x56e   : > { %3321 = vst.msk [vmem:[%s4665_s12 + $0x38] sm:$0xff] %vm3313_vm7, %v7776_v16 }
 0x574   : > { %v3529_v50 = vpop.permute.xlu1 %3528 }
 0x575   : > { %3920 = vst.msk [vmem:[%s4665_s12 + $0xb0] sm:$0xff] %vm3313_vm7, %v3529_v50 }
 0x576 PF: > { %s15_s17 = sadd.s32 1, %s4193_s17   ;;  %s7777_s15 = smov %s4189_s16 }
 0x577   : > { %p12_p5 = scmp.ge.s32.totalorder %s15_s17, 4   ;;  %s7778_s16 = smov %s7780_s18 }
 0x579   :  { %14 = sbr.rel (!%p12_p5) target bundleno = 2 (0x2), region = 78 }

</bundles_post_ra>
